<compile_context>
chip_gen: v5e
topology: v5e:2x2
jax: 0.10.0
libtpu: 0.0.40
codegen_flags: <defaults>
</compile_context>

<pallas_src>
import functools
import math

import jax
import jax.numpy as jnp
from jax.experimental import pallas as pl
from jax.experimental.pallas import tpu as pltpu

VMEM_SPEC = pl.BlockSpec(memory_space=pltpu.MemorySpace.VMEM)


# ------------------------------ fused kernel --------------------------------

def _decoder_stack_kernel(
    tgt_ref, mem_ref,
    sa_wqkv_ref, sa_bqkv_ref, sa_wo_ref, sa_bo_ref,
    ca_wqkv_ref, ca_bqkv_ref, ca_wo_ref, ca_bo_ref,
    ln1_g_ref, ln1_b_ref, ln2_g_ref, ln2_b_ref, ln3_g_ref, ln3_b_ref,
    ffn_w1_ref, ffn_b1_ref, ffn_w2_ref, ffn_b2_ref,
    out_w_ref, out_b_ref,
    o_ref,
    *, num_layers, nhead, T, S, B, d_model):
  D = d_model
  dh = D // nhead
  scale = 1.0 / math.sqrt(dh)
  eps = 1e-5

  x = tgt_ref[...].astype(jnp.float32)      # (B*T, D), batch-major rows
  mem = mem_ref[...].astype(jnp.float32)    # (B*S, D), batch-major rows

  def mha(q_src, kv_src, Tk, wqkv, bqkv, wo, bo):
    # q_src: (B*T, D); kv_src: (B*Tk, D); wqkv: (D, 3D) packed [q | k | v].
    q = jnp.dot(q_src, wqkv[:, :D], preferred_element_type=jnp.float32) + bqkv[:, :D]
    kv = jnp.dot(kv_src, wqkv[:, D:], preferred_element_type=jnp.float32) + bqkv[:, D:]
    k = kv[:, :D]
    v = kv[:, D:]

    batch_outs = []
    for b in range(B):                       # static, fully unrolled
      qb = q[b * T:(b + 1) * T, :]           # contiguous static row slice
      kb = k[b * Tk:(b + 1) * Tk, :]
      vb = v[b * Tk:(b + 1) * Tk, :]
      head_outs = []
      for h in range(nhead):                 # static lane slices, no transposes
        sl = slice(h * dh, (h + 1) * dh)
        # (T, dh) . (Tk, dh)^T  ->  (T, Tk), contraction on the minor dim.
        s = jax.lax.dot_general(
            qb[:, sl] * scale, kb[:, sl],
            (((1,), (1,)), ((), ())),
            preferred_element_type=jnp.float32)
        m = jnp.max(s, axis=-1, keepdims=True)
        p = jnp.exp(s - m)
        denom = jnp.sum(p, axis=-1, keepdims=True)
        p = p * pl.reciprocal(denom, approx=True)      # EUP vrcp, free slot
        head_outs.append(
            jnp.dot(p, vb[:, sl], preferred_element_type=jnp.float32))  # (T, dh)
      batch_outs.append(jnp.concatenate(head_outs, axis=-1))            # (T, D)
    o = jnp.concatenate(batch_outs, axis=0)                             # (B*T, D)
    return jnp.dot(o, wo, preferred_element_type=jnp.float32) + bo

  def add_ln(y, r, g, b):
    z = y + r
    mean = jnp.mean(z, axis=-1, keepdims=True)
    zc = z - mean
    var = jnp.mean(zc * zc, axis=-1, keepdims=True)
    return zc * jax.lax.rsqrt(var + eps) * g + b

  # post-norm (norm_first=False), relu activation, dropout = identity (eval)
  for l in range(num_layers):                # static unrolled layer loop
    sa = mha(x, x, T,
             sa_wqkv_ref[l], sa_bqkv_ref[l], sa_wo_ref[l], sa_bo_ref[l])
    x = add_ln(x, sa, ln1_g_ref[l], ln1_b_ref[l])

    ca = mha(x, mem, S,
             ca_wqkv_ref[l], ca_bqkv_ref[l], ca_wo_ref[l], ca_bo_ref[l])
    x = add_ln(x, ca, ln2_g_ref[l], ln2_b_ref[l])

    h1 = jnp.dot(x, ffn_w1_ref[l], preferred_element_type=jnp.float32) + ffn_b1_ref[l]
    h1 = jnp.maximum(h1, 0.0)
    ff = jnp.dot(h1, ffn_w2_ref[l], preferred_element_type=jnp.float32) + ffn_b2_ref[l]
    x = add_ln(x, ff, ln3_g_ref[l], ln3_b_ref[l])

  # output[-1]: last tgt time step of every batch (row b*T + T - 1), then
  # Linear(d_model, 1) folded into the same kernel (no extra launch).
  last = jnp.concatenate(
      [x[b * T + T - 1: b * T + T, :] for b in range(B)], axis=0)  # (B, D)
  o = jnp.dot(last, out_w_ref[...], preferred_element_type=jnp.float32) + out_b_ref[...]
  o_ref[...] = o.astype(o_ref.dtype)


# ------------------------------ forward wrapper ------------------------------

def informer_decoder_forward(tgt, memory, params, nhead):
  """tgt: (T, B, D), memory: (S, B, D) -> (B, 1). Matches PyTorch semantics."""
  T, B, D = tgt.shape
  S = memory.shape[0]
  L = params["sa_wqkv"].shape[0]

  # One-time host-side reorder to batch-major 2-D slabs so per-batch rows are
  # contiguous inside the kernel (replaces the old per-attention transposes).
  tgt2 = tgt.transpose(1, 0, 2).reshape(B * T, D)
  mem2 = memory.transpose(1, 0, 2).reshape(B * S, D)

  kernel = functools.partial(
      _decoder_stack_kernel,
      num_layers=L, nhead=nhead, T=T, S=S, B=B, d_model=D)

  return pl.pallas_call(
      kernel,
      out_shape=jax.ShapeDtypeStruct((B, 1), jnp.float32),
      in_specs=[VMEM_SPEC] * 22,
      out_specs=VMEM_SPEC,
  )(tgt2, mem2,
    params["sa_wqkv"], params["sa_bqkv"], params["sa_wo"], params["sa_bo"],
    params["ca_wqkv"], params["ca_bqkv"], params["ca_wo"], params["ca_bo"],
    params["ln1_g"], params["ln1_b"], params["ln2_g"], params["ln2_b"],
    params["ln3_g"], params["ln3_b"],
    params["ffn_w1"], params["ffn_b1"], params["ffn_w2"], params["ffn_b2"],
    params["out_w"], params["out_b"])


# -------------------------------- param init --------------------------------

def init_params(key, d_model, nhead, num_decoder_layers, dim_feedforward):
  D, F, L = d_model, dim_feedforward, num_decoder_layers

  def dense(k, fan_in, fan_out):
    k1, k2 = jax.random.split(k)
    bound = 1.0 / math.sqrt(fan_in)
    w = jax.random.uniform(k1, (fan_in, fan_out), jnp.float32, -bound, bound)
    b = jax.random.uniform(k2, (1, fan_out), jnp.float32, -bound, bound)
    return w, b

  names = ("sa_wqkv", "sa_bqkv", "sa_wo", "sa_bo",
           "ca_wqkv", "ca_bqkv", "ca_wo", "ca_bo",
           "ffn_w1", "ffn_b1", "ffn_w2", "ffn_b2",
           "ln1_g", "ln1_b", "ln2_g", "ln2_b", "ln3_g", "ln3_b")
  stacks = {n: [] for n in names}

  keys = jax.random.split(key, L + 1)
  for lk in keys[:-1]:
    ks = jax.random.split(lk, 6)
    sa_wqkv, sa_bqkv = dense(ks[0], D, 3 * D)   # packed [q|k|v] in_proj
    sa_wo, sa_bo = dense(ks[1], D, D)
    ca_wqkv, ca_bqkv = dense(ks[2], D, 3 * D)
    ca_wo, ca_bo = dense(ks[3], D, D)
    w1, b1 = dense(ks[4], D, F)
    w2, b2 = dense(ks[5], F, D)
    vals = dict(
        sa_wqkv=sa_wqkv, sa_bqkv=sa_bqkv, sa_wo=sa_wo, sa_bo=sa_bo,
        ca_wqkv=ca_wqkv, ca_bqkv=ca_bqkv, ca_wo=ca_wo, ca_bo=ca_bo,
        ffn_w1=w1, ffn_b1=b1, ffn_w2=w2, ffn_b2=b2,
        ln1_g=jnp.ones((1, D), jnp.float32), ln1_b=jnp.zeros((1, D), jnp.float32),
        ln2_g=jnp.ones((1, D), jnp.float32), ln2_b=jnp.zeros((1, D), jnp.float32),
        ln3_g=jnp.ones((1, D), jnp.float32), ln3_b=jnp.zeros((1, D), jnp.float32))
    for n in names:
      stacks[n].append(vals[n])

  params = {n: jnp.stack(stacks[n], axis=0) for n in names}
  out_w, out_b = dense(keys[-1], D, 1)
  params["out_w"] = out_w
  params["out_b"] = out_b
  return params


# ----------------------------------- main ------------------------------------

if __name__ == "__main__":
  d_model = 32
  nhead = 4
  num_decoder_layers = 2
  dim_feedforward = 64
  T, S, B = 8, 10, 2   # tgt seq, memory seq, batch

  key = jax.random.PRNGKey(0)
  k_tgt, k_mem, k_par = jax.random.split(key, 3)
  tgt = jax.random.normal(k_tgt, (T, B, d_model), jnp.float32)
  memory = jax.random.normal(k_mem, (S, B, d_model), jnp.float32)
  params = init_params(k_par, d_model, nhead, num_decoder_layers, dim_feedforward)

  fwd = jax.jit(functools.partial(informer_decoder_forward, nhead=nhead))
  out = jax.block_until_ready(fwd(tgt, memory, params))
  assert out.shape == (B, 1), out.shape
  assert bool(jnp.all(jnp.isfinite(out)))
  print("KERNEL_OK")
</pallas_src>

<mosaic_0001>
module attributes {stable_mosaic.version = 11 : i64} {
  func.func @_decoder_stack_kernel(%arg0: memref<16x32xf32, #tpu.memory_space<vmem>>, %arg1: memref<20x32xf32, #tpu.memory_space<vmem>>, %arg2: memref<2x32x96xf32, #tpu.memory_space<vmem>>, %arg3: memref<2x1x96xf32, #tpu.memory_space<vmem>>, %arg4: memref<2x32x32xf32, #tpu.memory_space<vmem>>, %arg5: memref<2x1x32xf32, #tpu.memory_space<vmem>>, %arg6: memref<2x32x96xf32, #tpu.memory_space<vmem>>, %arg7: memref<2x1x96xf32, #tpu.memory_space<vmem>>, %arg8: memref<2x32x32xf32, #tpu.memory_space<vmem>>, %arg9: memref<2x1x32xf32, #tpu.memory_space<vmem>>, %arg10: memref<2x1x32xf32, #tpu.memory_space<vmem>>, %arg11: memref<2x1x32xf32, #tpu.memory_space<vmem>>, %arg12: memref<2x1x32xf32, #tpu.memory_space<vmem>>, %arg13: memref<2x1x32xf32, #tpu.memory_space<vmem>>, %arg14: memref<2x1x32xf32, #tpu.memory_space<vmem>>, %arg15: memref<2x1x32xf32, #tpu.memory_space<vmem>>, %arg16: memref<2x32x64xf32, #tpu.memory_space<vmem>>, %arg17: memref<2x1x64xf32, #tpu.memory_space<vmem>>, %arg18: memref<2x64x32xf32, #tpu.memory_space<vmem>>, %arg19: memref<2x1x32xf32, #tpu.memory_space<vmem>>, %arg20: memref<32x1xf32, #tpu.memory_space<vmem>>, %arg21: memref<1x1xf32, #tpu.memory_space<vmem>>, %arg22: memref<2x1xf32, #tpu.memory_space<vmem>>) attributes {dimension_semantics = [], scalar_prefetch = 0 : i64, scratch_operands = 0 : i64, tpu.core_type = #tpu.core_type<tc>} {
    %c0 = arith.constant 0 : index
    %c0_0 = arith.constant 0 : index
    %0 = vector.load %arg0[%c0, %c0_0] : memref<16x32xf32, #tpu.memory_space<vmem>>, vector<16x32xf32>
    %c0_1 = arith.constant 0 : index
    %c0_2 = arith.constant 0 : index
    %1 = vector.load %arg1[%c0_1, %c0_2] : memref<20x32xf32, #tpu.memory_space<vmem>>, vector<20x32xf32>
    %c0_3 = arith.constant 0 : index
    %c0_4 = arith.constant 0 : index
    %c0_5 = arith.constant 0 : index
    %2 = vector.load %arg2[%c0_3, %c0_4, %c0_5] : memref<2x32x96xf32, #tpu.memory_space<vmem>>, vector<1x32x96xf32>
    %3 = vector.shape_cast %2 : vector<1x32x96xf32> to vector<32x96xf32>
    %c0_6 = arith.constant 0 : index
    %c0_7 = arith.constant 0 : index
    %c0_8 = arith.constant 0 : index
    %4 = vector.load %arg3[%c0_6, %c0_7, %c0_8] : memref<2x1x96xf32, #tpu.memory_space<vmem>>, vector<1x1x96xf32>
    %5 = vector.shape_cast %4 : vector<1x1x96xf32> to vector<1x96xf32>
    %c0_9 = arith.constant 0 : index
    %c0_10 = arith.constant 0 : index
    %c0_11 = arith.constant 0 : index
    %6 = vector.load %arg4[%c0_9, %c0_10, %c0_11] : memref<2x32x32xf32, #tpu.memory_space<vmem>>, vector<1x32x32xf32>
    %7 = vector.shape_cast %6 : vector<1x32x32xf32> to vector<32x32xf32>
    %c0_12 = arith.constant 0 : index
    %c0_13 = arith.constant 0 : index
    %c0_14 = arith.constant 0 : index
    %8 = vector.load %arg5[%c0_12, %c0_13, %c0_14] : memref<2x1x32xf32, #tpu.memory_space<vmem>>, vector<1x1x32xf32>
    %9 = vector.shape_cast %8 : vector<1x1x32xf32> to vector<1x32xf32>
    %10 = vector.extract_strided_slice %3 {offsets = [0, 0], sizes = [32, 32], strides = [1, 1]} : vector<32x96xf32> to vector<32x32xf32>
    %cst = arith.constant dense<0.000000e+00> : vector<16x32xf32>
    %11 = tpu.matmul %0, %10, %cst {dimension_numbers = #tpu.dot_dimension_numbers<[1], [0], [0], [1], [0, 0, 1, 1], [], []>} : vector<16x32xf32>, vector<32x32xf32>, vector<16x32xf32> -> vector<16x32xf32>
    %12 = vector.extract_strided_slice %5 {offsets = [0, 0], sizes = [1, 32], strides = [1, 1]} : vector<1x96xf32> to vector<1x32xf32>
    %13 = vector.broadcast %12 : vector<1x32xf32> to vector<16x32xf32>
    %14 = arith.addf %11, %13 : vector<16x32xf32>
    %15 = vector.extract_strided_slice %3 {offsets = [0, 32], sizes = [32, 64], strides = [1, 1]} : vector<32x96xf32> to vector<32x64xf32>
    %cst_15 = arith.constant dense<0.000000e+00> : vector<16x64xf32>
    %16 = tpu.matmul %0, %15, %cst_15 {dimension_numbers = #tpu.dot_dimension_numbers<[1], [0], [0], [1], [0, 0, 1, 1], [], []>} : vector<16x32xf32>, vector<32x64xf32>, vector<16x64xf32> -> vector<16x64xf32>
    %17 = vector.extract_strided_slice %5 {offsets = [0, 32], sizes = [1, 64], strides = [1, 1]} : vector<1x96xf32> to vector<1x64xf32>
    %18 = vector.broadcast %17 : vector<1x64xf32> to vector<16x64xf32>
    %19 = arith.addf %16, %18 : vector<16x64xf32>
    %20 = vector.extract_strided_slice %19 {offsets = [0, 0], sizes = [16, 32], strides = [1, 1]} : vector<16x64xf32> to vector<16x32xf32>
    %21 = vector.extract_strided_slice %19 {offsets = [0, 32], sizes = [16, 32], strides = [1, 1]} : vector<16x64xf32> to vector<16x32xf32>
    %22 = vector.extract_strided_slice %14 {offsets = [0, 0], sizes = [8, 32], strides = [1, 1]} : vector<16x32xf32> to vector<8x32xf32>
    %23 = vector.extract_strided_slice %20 {offsets = [0, 0], sizes = [8, 32], strides = [1, 1]} : vector<16x32xf32> to vector<8x32xf32>
    %24 = vector.extract_strided_slice %21 {offsets = [0, 0], sizes = [8, 32], strides = [1, 1]} : vector<16x32xf32> to vector<8x32xf32>
    %25 = vector.extract_strided_slice %22 {offsets = [0, 0], sizes = [8, 8], strides = [1, 1]} : vector<8x32xf32> to vector<8x8xf32>
    %cst_16 = arith.constant 0.353553385 : f32
    %26 = vector.broadcast %cst_16 : f32 to vector<8x8xf32>
    %27 = arith.mulf %25, %26 : vector<8x8xf32>
    %28 = vector.extract_strided_slice %23 {offsets = [0, 0], sizes = [8, 8], strides = [1, 1]} : vector<8x32xf32> to vector<8x8xf32>
    %cst_17 = arith.constant dense<0.000000e+00> : vector<8x8xf32>
    %29 = tpu.matmul %27, %28, %cst_17 {dimension_numbers = #tpu.dot_dimension_numbers<[1], [1], [0], [0], [0, 0, 1, 0], [], []>} : vector<8x8xf32>, vector<8x8xf32>, vector<8x8xf32> -> vector<8x8xf32>
    %cst_18 = arith.constant dense<0xFF800000> : vector<8xf32>
    %30 = vector.multi_reduction <maximumf>, %29, %cst_18 [1] : vector<8x8xf32> to vector<8xf32>
    %31 = vector.shape_cast %30 : vector<8xf32> to vector<8x1xf32>
    %32 = vector.broadcast %31 : vector<8x1xf32> to vector<8x8xf32>
    %33 = arith.subf %29, %32 : vector<8x8xf32>
    %34 = math.exp %33 : vector<8x8xf32>
    %cst_19 = arith.constant dense<0.000000e+00> : vector<8xf32>
    %35 = vector.multi_reduction <add>, %34, %cst_19 [1] : vector<8x8xf32> to vector<8xf32>
    %36 = vector.shape_cast %35 : vector<8xf32> to vector<8x1xf32>
    %37 = tpu.reciprocal %36 {approx = true} : vector<8x1xf32> -> vector<8x1xf32>
    %38 = vector.broadcast %37 : vector<8x1xf32> to vector<8x8xf32>
    %39 = arith.mulf %34, %38 : vector<8x8xf32>
    %40 = vector.extract_strided_slice %24 {offsets = [0, 0], sizes = [8, 8], strides = [1, 1]} : vector<8x32xf32> to vector<8x8xf32>
    %cst_20 = arith.constant dense<0.000000e+00> : vector<8x8xf32>
    %41 = tpu.matmul %39, %40, %cst_20 {dimension_numbers = #tpu.dot_dimension_numbers<[1], [0], [0], [1], [0, 0, 1, 1], [], []>} : vector<8x8xf32>, vector<8x8xf32>, vector<8x8xf32> -> vector<8x8xf32>
    %42 = vector.extract_strided_slice %22 {offsets = [0, 8], sizes = [8, 8], strides = [1, 1]} : vector<8x32xf32> to vector<8x8xf32>
    %cst_21 = arith.constant 0.353553385 : f32
    %43 = vector.broadcast %cst_21 : f32 to vector<8x8xf32>
    %44 = arith.mulf %42, %43 : vector<8x8xf32>
    %45 = vector.extract_strided_slice %23 {offsets = [0, 8], sizes = [8, 8], strides = [1, 1]} : vector<8x32xf32> to vector<8x8xf32>
    %cst_22 = arith.constant dense<0.000000e+00> : vector<8x8xf32>
    %46 = tpu.matmul %44, %45, %cst_22 {dimension_numbers = #tpu.dot_dimension_numbers<[1], [1], [0], [0], [0, 0, 1, 0], [], []>} : vector<8x8xf32>, vector<8x8xf32>, vector<8x8xf32> -> vector<8x8xf32>
    %cst_23 = arith.constant dense<0xFF800000> : vector<8xf32>
    %47 = vector.multi_reduction <maximumf>, %46, %cst_23 [1] : vector<8x8xf32> to vector<8xf32>
    %48 = vector.shape_cast %47 : vector<8xf32> to vector<8x1xf32>
    %49 = vector.broadcast %48 : vector<8x1xf32> to vector<8x8xf32>
    %50 = arith.subf %46, %49 : vector<8x8xf32>
    %51 = math.exp %50 : vector<8x8xf32>
    %cst_24 = arith.constant dense<0.000000e+00> : vector<8xf32>
    %52 = vector.multi_reduction <add>, %51, %cst_24 [1] : vector<8x8xf32> to vector<8xf32>
    %53 = vector.shape_cast %52 : vector<8xf32> to vector<8x1xf32>
    %54 = tpu.reciprocal %53 {approx = true} : vector<8x1xf32> -> vector<8x1xf32>
    %55 = vector.broadcast %54 : vector<8x1xf32> to vector<8x8xf32>
    %56 = arith.mulf %51, %55 : vector<8x8xf32>
    %57 = vector.extract_strided_slice %24 {offsets = [0, 8], sizes = [8, 8], strides = [1, 1]} : vector<8x32xf32> to vector<8x8xf32>
    %cst_25 = arith.constant dense<0.000000e+00> : vector<8x8xf32>
    %58 = tpu.matmul %56, %57, %cst_25 {dimension_numbers = #tpu.dot_dimension_numbers<[1], [0], [0], [1], [0, 0, 1, 1], [], []>} : vector<8x8xf32>, vector<8x8xf32>, vector<8x8xf32> -> vector<8x8xf32>
    %59 = vector.extract_strided_slice %22 {offsets = [0, 16], sizes = [8, 8], strides = [1, 1]} : vector<8x32xf32> to vector<8x8xf32>
    %cst_26 = arith.constant 0.353553385 : f32
    %60 = vector.broadcast %cst_26 : f32 to vector<8x8xf32>
    %61 = arith.mulf %59, %60 : vector<8x8xf32>
    %62 = vector.extract_strided_slice %23 {offsets = [0, 16], sizes = [8, 8], strides = [1, 1]} : vector<8x32xf32> to vector<8x8xf32>
    %cst_27 = arith.constant dense<0.000000e+00> : vector<8x8xf32>
    %63 = tpu.matmul %61, %62, %cst_27 {dimension_numbers = #tpu.dot_dimension_numbers<[1], [1], [0], [0], [0, 0, 1, 0], [], []>} : vector<8x8xf32>, vector<8x8xf32>, vector<8x8xf32> -> vector<8x8xf32>
    %cst_28 = arith.constant dense<0xFF800000> : vector<8xf32>
    %64 = vector.multi_reduction <maximumf>, %63, %cst_28 [1] : vector<8x8xf32> to vector<8xf32>
    %65 = vector.shape_cast %64 : vector<8xf32> to vector<8x1xf32>
    %66 = vector.broadcast %65 : vector<8x1xf32> to vector<8x8xf32>
    %67 = arith.subf %63, %66 : vector<8x8xf32>
    %68 = math.exp %67 : vector<8x8xf32>
    %cst_29 = arith.constant dense<0.000000e+00> : vector<8xf32>
    %69 = vector.multi_reduction <add>, %68, %cst_29 [1] : vector<8x8xf32> to vector<8xf32>
    %70 = vector.shape_cast %69 : vector<8xf32> to vector<8x1xf32>
    %71 = tpu.reciprocal %70 {approx = true} : vector<8x1xf32> -> vector<8x1xf32>
    %72 = vector.broadcast %71 : vector<8x1xf32> to vector<8x8xf32>
    %73 = arith.mulf %68, %72 : vector<8x8xf32>
    %74 = vector.extract_strided_slice %24 {offsets = [0, 16], sizes = [8, 8], strides = [1, 1]} : vector<8x32xf32> to vector<8x8xf32>
    %cst_30 = arith.constant dense<0.000000e+00> : vector<8x8xf32>
    %75 = tpu.matmul %73, %74, %cst_30 {dimension_numbers = #tpu.dot_dimension_numbers<[1], [0], [0], [1], [0, 0, 1, 1], [], []>} : vector<8x8xf32>, vector<8x8xf32>, vector<8x8xf32> -> vector<8x8xf32>
    %76 = vector.extract_strided_slice %22 {offsets = [0, 24], sizes = [8, 8], strides = [1, 1]} : vector<8x32xf32> to vector<8x8xf32>
    %cst_31 = arith.constant 0.353553385 : f32
    %77 = vector.broadcast %cst_31 : f32 to vector<8x8xf32>
    %78 = arith.mulf %76, %77 : vector<8x8xf32>
    %79 = vector.extract_strided_slice %23 {offsets = [0, 24], sizes = [8, 8], strides = [1, 1]} : vector<8x32xf32> to vector<8x8xf32>
    %cst_32 = arith.constant dense<0.000000e+00> : vector<8x8xf32>
    %80 = tpu.matmul %78, %79, %cst_32 {dimension_numbers = #tpu.dot_dimension_numbers<[1], [1], [0], [0], [0, 0, 1, 0], [], []>} : vector<8x8xf32>, vector<8x8xf32>, vector<8x8xf32> -> vector<8x8xf32>
    %cst_33 = arith.constant dense<0xFF800000> : vector<8xf32>
    %81 = vector.multi_reduction <maximumf>, %80, %cst_33 [1] : vector<8x8xf32> to vector<8xf32>
    %82 = vector.shape_cast %81 : vector<8xf32> to vector<8x1xf32>
    %83 = vector.broadcast %82 : vector<8x1xf32> to vector<8x8xf32>
    %84 = arith.subf %80, %83 : vector<8x8xf32>
    %85 = math.exp %84 : vector<8x8xf32>
    %cst_34 = arith.constant dense<0.000000e+00> : vector<8xf32>
    %86 = vector.multi_reduction <add>, %85, %cst_34 [1] : vector<8x8xf32> to vector<8xf32>
    %87 = vector.shape_cast %86 : vector<8xf32> to vector<8x1xf32>
    %88 = tpu.reciprocal %87 {approx = true} : vector<8x1xf32> -> vector<8x1xf32>
    %89 = vector.broadcast %88 : vector<8x1xf32> to vector<8x8xf32>
    %90 = arith.mulf %85, %89 : vector<8x8xf32>
    %91 = vector.extract_strided_slice %24 {offsets = [0, 24], sizes = [8, 8], strides = [1, 1]} : vector<8x32xf32> to vector<8x8xf32>
    %cst_35 = arith.constant dense<0.000000e+00> : vector<8x8xf32>
    %92 = tpu.matmul %90, %91, %cst_35 {dimension_numbers = #tpu.dot_dimension_numbers<[1], [0], [0], [1], [0, 0, 1, 1], [], []>} : vector<8x8xf32>, vector<8x8xf32>, vector<8x8xf32> -> vector<8x8xf32>
    %93 = tpu.concatenate %41, %58, %75, %92 in 1 : vector<8x8xf32>, vector<8x8xf32>, vector<8x8xf32>, vector<8x8xf32> -> vector<8x32xf32>
    %94 = vector.extract_strided_slice %14 {offsets = [8, 0], sizes = [8, 32], strides = [1, 1]} : vector<16x32xf32> to vector<8x32xf32>
    %95 = vector.extract_strided_slice %20 {offsets = [8, 0], sizes = [8, 32], strides = [1, 1]} : vector<16x32xf32> to vector<8x32xf32>
    %96 = vector.extract_strided_slice %21 {offsets = [8, 0], sizes = [8, 32], strides = [1, 1]} : vector<16x32xf32> to vector<8x32xf32>
    %97 = vector.extract_strided_slice %94 {offsets = [0, 0], sizes = [8, 8], strides = [1, 1]} : vector<8x32xf32> to vector<8x8xf32>
    %cst_36 = arith.constant 0.353553385 : f32
    %98 = vector.broadcast %cst_36 : f32 to vector<8x8xf32>
    %99 = arith.mulf %97, %98 : vector<8x8xf32>
    %100 = vector.extract_strided_slice %95 {offsets = [0, 0], sizes = [8, 8], strides = [1, 1]} : vector<8x32xf32> to vector<8x8xf32>
    %cst_37 = arith.constant dense<0.000000e+00> : vector<8x8xf32>
    %101 = tpu.matmul %99, %100, %cst_37 {dimension_numbers = #tpu.dot_dimension_numbers<[1], [1], [0], [0], [0, 0, 1, 0], [], []>} : vector<8x8xf32>, vector<8x8xf32>, vector<8x8xf32> -> vector<8x8xf32>
    %cst_38 = arith.constant dense<0xFF800000> : vector<8xf32>
    %102 = vector.multi_reduction <maximumf>, %101, %cst_38 [1] : vector<8x8xf32> to vector<8xf32>
    %103 = vector.shape_cast %102 : vector<8xf32> to vector<8x1xf32>
    %104 = vector.broadcast %103 : vector<8x1xf32> to vector<8x8xf32>
    %105 = arith.subf %101, %104 : vector<8x8xf32>
    %106 = math.exp %105 : vector<8x8xf32>
    %cst_39 = arith.constant dense<0.000000e+00> : vector<8xf32>
    %107 = vector.multi_reduction <add>, %106, %cst_39 [1] : vector<8x8xf32> to vector<8xf32>
    %108 = vector.shape_cast %107 : vector<8xf32> to vector<8x1xf32>
    %109 = tpu.reciprocal %108 {approx = true} : vector<8x1xf32> -> vector<8x1xf32>
    %110 = vector.broadcast %109 : vector<8x1xf32> to vector<8x8xf32>
    %111 = arith.mulf %106, %110 : vector<8x8xf32>
    %112 = vector.extract_strided_slice %96 {offsets = [0, 0], sizes = [8, 8], strides = [1, 1]} : vector<8x32xf32> to vector<8x8xf32>
    %cst_40 = arith.constant dense<0.000000e+00> : vector<8x8xf32>
    %113 = tpu.matmul %111, %112, %cst_40 {dimension_numbers = #tpu.dot_dimension_numbers<[1], [0], [0], [1], [0, 0, 1, 1], [], []>} : vector<8x8xf32>, vector<8x8xf32>, vector<8x8xf32> -> vector<8x8xf32>
    %114 = vector.extract_strided_slice %94 {offsets = [0, 8], sizes = [8, 8], strides = [1, 1]} : vector<8x32xf32> to vector<8x8xf32>
    %cst_41 = arith.constant 0.353553385 : f32
    %115 = vector.broadcast %cst_41 : f32 to vector<8x8xf32>
    %116 = arith.mulf %114, %115 : vector<8x8xf32>
    %117 = vector.extract_strided_slice %95 {offsets = [0, 8], sizes = [8, 8], strides = [1, 1]} : vector<8x32xf32> to vector<8x8xf32>
    %cst_42 = arith.constant dense<0.000000e+00> : vector<8x8xf32>
    %118 = tpu.matmul %116, %117, %cst_42 {dimension_numbers = #tpu.dot_dimension_numbers<[1], [1], [0], [0], [0, 0, 1, 0], [], []>} : vector<8x8xf32>, vector<8x8xf32>, vector<8x8xf32> -> vector<8x8xf32>
    %cst_43 = arith.constant dense<0xFF800000> : vector<8xf32>
    %119 = vector.multi_reduction <maximumf>, %118, %cst_43 [1] : vector<8x8xf32> to vector<8xf32>
    %120 = vector.shape_cast %119 : vector<8xf32> to vector<8x1xf32>
    %121 = vector.broadcast %120 : vector<8x1xf32> to vector<8x8xf32>
    %122 = arith.subf %118, %121 : vector<8x8xf32>
    %123 = math.exp %122 : vector<8x8xf32>
    %cst_44 = arith.constant dense<0.000000e+00> : vector<8xf32>
    %124 = vector.multi_reduction <add>, %123, %cst_44 [1] : vector<8x8xf32> to vector<8xf32>
    %125 = vector.shape_cast %124 : vector<8xf32> to vector<8x1xf32>
    %126 = tpu.reciprocal %125 {approx = true} : vector<8x1xf32> -> vector<8x1xf32>
    %127 = vector.broadcast %126 : vector<8x1xf32> to vector<8x8xf32>
    %128 = arith.mulf %123, %127 : vector<8x8xf32>
    %129 = vector.extract_strided_slice %96 {offsets = [0, 8], sizes = [8, 8], strides = [1, 1]} : vector<8x32xf32> to vector<8x8xf32>
    %cst_45 = arith.constant dense<0.000000e+00> : vector<8x8xf32>
    %130 = tpu.matmul %128, %129, %cst_45 {dimension_numbers = #tpu.dot_dimension_numbers<[1], [0], [0], [1], [0, 0, 1, 1], [], []>} : vector<8x8xf32>, vector<8x8xf32>, vector<8x8xf32> -> vector<8x8xf32>
    %131 = vector.extract_strided_slice %94 {offsets = [0, 16], sizes = [8, 8], strides = [1, 1]} : vector<8x32xf32> to vector<8x8xf32>
    %cst_46 = arith.constant 0.353553385 : f32
    %132 = vector.broadcast %cst_46 : f32 to vector<8x8xf32>
    %133 = arith.mulf %131, %132 : vector<8x8xf32>
    %134 = vector.extract_strided_slice %95 {offsets = [0, 16], sizes = [8, 8], strides = [1, 1]} : vector<8x32xf32> to vector<8x8xf32>
    %cst_47 = arith.constant dense<0.000000e+00> : vector<8x8xf32>
    %135 = tpu.matmul %133, %134, %cst_47 {dimension_numbers = #tpu.dot_dimension_numbers<[1], [1], [0], [0], [0, 0, 1, 0], [], []>} : vector<8x8xf32>, vector<8x8xf32>, vector<8x8xf32> -> vector<8x8xf32>
    %cst_48 = arith.constant dense<0xFF800000> : vector<8xf32>
    %136 = vector.multi_reduction <maximumf>, %135, %cst_48 [1] : vector<8x8xf32> to vector<8xf32>
    %137 = vector.shape_cast %136 : vector<8xf32> to vector<8x1xf32>
    %138 = vector.broadcast %137 : vector<8x1xf32> to vector<8x8xf32>
    %139 = arith.subf %135, %138 : vector<8x8xf32>
    %140 = math.exp %139 : vector<8x8xf32>
    %cst_49 = arith.constant dense<0.000000e+00> : vector<8xf32>
    %141 = vector.multi_reduction <add>, %140, %cst_49 [1] : vector<8x8xf32> to vector<8xf32>
    %142 = vector.shape_cast %141 : vector<8xf32> to vector<8x1xf32>
    %143 = tpu.reciprocal %142 {approx = true} : vector<8x1xf32> -> vector<8x1xf32>
    %144 = vector.broadcast %143 : vector<8x1xf32> to vector<8x8xf32>
    %145 = arith.mulf %140, %144 : vector<8x8xf32>
    %146 = vector.extract_strided_slice %96 {offsets = [0, 16], sizes = [8, 8], strides = [1, 1]} : vector<8x32xf32> to vector<8x8xf32>
    %cst_50 = arith.constant dense<0.000000e+00> : vector<8x8xf32>
    %147 = tpu.matmul %145, %146, %cst_50 {dimension_numbers = #tpu.dot_dimension_numbers<[1], [0], [0], [1], [0, 0, 1, 1], [], []>} : vector<8x8xf32>, vector<8x8xf32>, vector<8x8xf32> -> vector<8x8xf32>
    %148 = vector.extract_strided_slice %94 {offsets = [0, 24], sizes = [8, 8], strides = [1, 1]} : vector<8x32xf32> to vector<8x8xf32>
    %cst_51 = arith.constant 0.353553385 : f32
    %149 = vector.broadcast %cst_51 : f32 to vector<8x8xf32>
    %150 = arith.mulf %148, %149 : vector<8x8xf32>
    %151 = vector.extract_strided_slice %95 {offsets = [0, 24], sizes = [8, 8], strides = [1, 1]} : vector<8x32xf32> to vector<8x8xf32>
    %cst_52 = arith.constant dense<0.000000e+00> : vector<8x8xf32>
    %152 = tpu.matmul %150, %151, %cst_52 {dimension_numbers = #tpu.dot_dimension_numbers<[1], [1], [0], [0], [0, 0, 1, 0], [], []>} : vector<8x8xf32>, vector<8x8xf32>, vector<8x8xf32> -> vector<8x8xf32>
    %cst_53 = arith.constant dense<0xFF800000> : vector<8xf32>
    %153 = vector.multi_reduction <maximumf>, %152, %cst_53 [1] : vector<8x8xf32> to vector<8xf32>
    %154 = vector.shape_cast %153 : vector<8xf32> to vector<8x1xf32>
    %155 = vector.broadcast %154 : vector<8x1xf32> to vector<8x8xf32>
    %156 = arith.subf %152, %155 : vector<8x8xf32>
    %157 = math.exp %156 : vector<8x8xf32>
    %cst_54 = arith.constant dense<0.000000e+00> : vector<8xf32>
    %158 = vector.multi_reduction <add>, %157, %cst_54 [1] : vector<8x8xf32> to vector<8xf32>
    %159 = vector.shape_cast %158 : vector<8xf32> to vector<8x1xf32>
    %160 = tpu.reciprocal %159 {approx = true} : vector<8x1xf32> -> vector<8x1xf32>
    %161 = vector.broadcast %160 : vector<8x1xf32> to vector<8x8xf32>
    %162 = arith.mulf %157, %161 : vector<8x8xf32>
    %163 = vector.extract_strided_slice %96 {offsets = [0, 24], sizes = [8, 8], strides = [1, 1]} : vector<8x32xf32> to vector<8x8xf32>
    %cst_55 = arith.constant dense<0.000000e+00> : vector<8x8xf32>
    %164 = tpu.matmul %162, %163, %cst_55 {dimension_numbers = #tpu.dot_dimension_numbers<[1], [0], [0], [1], [0, 0, 1, 1], [], []>} : vector<8x8xf32>, vector<8x8xf32>, vector<8x8xf32> -> vector<8x8xf32>
    %165 = tpu.concatenate %113, %130, %147, %164 in 1 : vector<8x8xf32>, vector<8x8xf32>, vector<8x8xf32>, vector<8x8xf32> -> vector<8x32xf32>
    %166 = tpu.concatenate %93, %165 in 0 : vector<8x32xf32>, vector<8x32xf32> -> vector<16x32xf32>
    %cst_56 = arith.constant dense<0.000000e+00> : vector<16x32xf32>
    %167 = tpu.matmul %166, %7, %cst_56 {dimension_numbers = #tpu.dot_dimension_numbers<[1], [0], [0], [1], [0, 0, 1, 1], [], []>} : vector<16x32xf32>, vector<32x32xf32>, vector<16x32xf32> -> vector<16x32xf32>
    %168 = vector.broadcast %9 : vector<1x32xf32> to vector<16x32xf32>
    %169 = arith.addf %167, %168 : vector<16x32xf32>
    %c0_57 = arith.constant 0 : index
    %c0_58 = arith.constant 0 : index
    %c0_59 = arith.constant 0 : index
    %170 = vector.load %arg10[%c0_57, %c0_58, %c0_59] : memref<2x1x32xf32, #tpu.memory_space<vmem>>, vector<1x1x32xf32>
    %171 = vector.shape_cast %170 : vector<1x1x32xf32> to vector<1x32xf32>
    %c0_60 = arith.constant 0 : index
    %c0_61 = arith.constant 0 : index
    %c0_62 = arith.constant 0 : index
    %172 = vector.load %arg11[%c0_60, %c0_61, %c0_62] : memref<2x1x32xf32, #tpu.memory_space<vmem>>, vector<1x1x32xf32>
    %173 = vector.shape_cast %172 : vector<1x1x32xf32> to vector<1x32xf32>
    %174 = arith.addf %0, %169 : vector<16x32xf32>
    %cst_63 = arith.constant dense<0.000000e+00> : vector<16xf32>
    %175 = vector.multi_reduction <add>, %174, %cst_63 [1] : vector<16x32xf32> to vector<16xf32>
    %176 = vector.shape_cast %175 : vector<16xf32> to vector<16x1xf32>
    %cst_64 = arith.constant 3.200000e+01 : f32
    %177 = vector.broadcast %cst_64 : f32 to vector<16x1xf32>
    %178 = arith.divf %176, %177 : vector<16x1xf32>
    %179 = vector.broadcast %178 : vector<16x1xf32> to vector<16x32xf32>
    %180 = arith.subf %174, %179 : vector<16x32xf32>
    %181 = arith.mulf %180, %180 : vector<16x32xf32>
    %cst_65 = arith.constant dense<0.000000e+00> : vector<16xf32>
    %182 = vector.multi_reduction <add>, %181, %cst_65 [1] : vector<16x32xf32> to vector<16xf32>
    %183 = vector.shape_cast %182 : vector<16xf32> to vector<16x1xf32>
    %cst_66 = arith.constant 3.200000e+01 : f32
    %184 = vector.broadcast %cst_66 : f32 to vector<16x1xf32>
    %185 = arith.divf %183, %184 : vector<16x1xf32>
    %cst_67 = arith.constant 9.99999974E-6 : f32
    %186 = vector.broadcast %cst_67 : f32 to vector<16x1xf32>
    %187 = arith.addf %185, %186 : vector<16x1xf32>
    %188 = math.rsqrt %187 : vector<16x1xf32>
    %189 = vector.broadcast %188 : vector<16x1xf32> to vector<16x32xf32>
    %190 = arith.mulf %180, %189 : vector<16x32xf32>
    %191 = vector.broadcast %171 : vector<1x32xf32> to vector<16x32xf32>
    %192 = arith.mulf %190, %191 : vector<16x32xf32>
    %193 = vector.broadcast %173 : vector<1x32xf32> to vector<16x32xf32>
    %194 = arith.addf %192, %193 : vector<16x32xf32>
    %c0_68 = arith.constant 0 : index
    %c0_69 = arith.constant 0 : index
    %c0_70 = arith.constant 0 : index
    %195 = vector.load %arg6[%c0_68, %c0_69, %c0_70] : memref<2x32x96xf32, #tpu.memory_space<vmem>>, vector<1x32x96xf32>
    %196 = vector.shape_cast %195 : vector<1x32x96xf32> to vector<32x96xf32>
    %c0_71 = arith.constant 0 : index
    %c0_72 = arith.constant 0 : index
    %c0_73 = arith.constant 0 : index
    %197 = vector.load %arg7[%c0_71, %c0_72, %c0_73] : memref<2x1x96xf32, #tpu.memory_space<vmem>>, vector<1x1x96xf32>
    %198 = vector.shape_cast %197 : vector<1x1x96xf32> to vector<1x96xf32>
    %c0_74 = arith.constant 0 : index
    %c0_75 = arith.constant 0 : index
    %c0_76 = arith.constant 0 : index
    %199 = vector.load %arg8[%c0_74, %c0_75, %c0_76] : memref<2x32x32xf32, #tpu.memory_space<vmem>>, vector<1x32x32xf32>
    %200 = vector.shape_cast %199 : vector<1x32x32xf32> to vector<32x32xf32>
    %c0_77 = arith.constant 0 : index
    %c0_78 = arith.constant 0 : index
    %c0_79 = arith.constant 0 : index
    %201 = vector.load %arg9[%c0_77, %c0_78, %c0_79] : memref<2x1x32xf32, #tpu.memory_space<vmem>>, vector<1x1x32xf32>
    %202 = vector.shape_cast %201 : vector<1x1x32xf32> to vector<1x32xf32>
    %203 = vector.extract_strided_slice %196 {offsets = [0, 0], sizes = [32, 32], strides = [1, 1]} : vector<32x96xf32> to vector<32x32xf32>
    %cst_80 = arith.constant dense<0.000000e+00> : vector<16x32xf32>
    %204 = tpu.matmul %194, %203, %cst_80 {dimension_numbers = #tpu.dot_dimension_numbers<[1], [0], [0], [1], [0, 0, 1, 1], [], []>} : vector<16x32xf32>, vector<32x32xf32>, vector<16x32xf32> -> vector<16x32xf32>
    %205 = vector.extract_strided_slice %198 {offsets = [0, 0], sizes = [1, 32], strides = [1, 1]} : vector<1x96xf32> to vector<1x32xf32>
    %206 = vector.broadcast %205 : vector<1x32xf32> to vector<16x32xf32>
    %207 = arith.addf %204, %206 : vector<16x32xf32>
    %208 = vector.extract_strided_slice %196 {offsets = [0, 32], sizes = [32, 64], strides = [1, 1]} : vector<32x96xf32> to vector<32x64xf32>
    %cst_81 = arith.constant dense<0.000000e+00> : vector<20x64xf32>
    %209 = tpu.matmul %1, %208, %cst_81 {dimension_numbers = #tpu.dot_dimension_numbers<[1], [0], [0], [1], [0, 0, 1, 1], [], []>} : vector<20x32xf32>, vector<32x64xf32>, vector<20x64xf32> -> vector<20x64xf32>
    %210 = vector.extract_strided_slice %198 {offsets = [0, 32], sizes = [1, 64], strides = [1, 1]} : vector<1x96xf32> to vector<1x64xf32>
    %211 = vector.broadcast %210 : vector<1x64xf32> to vector<20x64xf32>
    %212 = arith.addf %209, %211 : vector<20x64xf32>
    %213 = vector.extract_strided_slice %212 {offsets = [0, 0], sizes = [20, 32], strides = [1, 1]} : vector<20x64xf32> to vector<20x32xf32>
    %214 = vector.extract_strided_slice %212 {offsets = [0, 32], sizes = [20, 32], strides = [1, 1]} : vector<20x64xf32> to vector<20x32xf32>
    %215 = vector.extract_strided_slice %207 {offsets = [0, 0], sizes = [8, 32], strides = [1, 1]} : vector<16x32xf32> to vector<8x32xf32>
    %216 = vector.extract_strided_slice %213 {offsets = [0, 0], sizes = [10, 32], strides = [1, 1]} : vector<20x32xf32> to vector<10x32xf32>
    %217 = vector.extract_strided_slice %214 {offsets = [0, 0], sizes = [10, 32], strides = [1, 1]} : vector<20x32xf32> to vector<10x32xf32>
    %218 = vector.extract_strided_slice %215 {offsets = [0, 0], sizes = [8, 8], strides = [1, 1]} : vector<8x32xf32> to vector<8x8xf32>
    %cst_82 = arith.constant 0.353553385 : f32
    %219 = vector.broadcast %cst_82 : f32 to vector<8x8xf32>
    %220 = arith.mulf %218, %219 : vector<8x8xf32>
    %221 = vector.extract_strided_slice %216 {offsets = [0, 0], sizes = [10, 8], strides = [1, 1]} : vector<10x32xf32> to vector<10x8xf32>
    %cst_83 = arith.constant dense<0.000000e+00> : vector<8x10xf32>
    %222 = tpu.matmul %220, %221, %cst_83 {dimension_numbers = #tpu.dot_dimension_numbers<[1], [1], [0], [0], [0, 0, 1, 0], [], []>} : vector<8x8xf32>, vector<10x8xf32>, vector<8x10xf32> -> vector<8x10xf32>
    %cst_84 = arith.constant dense<0xFF800000> : vector<8xf32>
    %223 = vector.multi_reduction <maximumf>, %222, %cst_84 [1] : vector<8x10xf32> to vector<8xf32>
    %224 = vector.shape_cast %223 : vector<8xf32> to vector<8x1xf32>
    %225 = vector.broadcast %224 : vector<8x1xf32> to vector<8x10xf32>
    %226 = arith.subf %222, %225 : vector<8x10xf32>
    %227 = math.exp %226 : vector<8x10xf32>
    %cst_85 = arith.constant dense<0.000000e+00> : vector<8xf32>
    %228 = vector.multi_reduction <add>, %227, %cst_85 [1] : vector<8x10xf32> to vector<8xf32>
    %229 = vector.shape_cast %228 : vector<8xf32> to vector<8x1xf32>
    %230 = tpu.reciprocal %229 {approx = true} : vector<8x1xf32> -> vector<8x1xf32>
    %231 = vector.broadcast %230 : vector<8x1xf32> to vector<8x10xf32>
    %232 = arith.mulf %227, %231 : vector<8x10xf32>
    %233 = vector.extract_strided_slice %217 {offsets = [0, 0], sizes = [10, 8], strides = [1, 1]} : vector<10x32xf32> to vector<10x8xf32>
    %cst_86 = arith.constant dense<0.000000e+00> : vector<8x8xf32>
    %234 = tpu.matmul %232, %233, %cst_86 {dimension_numbers = #tpu.dot_dimension_numbers<[1], [0], [0], [1], [0, 0, 1, 1], [], []>} : vector<8x10xf32>, vector<10x8xf32>, vector<8x8xf32> -> vector<8x8xf32>
    %235 = vector.extract_strided_slice %215 {offsets = [0, 8], sizes = [8, 8], strides = [1, 1]} : vector<8x32xf32> to vector<8x8xf32>
    %cst_87 = arith.constant 0.353553385 : f32
    %236 = vector.broadcast %cst_87 : f32 to vector<8x8xf32>
    %237 = arith.mulf %235, %236 : vector<8x8xf32>
    %238 = vector.extract_strided_slice %216 {offsets = [0, 8], sizes = [10, 8], strides = [1, 1]} : vector<10x32xf32> to vector<10x8xf32>
    %cst_88 = arith.constant dense<0.000000e+00> : vector<8x10xf32>
    %239 = tpu.matmul %237, %238, %cst_88 {dimension_numbers = #tpu.dot_dimension_numbers<[1], [1], [0], [0], [0, 0, 1, 0], [], []>} : vector<8x8xf32>, vector<10x8xf32>, vector<8x10xf32> -> vector<8x10xf32>
    %cst_89 = arith.constant dense<0xFF800000> : vector<8xf32>
    %240 = vector.multi_reduction <maximumf>, %239, %cst_89 [1] : vector<8x10xf32> to vector<8xf32>
    %241 = vector.shape_cast %240 : vector<8xf32> to vector<8x1xf32>
    %242 = vector.broadcast %241 : vector<8x1xf32> to vector<8x10xf32>
    %243 = arith.subf %239, %242 : vector<8x10xf32>
    %244 = math.exp %243 : vector<8x10xf32>
    %cst_90 = arith.constant dense<0.000000e+00> : vector<8xf32>
    %245 = vector.multi_reduction <add>, %244, %cst_90 [1] : vector<8x10xf32> to vector<8xf32>
    %246 = vector.shape_cast %245 : vector<8xf32> to vector<8x1xf32>
    %247 = tpu.reciprocal %246 {approx = true} : vector<8x1xf32> -> vector<8x1xf32>
    %248 = vector.broadcast %247 : vector<8x1xf32> to vector<8x10xf32>
    %249 = arith.mulf %244, %248 : vector<8x10xf32>
    %250 = vector.extract_strided_slice %217 {offsets = [0, 8], sizes = [10, 8], strides = [1, 1]} : vector<10x32xf32> to vector<10x8xf32>
    %cst_91 = arith.constant dense<0.000000e+00> : vector<8x8xf32>
    %251 = tpu.matmul %249, %250, %cst_91 {dimension_numbers = #tpu.dot_dimension_numbers<[1], [0], [0], [1], [0, 0, 1, 1], [], []>} : vector<8x10xf32>, vector<10x8xf32>, vector<8x8xf32> -> vector<8x8xf32>
    %252 = vector.extract_strided_slice %215 {offsets = [0, 16], sizes = [8, 8], strides = [1, 1]} : vector<8x32xf32> to vector<8x8xf32>
    %cst_92 = arith.constant 0.353553385 : f32
    %253 = vector.broadcast %cst_92 : f32 to vector<8x8xf32>
    %254 = arith.mulf %252, %253 : vector<8x8xf32>
    %255 = vector.extract_strided_slice %216 {offsets = [0, 16], sizes = [10, 8], strides = [1, 1]} : vector<10x32xf32> to vector<10x8xf32>
    %cst_93 = arith.constant dense<0.000000e+00> : vector<8x10xf32>
    %256 = tpu.matmul %254, %255, %cst_93 {dimension_numbers = #tpu.dot_dimension_numbers<[1], [1], [0], [0], [0, 0, 1, 0], [], []>} : vector<8x8xf32>, vector<10x8xf32>, vector<8x10xf32> -> vector<8x10xf32>
    %cst_94 = arith.constant dense<0xFF800000> : vector<8xf32>
    %257 = vector.multi_reduction <maximumf>, %256, %cst_94 [1] : vector<8x10xf32> to vector<8xf32>
    %258 = vector.shape_cast %257 : vector<8xf32> to vector<8x1xf32>
    %259 = vector.broadcast %258 : vector<8x1xf32> to vector<8x10xf32>
    %260 = arith.subf %256, %259 : vector<8x10xf32>
    %261 = math.exp %260 : vector<8x10xf32>
    %cst_95 = arith.constant dense<0.000000e+00> : vector<8xf32>
    %262 = vector.multi_reduction <add>, %261, %cst_95 [1] : vector<8x10xf32> to vector<8xf32>
    %263 = vector.shape_cast %262 : vector<8xf32> to vector<8x1xf32>
    %264 = tpu.reciprocal %263 {approx = true} : vector<8x1xf32> -> vector<8x1xf32>
    %265 = vector.broadcast %264 : vector<8x1xf32> to vector<8x10xf32>
    %266 = arith.mulf %261, %265 : vector<8x10xf32>
    %267 = vector.extract_strided_slice %217 {offsets = [0, 16], sizes = [10, 8], strides = [1, 1]} : vector<10x32xf32> to vector<10x8xf32>
    %cst_96 = arith.constant dense<0.000000e+00> : vector<8x8xf32>
    %268 = tpu.matmul %266, %267, %cst_96 {dimension_numbers = #tpu.dot_dimension_numbers<[1], [0], [0], [1], [0, 0, 1, 1], [], []>} : vector<8x10xf32>, vector<10x8xf32>, vector<8x8xf32> -> vector<8x8xf32>
    %269 = vector.extract_strided_slice %215 {offsets = [0, 24], sizes = [8, 8], strides = [1, 1]} : vector<8x32xf32> to vector<8x8xf32>
    %cst_97 = arith.constant 0.353553385 : f32
    %270 = vector.broadcast %cst_97 : f32 to vector<8x8xf32>
    %271 = arith.mulf %269, %270 : vector<8x8xf32>
    %272 = vector.extract_strided_slice %216 {offsets = [0, 24], sizes = [10, 8], strides = [1, 1]} : vector<10x32xf32> to vector<10x8xf32>
    %cst_98 = arith.constant dense<0.000000e+00> : vector<8x10xf32>
    %273 = tpu.matmul %271, %272, %cst_98 {dimension_numbers = #tpu.dot_dimension_numbers<[1], [1], [0], [0], [0, 0, 1, 0], [], []>} : vector<8x8xf32>, vector<10x8xf32>, vector<8x10xf32> -> vector<8x10xf32>
    %cst_99 = arith.constant dense<0xFF800000> : vector<8xf32>
    %274 = vector.multi_reduction <maximumf>, %273, %cst_99 [1] : vector<8x10xf32> to vector<8xf32>
    %275 = vector.shape_cast %274 : vector<8xf32> to vector<8x1xf32>
    %276 = vector.broadcast %275 : vector<8x1xf32> to vector<8x10xf32>
    %277 = arith.subf %273, %276 : vector<8x10xf32>
    %278 = math.exp %277 : vector<8x10xf32>
    %cst_100 = arith.constant dense<0.000000e+00> : vector<8xf32>
    %279 = vector.multi_reduction <add>, %278, %cst_100 [1] : vector<8x10xf32> to vector<8xf32>
    %280 = vector.shape_cast %279 : vector<8xf32> to vector<8x1xf32>
    %281 = tpu.reciprocal %280 {approx = true} : vector<8x1xf32> -> vector<8x1xf32>
    %282 = vector.broadcast %281 : vector<8x1xf32> to vector<8x10xf32>
    %283 = arith.mulf %278, %282 : vector<8x10xf32>
    %284 = vector.extract_strided_slice %217 {offsets = [0, 24], sizes = [10, 8], strides = [1, 1]} : vector<10x32xf32> to vector<10x8xf32>
    %cst_101 = arith.constant dense<0.000000e+00> : vector<8x8xf32>
    %285 = tpu.matmul %283, %284, %cst_101 {dimension_numbers = #tpu.dot_dimension_numbers<[1], [0], [0], [1], [0, 0, 1, 1], [], []>} : vector<8x10xf32>, vector<10x8xf32>, vector<8x8xf32> -> vector<8x8xf32>
    %286 = tpu.concatenate %234, %251, %268, %285 in 1 : vector<8x8xf32>, vector<8x8xf32>, vector<8x8xf32>, vector<8x8xf32> -> vector<8x32xf32>
    %287 = vector.extract_strided_slice %207 {offsets = [8, 0], sizes = [8, 32], strides = [1, 1]} : vector<16x32xf32> to vector<8x32xf32>
    %288 = vector.extract_strided_slice %213 {offsets = [10, 0], sizes = [10, 32], strides = [1, 1]} : vector<20x32xf32> to vector<10x32xf32>
    %289 = vector.extract_strided_slice %214 {offsets = [10, 0], sizes = [10, 32], strides = [1, 1]} : vector<20x32xf32> to vector<10x32xf32>
    %290 = vector.extract_strided_slice %287 {offsets = [0, 0], sizes = [8, 8], strides = [1, 1]} : vector<8x32xf32> to vector<8x8xf32>
    %cst_102 = arith.constant 0.353553385 : f32
    %291 = vector.broadcast %cst_102 : f32 to vector<8x8xf32>
    %292 = arith.mulf %290, %291 : vector<8x8xf32>
    %293 = vector.extract_strided_slice %288 {offsets = [0, 0], sizes = [10, 8], strides = [1, 1]} : vector<10x32xf32> to vector<10x8xf32>
    %cst_103 = arith.constant dense<0.000000e+00> : vector<8x10xf32>
    %294 = tpu.matmul %292, %293, %cst_103 {dimension_numbers = #tpu.dot_dimension_numbers<[1], [1], [0], [0], [0, 0, 1, 0], [], []>} : vector<8x8xf32>, vector<10x8xf32>, vector<8x10xf32> -> vector<8x10xf32>
    %cst_104 = arith.constant dense<0xFF800000> : vector<8xf32>
    %295 = vector.multi_reduction <maximumf>, %294, %cst_104 [1] : vector<8x10xf32> to vector<8xf32>
    %296 = vector.shape_cast %295 : vector<8xf32> to vector<8x1xf32>
    %297 = vector.broadcast %296 : vector<8x1xf32> to vector<8x10xf32>
    %298 = arith.subf %294, %297 : vector<8x10xf32>
    %299 = math.exp %298 : vector<8x10xf32>
    %cst_105 = arith.constant dense<0.000000e+00> : vector<8xf32>
    %300 = vector.multi_reduction <add>, %299, %cst_105 [1] : vector<8x10xf32> to vector<8xf32>
    %301 = vector.shape_cast %300 : vector<8xf32> to vector<8x1xf32>
    %302 = tpu.reciprocal %301 {approx = true} : vector<8x1xf32> -> vector<8x1xf32>
    %303 = vector.broadcast %302 : vector<8x1xf32> to vector<8x10xf32>
    %304 = arith.mulf %299, %303 : vector<8x10xf32>
    %305 = vector.extract_strided_slice %289 {offsets = [0, 0], sizes = [10, 8], strides = [1, 1]} : vector<10x32xf32> to vector<10x8xf32>
    %cst_106 = arith.constant dense<0.000000e+00> : vector<8x8xf32>
    %306 = tpu.matmul %304, %305, %cst_106 {dimension_numbers = #tpu.dot_dimension_numbers<[1], [0], [0], [1], [0, 0, 1, 1], [], []>} : vector<8x10xf32>, vector<10x8xf32>, vector<8x8xf32> -> vector<8x8xf32>
    %307 = vector.extract_strided_slice %287 {offsets = [0, 8], sizes = [8, 8], strides = [1, 1]} : vector<8x32xf32> to vector<8x8xf32>
    %cst_107 = arith.constant 0.353553385 : f32
    %308 = vector.broadcast %cst_107 : f32 to vector<8x8xf32>
    %309 = arith.mulf %307, %308 : vector<8x8xf32>
    %310 = vector.extract_strided_slice %288 {offsets = [0, 8], sizes = [10, 8], strides = [1, 1]} : vector<10x32xf32> to vector<10x8xf32>
    %cst_108 = arith.constant dense<0.000000e+00> : vector<8x10xf32>
    %311 = tpu.matmul %309, %310, %cst_108 {dimension_numbers = #tpu.dot_dimension_numbers<[1], [1], [0], [0], [0, 0, 1, 0], [], []>} : vector<8x8xf32>, vector<10x8xf32>, vector<8x10xf32> -> vector<8x10xf32>
    %cst_109 = arith.constant dense<0xFF800000> : vector<8xf32>
    %312 = vector.multi_reduction <maximumf>, %311, %cst_109 [1] : vector<8x10xf32> to vector<8xf32>
    %313 = vector.shape_cast %312 : vector<8xf32> to vector<8x1xf32>
    %314 = vector.broadcast %313 : vector<8x1xf32> to vector<8x10xf32>
    %315 = arith.subf %311, %314 : vector<8x10xf32>
    %316 = math.exp %315 : vector<8x10xf32>
    %cst_110 = arith.constant dense<0.000000e+00> : vector<8xf32>
    %317 = vector.multi_reduction <add>, %316, %cst_110 [1] : vector<8x10xf32> to vector<8xf32>
    %318 = vector.shape_cast %317 : vector<8xf32> to vector<8x1xf32>
    %319 = tpu.reciprocal %318 {approx = true} : vector<8x1xf32> -> vector<8x1xf32>
    %320 = vector.broadcast %319 : vector<8x1xf32> to vector<8x10xf32>
    %321 = arith.mulf %316, %320 : vector<8x10xf32>
    %322 = vector.extract_strided_slice %289 {offsets = [0, 8], sizes = [10, 8], strides = [1, 1]} : vector<10x32xf32> to vector<10x8xf32>
    %cst_111 = arith.constant dense<0.000000e+00> : vector<8x8xf32>
    %323 = tpu.matmul %321, %322, %cst_111 {dimension_numbers = #tpu.dot_dimension_numbers<[1], [0], [0], [1], [0, 0, 1, 1], [], []>} : vector<8x10xf32>, vector<10x8xf32>, vector<8x8xf32> -> vector<8x8xf32>
    %324 = vector.extract_strided_slice %287 {offsets = [0, 16], sizes = [8, 8], strides = [1, 1]} : vector<8x32xf32> to vector<8x8xf32>
    %cst_112 = arith.constant 0.353553385 : f32
    %325 = vector.broadcast %cst_112 : f32 to vector<8x8xf32>
    %326 = arith.mulf %324, %325 : vector<8x8xf32>
    %327 = vector.extract_strided_slice %288 {offsets = [0, 16], sizes = [10, 8], strides = [1, 1]} : vector<10x32xf32> to vector<10x8xf32>
    %cst_113 = arith.constant dense<0.000000e+00> : vector<8x10xf32>
    %328 = tpu.matmul %326, %327, %cst_113 {dimension_numbers = #tpu.dot_dimension_numbers<[1], [1], [0], [0], [0, 0, 1, 0], [], []>} : vector<8x8xf32>, vector<10x8xf32>, vector<8x10xf32> -> vector<8x10xf32>
    %cst_114 = arith.constant dense<0xFF800000> : vector<8xf32>
    %329 = vector.multi_reduction <maximumf>, %328, %cst_114 [1] : vector<8x10xf32> to vector<8xf32>
    %330 = vector.shape_cast %329 : vector<8xf32> to vector<8x1xf32>
    %331 = vector.broadcast %330 : vector<8x1xf32> to vector<8x10xf32>
    %332 = arith.subf %328, %331 : vector<8x10xf32>
    %333 = math.exp %332 : vector<8x10xf32>
    %cst_115 = arith.constant dense<0.000000e+00> : vector<8xf32>
    %334 = vector.multi_reduction <add>, %333, %cst_115 [1] : vector<8x10xf32> to vector<8xf32>
    %335 = vector.shape_cast %334 : vector<8xf32> to vector<8x1xf32>
    %336 = tpu.reciprocal %335 {approx = true} : vector<8x1xf32> -> vector<8x1xf32>
    %337 = vector.broadcast %336 : vector<8x1xf32> to vector<8x10xf32>
    %338 = arith.mulf %333, %337 : vector<8x10xf32>
    %339 = vector.extract_strided_slice %289 {offsets = [0, 16], sizes = [10, 8], strides = [1, 1]} : vector<10x32xf32> to vector<10x8xf32>
    %cst_116 = arith.constant dense<0.000000e+00> : vector<8x8xf32>
    %340 = tpu.matmul %338, %339, %cst_116 {dimension_numbers = #tpu.dot_dimension_numbers<[1], [0], [0], [1], [0, 0, 1, 1], [], []>} : vector<8x10xf32>, vector<10x8xf32>, vector<8x8xf32> -> vector<8x8xf32>
    %341 = vector.extract_strided_slice %287 {offsets = [0, 24], sizes = [8, 8], strides = [1, 1]} : vector<8x32xf32> to vector<8x8xf32>
    %cst_117 = arith.constant 0.353553385 : f32
    %342 = vector.broadcast %cst_117 : f32 to vector<8x8xf32>
    %343 = arith.mulf %341, %342 : vector<8x8xf32>
    %344 = vector.extract_strided_slice %288 {offsets = [0, 24], sizes = [10, 8], strides = [1, 1]} : vector<10x32xf32> to vector<10x8xf32>
    %cst_118 = arith.constant dense<0.000000e+00> : vector<8x10xf32>
    %345 = tpu.matmul %343, %344, %cst_118 {dimension_numbers = #tpu.dot_dimension_numbers<[1], [1], [0], [0], [0, 0, 1, 0], [], []>} : vector<8x8xf32>, vector<10x8xf32>, vector<8x10xf32> -> vector<8x10xf32>
    %cst_119 = arith.constant dense<0xFF800000> : vector<8xf32>
    %346 = vector.multi_reduction <maximumf>, %345, %cst_119 [1] : vector<8x10xf32> to vector<8xf32>
    %347 = vector.shape_cast %346 : vector<8xf32> to vector<8x1xf32>
    %348 = vector.broadcast %347 : vector<8x1xf32> to vector<8x10xf32>
    %349 = arith.subf %345, %348 : vector<8x10xf32>
    %350 = math.exp %349 : vector<8x10xf32>
    %cst_120 = arith.constant dense<0.000000e+00> : vector<8xf32>
    %351 = vector.multi_reduction <add>, %350, %cst_120 [1] : vector<8x10xf32> to vector<8xf32>
    %352 = vector.shape_cast %351 : vector<8xf32> to vector<8x1xf32>
    %353 = tpu.reciprocal %352 {approx = true} : vector<8x1xf32> -> vector<8x1xf32>
    %354 = vector.broadcast %353 : vector<8x1xf32> to vector<8x10xf32>
    %355 = arith.mulf %350, %354 : vector<8x10xf32>
    %356 = vector.extract_strided_slice %289 {offsets = [0, 24], sizes = [10, 8], strides = [1, 1]} : vector<10x32xf32> to vector<10x8xf32>
    %cst_121 = arith.constant dense<0.000000e+00> : vector<8x8xf32>
    %357 = tpu.matmul %355, %356, %cst_121 {dimension_numbers = #tpu.dot_dimension_numbers<[1], [0], [0], [1], [0, 0, 1, 1], [], []>} : vector<8x10xf32>, vector<10x8xf32>, vector<8x8xf32> -> vector<8x8xf32>
    %358 = tpu.concatenate %306, %323, %340, %357 in 1 : vector<8x8xf32>, vector<8x8xf32>, vector<8x8xf32>, vector<8x8xf32> -> vector<8x32xf32>
    %359 = tpu.concatenate %286, %358 in 0 : vector<8x32xf32>, vector<8x32xf32> -> vector<16x32xf32>
    %cst_122 = arith.constant dense<0.000000e+00> : vector<16x32xf32>
    %360 = tpu.matmul %359, %200, %cst_122 {dimension_numbers = #tpu.dot_dimension_numbers<[1], [0], [0], [1], [0, 0, 1, 1], [], []>} : vector<16x32xf32>, vector<32x32xf32>, vector<16x32xf32> -> vector<16x32xf32>
    %361 = vector.broadcast %202 : vector<1x32xf32> to vector<16x32xf32>
    %362 = arith.addf %360, %361 : vector<16x32xf32>
    %c0_123 = arith.constant 0 : index
    %c0_124 = arith.constant 0 : index
    %c0_125 = arith.constant 0 : index
    %363 = vector.load %arg12[%c0_123, %c0_124, %c0_125] : memref<2x1x32xf32, #tpu.memory_space<vmem>>, vector<1x1x32xf32>
    %364 = vector.shape_cast %363 : vector<1x1x32xf32> to vector<1x32xf32>
    %c0_126 = arith.constant 0 : index
    %c0_127 = arith.constant 0 : index
    %c0_128 = arith.constant 0 : index
    %365 = vector.load %arg13[%c0_126, %c0_127, %c0_128] : memref<2x1x32xf32, #tpu.memory_space<vmem>>, vector<1x1x32xf32>
    %366 = vector.shape_cast %365 : vector<1x1x32xf32> to vector<1x32xf32>
    %367 = arith.addf %194, %362 : vector<16x32xf32>
    %cst_129 = arith.constant dense<0.000000e+00> : vector<16xf32>
    %368 = vector.multi_reduction <add>, %367, %cst_129 [1] : vector<16x32xf32> to vector<16xf32>
    %369 = vector.shape_cast %368 : vector<16xf32> to vector<16x1xf32>
    %cst_130 = arith.constant 3.200000e+01 : f32
    %370 = vector.broadcast %cst_130 : f32 to vector<16x1xf32>
    %371 = arith.divf %369, %370 : vector<16x1xf32>
    %372 = vector.broadcast %371 : vector<16x1xf32> to vector<16x32xf32>
    %373 = arith.subf %367, %372 : vector<16x32xf32>
    %374 = arith.mulf %373, %373 : vector<16x32xf32>
    %cst_131 = arith.constant dense<0.000000e+00> : vector<16xf32>
    %375 = vector.multi_reduction <add>, %374, %cst_131 [1] : vector<16x32xf32> to vector<16xf32>
    %376 = vector.shape_cast %375 : vector<16xf32> to vector<16x1xf32>
    %cst_132 = arith.constant 3.200000e+01 : f32
    %377 = vector.broadcast %cst_132 : f32 to vector<16x1xf32>
    %378 = arith.divf %376, %377 : vector<16x1xf32>
    %cst_133 = arith.constant 9.99999974E-6 : f32
    %379 = vector.broadcast %cst_133 : f32 to vector<16x1xf32>
    %380 = arith.addf %378, %379 : vector<16x1xf32>
    %381 = math.rsqrt %380 : vector<16x1xf32>
    %382 = vector.broadcast %381 : vector<16x1xf32> to vector<16x32xf32>
    %383 = arith.mulf %373, %382 : vector<16x32xf32>
    %384 = vector.broadcast %364 : vector<1x32xf32> to vector<16x32xf32>
    %385 = arith.mulf %383, %384 : vector<16x32xf32>
    %386 = vector.broadcast %366 : vector<1x32xf32> to vector<16x32xf32>
    %387 = arith.addf %385, %386 : vector<16x32xf32>
    %c0_134 = arith.constant 0 : index
    %c0_135 = arith.constant 0 : index
    %c0_136 = arith.constant 0 : index
    %388 = vector.load %arg16[%c0_134, %c0_135, %c0_136] : memref<2x32x64xf32, #tpu.memory_space<vmem>>, vector<1x32x64xf32>
    %389 = vector.shape_cast %388 : vector<1x32x64xf32> to vector<32x64xf32>
    %cst_137 = arith.constant dense<0.000000e+00> : vector<16x64xf32>
    %390 = tpu.matmul %387, %389, %cst_137 {dimension_numbers = #tpu.dot_dimension_numbers<[1], [0], [0], [1], [0, 0, 1, 1], [], []>} : vector<16x32xf32>, vector<32x64xf32>, vector<16x64xf32> -> vector<16x64xf32>
    %c0_138 = arith.constant 0 : index
    %c0_139 = arith.constant 0 : index
    %c0_140 = arith.constant 0 : index
    %391 = vector.load %arg17[%c0_138, %c0_139, %c0_140] : memref<2x1x64xf32, #tpu.memory_space<vmem>>, vector<1x1x64xf32>
    %392 = vector.shape_cast %391 : vector<1x1x64xf32> to vector<1x64xf32>
    %393 = vector.broadcast %392 : vector<1x64xf32> to vector<16x64xf32>
    %394 = arith.addf %390, %393 : vector<16x64xf32>
    %cst_141 = arith.constant 0.000000e+00 : f32
    %395 = vector.broadcast %cst_141 : f32 to vector<16x64xf32>
    %396 = arith.maximumf %394, %395 : vector<16x64xf32>
    %c0_142 = arith.constant 0 : index
    %c0_143 = arith.constant 0 : index
    %c0_144 = arith.constant 0 : index
    %397 = vector.load %arg18[%c0_142, %c0_143, %c0_144] : memref<2x64x32xf32, #tpu.memory_space<vmem>>, vector<1x64x32xf32>
    %398 = vector.shape_cast %397 : vector<1x64x32xf32> to vector<64x32xf32>
    %cst_145 = arith.constant dense<0.000000e+00> : vector<16x32xf32>
    %399 = tpu.matmul %396, %398, %cst_145 {dimension_numbers = #tpu.dot_dimension_numbers<[1], [0], [0], [1], [0, 0, 1, 1], [], []>} : vector<16x64xf32>, vector<64x32xf32>, vector<16x32xf32> -> vector<16x32xf32>
    %c0_146 = arith.constant 0 : index
    %c0_147 = arith.constant 0 : index
    %c0_148 = arith.constant 0 : index
    %400 = vector.load %arg19[%c0_146, %c0_147, %c0_148] : memref<2x1x32xf32, #tpu.memory_space<vmem>>, vector<1x1x32xf32>
    %401 = vector.shape_cast %400 : vector<1x1x32xf32> to vector<1x32xf32>
    %402 = vector.broadcast %401 : vector<1x32xf32> to vector<16x32xf32>
    %403 = arith.addf %399, %402 : vector<16x32xf32>
    %c0_149 = arith.constant 0 : index
    %c0_150 = arith.constant 0 : index
    %c0_151 = arith.constant 0 : index
    %404 = vector.load %arg14[%c0_149, %c0_150, %c0_151] : memref<2x1x32xf32, #tpu.memory_space<vmem>>, vector<1x1x32xf32>
    %405 = vector.shape_cast %404 : vector<1x1x32xf32> to vector<1x32xf32>
    %c0_152 = arith.constant 0 : index
    %c0_153 = arith.constant 0 : index
    %c0_154 = arith.constant 0 : index
    %406 = vector.load %arg15[%c0_152, %c0_153, %c0_154] : memref<2x1x32xf32, #tpu.memory_space<vmem>>, vector<1x1x32xf32>
    %407 = vector.shape_cast %406 : vector<1x1x32xf32> to vector<1x32xf32>
    %408 = arith.addf %387, %403 : vector<16x32xf32>
    %cst_155 = arith.constant dense<0.000000e+00> : vector<16xf32>
    %409 = vector.multi_reduction <add>, %408, %cst_155 [1] : vector<16x32xf32> to vector<16xf32>
    %410 = vector.shape_cast %409 : vector<16xf32> to vector<16x1xf32>
    %cst_156 = arith.constant 3.200000e+01 : f32
    %411 = vector.broadcast %cst_156 : f32 to vector<16x1xf32>
    %412 = arith.divf %410, %411 : vector<16x1xf32>
    %413 = vector.broadcast %412 : vector<16x1xf32> to vector<16x32xf32>
    %414 = arith.subf %408, %413 : vector<16x32xf32>
    %415 = arith.mulf %414, %414 : vector<16x32xf32>
    %cst_157 = arith.constant dense<0.000000e+00> : vector<16xf32>
    %416 = vector.multi_reduction <add>, %415, %cst_157 [1] : vector<16x32xf32> to vector<16xf32>
    %417 = vector.shape_cast %416 : vector<16xf32> to vector<16x1xf32>
    %cst_158 = arith.constant 3.200000e+01 : f32
    %418 = vector.broadcast %cst_158 : f32 to vector<16x1xf32>
    %419 = arith.divf %417, %418 : vector<16x1xf32>
    %cst_159 = arith.constant 9.99999974E-6 : f32
    %420 = vector.broadcast %cst_159 : f32 to vector<16x1xf32>
    %421 = arith.addf %419, %420 : vector<16x1xf32>
    %422 = math.rsqrt %421 : vector<16x1xf32>
    %423 = vector.broadcast %422 : vector<16x1xf32> to vector<16x32xf32>
    %424 = arith.mulf %414, %423 : vector<16x32xf32>
    %425 = vector.broadcast %405 : vector<1x32xf32> to vector<16x32xf32>
    %426 = arith.mulf %424, %425 : vector<16x32xf32>
    %427 = vector.broadcast %407 : vector<1x32xf32> to vector<16x32xf32>
    %428 = arith.addf %426, %427 : vector<16x32xf32>
    %c1 = arith.constant 1 : index
    %c0_160 = arith.constant 0 : index
    %c0_161 = arith.constant 0 : index
    %429 = vector.load %arg2[%c1, %c0_160, %c0_161] : memref<2x32x96xf32, #tpu.memory_space<vmem>>, vector<1x32x96xf32>
    %430 = vector.shape_cast %429 : vector<1x32x96xf32> to vector<32x96xf32>
    %c1_162 = arith.constant 1 : index
    %c0_163 = arith.constant 0 : index
    %c0_164 = arith.constant 0 : index
    %431 = vector.load %arg3[%c1_162, %c0_163, %c0_164] : memref<2x1x96xf32, #tpu.memory_space<vmem>>, vector<1x1x96xf32>
    %432 = vector.shape_cast %431 : vector<1x1x96xf32> to vector<1x96xf32>
    %c1_165 = arith.constant 1 : index
    %c0_166 = arith.constant 0 : index
    %c0_167 = arith.constant 0 : index
    %433 = vector.load %arg4[%c1_165, %c0_166, %c0_167] : memref<2x32x32xf32, #tpu.memory_space<vmem>>, vector<1x32x32xf32>
    %434 = vector.shape_cast %433 : vector<1x32x32xf32> to vector<32x32xf32>
    %c1_168 = arith.constant 1 : index
    %c0_169 = arith.constant 0 : index
    %c0_170 = arith.constant 0 : index
    %435 = vector.load %arg5[%c1_168, %c0_169, %c0_170] : memref<2x1x32xf32, #tpu.memory_space<vmem>>, vector<1x1x32xf32>
    %436 = vector.shape_cast %435 : vector<1x1x32xf32> to vector<1x32xf32>
    %437 = vector.extract_strided_slice %430 {offsets = [0, 0], sizes = [32, 32], strides = [1, 1]} : vector<32x96xf32> to vector<32x32xf32>
    %cst_171 = arith.constant dense<0.000000e+00> : vector<16x32xf32>
    %438 = tpu.matmul %428, %437, %cst_171 {dimension_numbers = #tpu.dot_dimension_numbers<[1], [0], [0], [1], [0, 0, 1, 1], [], []>} : vector<16x32xf32>, vector<32x32xf32>, vector<16x32xf32> -> vector<16x32xf32>
    %439 = vector.extract_strided_slice %432 {offsets = [0, 0], sizes = [1, 32], strides = [1, 1]} : vector<1x96xf32> to vector<1x32xf32>
    %440 = vector.broadcast %439 : vector<1x32xf32> to vector<16x32xf32>
    %441 = arith.addf %438, %440 : vector<16x32xf32>
    %442 = vector.extract_strided_slice %430 {offsets = [0, 32], sizes = [32, 64], strides = [1, 1]} : vector<32x96xf32> to vector<32x64xf32>
    %cst_172 = arith.constant dense<0.000000e+00> : vector<16x64xf32>
    %443 = tpu.matmul %428, %442, %cst_172 {dimension_numbers = #tpu.dot_dimension_numbers<[1], [0], [0], [1], [0, 0, 1, 1], [], []>} : vector<16x32xf32>, vector<32x64xf32>, vector<16x64xf32> -> vector<16x64xf32>
    %444 = vector.extract_strided_slice %432 {offsets = [0, 32], sizes = [1, 64], strides = [1, 1]} : vector<1x96xf32> to vector<1x64xf32>
    %445 = vector.broadcast %444 : vector<1x64xf32> to vector<16x64xf32>
    %446 = arith.addf %443, %445 : vector<16x64xf32>
    %447 = vector.extract_strided_slice %446 {offsets = [0, 0], sizes = [16, 32], strides = [1, 1]} : vector<16x64xf32> to vector<16x32xf32>
    %448 = vector.extract_strided_slice %446 {offsets = [0, 32], sizes = [16, 32], strides = [1, 1]} : vector<16x64xf32> to vector<16x32xf32>
    %449 = vector.extract_strided_slice %441 {offsets = [0, 0], sizes = [8, 32], strides = [1, 1]} : vector<16x32xf32> to vector<8x32xf32>
    %450 = vector.extract_strided_slice %447 {offsets = [0, 0], sizes = [8, 32], strides = [1, 1]} : vector<16x32xf32> to vector<8x32xf32>
    %451 = vector.extract_strided_slice %448 {offsets = [0, 0], sizes = [8, 32], strides = [1, 1]} : vector<16x32xf32> to vector<8x32xf32>
    %452 = vector.extract_strided_slice %449 {offsets = [0, 0], sizes = [8, 8], strides = [1, 1]} : vector<8x32xf32> to vector<8x8xf32>
    %cst_173 = arith.constant 0.353553385 : f32
    %453 = vector.broadcast %cst_173 : f32 to vector<8x8xf32>
    %454 = arith.mulf %452, %453 : vector<8x8xf32>
    %455 = vector.extract_strided_slice %450 {offsets = [0, 0], sizes = [8, 8], strides = [1, 1]} : vector<8x32xf32> to vector<8x8xf32>
    %cst_174 = arith.constant dense<0.000000e+00> : vector<8x8xf32>
    %456 = tpu.matmul %454, %455, %cst_174 {dimension_numbers = #tpu.dot_dimension_numbers<[1], [1], [0], [0], [0, 0, 1, 0], [], []>} : vector<8x8xf32>, vector<8x8xf32>, vector<8x8xf32> -> vector<8x8xf32>
    %cst_175 = arith.constant dense<0xFF800000> : vector<8xf32>
    %457 = vector.multi_reduction <maximumf>, %456, %cst_175 [1] : vector<8x8xf32> to vector<8xf32>
    %458 = vector.shape_cast %457 : vector<8xf32> to vector<8x1xf32>
    %459 = vector.broadcast %458 : vector<8x1xf32> to vector<8x8xf32>
    %460 = arith.subf %456, %459 : vector<8x8xf32>
    %461 = math.exp %460 : vector<8x8xf32>
    %cst_176 = arith.constant dense<0.000000e+00> : vector<8xf32>
    %462 = vector.multi_reduction <add>, %461, %cst_176 [1] : vector<8x8xf32> to vector<8xf32>
    %463 = vector.shape_cast %462 : vector<8xf32> to vector<8x1xf32>
    %464 = tpu.reciprocal %463 {approx = true} : vector<8x1xf32> -> vector<8x1xf32>
    %465 = vector.broadcast %464 : vector<8x1xf32> to vector<8x8xf32>
    %466 = arith.mulf %461, %465 : vector<8x8xf32>
    %467 = vector.extract_strided_slice %451 {offsets = [0, 0], sizes = [8, 8], strides = [1, 1]} : vector<8x32xf32> to vector<8x8xf32>
    %cst_177 = arith.constant dense<0.000000e+00> : vector<8x8xf32>
    %468 = tpu.matmul %466, %467, %cst_177 {dimension_numbers = #tpu.dot_dimension_numbers<[1], [0], [0], [1], [0, 0, 1, 1], [], []>} : vector<8x8xf32>, vector<8x8xf32>, vector<8x8xf32> -> vector<8x8xf32>
    %469 = vector.extract_strided_slice %449 {offsets = [0, 8], sizes = [8, 8], strides = [1, 1]} : vector<8x32xf32> to vector<8x8xf32>
    %cst_178 = arith.constant 0.353553385 : f32
    %470 = vector.broadcast %cst_178 : f32 to vector<8x8xf32>
    %471 = arith.mulf %469, %470 : vector<8x8xf32>
    %472 = vector.extract_strided_slice %450 {offsets = [0, 8], sizes = [8, 8], strides = [1, 1]} : vector<8x32xf32> to vector<8x8xf32>
    %cst_179 = arith.constant dense<0.000000e+00> : vector<8x8xf32>
    %473 = tpu.matmul %471, %472, %cst_179 {dimension_numbers = #tpu.dot_dimension_numbers<[1], [1], [0], [0], [0, 0, 1, 0], [], []>} : vector<8x8xf32>, vector<8x8xf32>, vector<8x8xf32> -> vector<8x8xf32>
    %cst_180 = arith.constant dense<0xFF800000> : vector<8xf32>
    %474 = vector.multi_reduction <maximumf>, %473, %cst_180 [1] : vector<8x8xf32> to vector<8xf32>
    %475 = vector.shape_cast %474 : vector<8xf32> to vector<8x1xf32>
    %476 = vector.broadcast %475 : vector<8x1xf32> to vector<8x8xf32>
    %477 = arith.subf %473, %476 : vector<8x8xf32>
    %478 = math.exp %477 : vector<8x8xf32>
    %cst_181 = arith.constant dense<0.000000e+00> : vector<8xf32>
    %479 = vector.multi_reduction <add>, %478, %cst_181 [1] : vector<8x8xf32> to vector<8xf32>
    %480 = vector.shape_cast %479 : vector<8xf32> to vector<8x1xf32>
    %481 = tpu.reciprocal %480 {approx = true} : vector<8x1xf32> -> vector<8x1xf32>
    %482 = vector.broadcast %481 : vector<8x1xf32> to vector<8x8xf32>
    %483 = arith.mulf %478, %482 : vector<8x8xf32>
    %484 = vector.extract_strided_slice %451 {offsets = [0, 8], sizes = [8, 8], strides = [1, 1]} : vector<8x32xf32> to vector<8x8xf32>
    %cst_182 = arith.constant dense<0.000000e+00> : vector<8x8xf32>
    %485 = tpu.matmul %483, %484, %cst_182 {dimension_numbers = #tpu.dot_dimension_numbers<[1], [0], [0], [1], [0, 0, 1, 1], [], []>} : vector<8x8xf32>, vector<8x8xf32>, vector<8x8xf32> -> vector<8x8xf32>
    %486 = vector.extract_strided_slice %449 {offsets = [0, 16], sizes = [8, 8], strides = [1, 1]} : vector<8x32xf32> to vector<8x8xf32>
    %cst_183 = arith.constant 0.353553385 : f32
    %487 = vector.broadcast %cst_183 : f32 to vector<8x8xf32>
    %488 = arith.mulf %486, %487 : vector<8x8xf32>
    %489 = vector.extract_strided_slice %450 {offsets = [0, 16], sizes = [8, 8], strides = [1, 1]} : vector<8x32xf32> to vector<8x8xf32>
    %cst_184 = arith.constant dense<0.000000e+00> : vector<8x8xf32>
    %490 = tpu.matmul %488, %489, %cst_184 {dimension_numbers = #tpu.dot_dimension_numbers<[1], [1], [0], [0], [0, 0, 1, 0], [], []>} : vector<8x8xf32>, vector<8x8xf32>, vector<8x8xf32> -> vector<8x8xf32>
    %cst_185 = arith.constant dense<0xFF800000> : vector<8xf32>
    %491 = vector.multi_reduction <maximumf>, %490, %cst_185 [1] : vector<8x8xf32> to vector<8xf32>
    %492 = vector.shape_cast %491 : vector<8xf32> to vector<8x1xf32>
    %493 = vector.broadcast %492 : vector<8x1xf32> to vector<8x8xf32>
    %494 = arith.subf %490, %493 : vector<8x8xf32>
    %495 = math.exp %494 : vector<8x8xf32>
    %cst_186 = arith.constant dense<0.000000e+00> : vector<8xf32>
    %496 = vector.multi_reduction <add>, %495, %cst_186 [1] : vector<8x8xf32> to vector<8xf32>
    %497 = vector.shape_cast %496 : vector<8xf32> to vector<8x1xf32>
    %498 = tpu.reciprocal %497 {approx = true} : vector<8x1xf32> -> vector<8x1xf32>
    %499 = vector.broadcast %498 : vector<8x1xf32> to vector<8x8xf32>
    %500 = arith.mulf %495, %499 : vector<8x8xf32>
    %501 = vector.extract_strided_slice %451 {offsets = [0, 16], sizes = [8, 8], strides = [1, 1]} : vector<8x32xf32> to vector<8x8xf32>
    %cst_187 = arith.constant dense<0.000000e+00> : vector<8x8xf32>
    %502 = tpu.matmul %500, %501, %cst_187 {dimension_numbers = #tpu.dot_dimension_numbers<[1], [0], [0], [1], [0, 0, 1, 1], [], []>} : vector<8x8xf32>, vector<8x8xf32>, vector<8x8xf32> -> vector<8x8xf32>
    %503 = vector.extract_strided_slice %449 {offsets = [0, 24], sizes = [8, 8], strides = [1, 1]} : vector<8x32xf32> to vector<8x8xf32>
    %cst_188 = arith.constant 0.353553385 : f32
    %504 = vector.broadcast %cst_188 : f32 to vector<8x8xf32>
    %505 = arith.mulf %503, %504 : vector<8x8xf32>
    %506 = vector.extract_strided_slice %450 {offsets = [0, 24], sizes = [8, 8], strides = [1, 1]} : vector<8x32xf32> to vector<8x8xf32>
    %cst_189 = arith.constant dense<0.000000e+00> : vector<8x8xf32>
    %507 = tpu.matmul %505, %506, %cst_189 {dimension_numbers = #tpu.dot_dimension_numbers<[1], [1], [0], [0], [0, 0, 1, 0], [], []>} : vector<8x8xf32>, vector<8x8xf32>, vector<8x8xf32> -> vector<8x8xf32>
    %cst_190 = arith.constant dense<0xFF800000> : vector<8xf32>
    %508 = vector.multi_reduction <maximumf>, %507, %cst_190 [1] : vector<8x8xf32> to vector<8xf32>
    %509 = vector.shape_cast %508 : vector<8xf32> to vector<8x1xf32>
    %510 = vector.broadcast %509 : vector<8x1xf32> to vector<8x8xf32>
    %511 = arith.subf %507, %510 : vector<8x8xf32>
    %512 = math.exp %511 : vector<8x8xf32>
    %cst_191 = arith.constant dense<0.000000e+00> : vector<8xf32>
    %513 = vector.multi_reduction <add>, %512, %cst_191 [1] : vector<8x8xf32> to vector<8xf32>
    %514 = vector.shape_cast %513 : vector<8xf32> to vector<8x1xf32>
    %515 = tpu.reciprocal %514 {approx = true} : vector<8x1xf32> -> vector<8x1xf32>
    %516 = vector.broadcast %515 : vector<8x1xf32> to vector<8x8xf32>
    %517 = arith.mulf %512, %516 : vector<8x8xf32>
    %518 = vector.extract_strided_slice %451 {offsets = [0, 24], sizes = [8, 8], strides = [1, 1]} : vector<8x32xf32> to vector<8x8xf32>
    %cst_192 = arith.constant dense<0.000000e+00> : vector<8x8xf32>
    %519 = tpu.matmul %517, %518, %cst_192 {dimension_numbers = #tpu.dot_dimension_numbers<[1], [0], [0], [1], [0, 0, 1, 1], [], []>} : vector<8x8xf32>, vector<8x8xf32>, vector<8x8xf32> -> vector<8x8xf32>
    %520 = tpu.concatenate %468, %485, %502, %519 in 1 : vector<8x8xf32>, vector<8x8xf32>, vector<8x8xf32>, vector<8x8xf32> -> vector<8x32xf32>
    %521 = vector.extract_strided_slice %441 {offsets = [8, 0], sizes = [8, 32], strides = [1, 1]} : vector<16x32xf32> to vector<8x32xf32>
    %522 = vector.extract_strided_slice %447 {offsets = [8, 0], sizes = [8, 32], strides = [1, 1]} : vector<16x32xf32> to vector<8x32xf32>
    %523 = vector.extract_strided_slice %448 {offsets = [8, 0], sizes = [8, 32], strides = [1, 1]} : vector<16x32xf32> to vector<8x32xf32>
    %524 = vector.extract_strided_slice %521 {offsets = [0, 0], sizes = [8, 8], strides = [1, 1]} : vector<8x32xf32> to vector<8x8xf32>
    %cst_193 = arith.constant 0.353553385 : f32
    %525 = vector.broadcast %cst_193 : f32 to vector<8x8xf32>
    %526 = arith.mulf %524, %525 : vector<8x8xf32>
    %527 = vector.extract_strided_slice %522 {offsets = [0, 0], sizes = [8, 8], strides = [1, 1]} : vector<8x32xf32> to vector<8x8xf32>
    %cst_194 = arith.constant dense<0.000000e+00> : vector<8x8xf32>
    %528 = tpu.matmul %526, %527, %cst_194 {dimension_numbers = #tpu.dot_dimension_numbers<[1], [1], [0], [0], [0, 0, 1, 0], [], []>} : vector<8x8xf32>, vector<8x8xf32>, vector<8x8xf32> -> vector<8x8xf32>
    %cst_195 = arith.constant dense<0xFF800000> : vector<8xf32>
    %529 = vector.multi_reduction <maximumf>, %528, %cst_195 [1] : vector<8x8xf32> to vector<8xf32>
    %530 = vector.shape_cast %529 : vector<8xf32> to vector<8x1xf32>
    %531 = vector.broadcast %530 : vector<8x1xf32> to vector<8x8xf32>
    %532 = arith.subf %528, %531 : vector<8x8xf32>
    %533 = math.exp %532 : vector<8x8xf32>
    %cst_196 = arith.constant dense<0.000000e+00> : vector<8xf32>
    %534 = vector.multi_reduction <add>, %533, %cst_196 [1] : vector<8x8xf32> to vector<8xf32>
    %535 = vector.shape_cast %534 : vector<8xf32> to vector<8x1xf32>
    %536 = tpu.reciprocal %535 {approx = true} : vector<8x1xf32> -> vector<8x1xf32>
    %537 = vector.broadcast %536 : vector<8x1xf32> to vector<8x8xf32>
    %538 = arith.mulf %533, %537 : vector<8x8xf32>
    %539 = vector.extract_strided_slice %523 {offsets = [0, 0], sizes = [8, 8], strides = [1, 1]} : vector<8x32xf32> to vector<8x8xf32>
    %cst_197 = arith.constant dense<0.000000e+00> : vector<8x8xf32>
    %540 = tpu.matmul %538, %539, %cst_197 {dimension_numbers = #tpu.dot_dimension_numbers<[1], [0], [0], [1], [0, 0, 1, 1], [], []>} : vector<8x8xf32>, vector<8x8xf32>, vector<8x8xf32> -> vector<8x8xf32>
    %541 = vector.extract_strided_slice %521 {offsets = [0, 8], sizes = [8, 8], strides = [1, 1]} : vector<8x32xf32> to vector<8x8xf32>
    %cst_198 = arith.constant 0.353553385 : f32
    %542 = vector.broadcast %cst_198 : f32 to vector<8x8xf32>
    %543 = arith.mulf %541, %542 : vector<8x8xf32>
    %544 = vector.extract_strided_slice %522 {offsets = [0, 8], sizes = [8, 8], strides = [1, 1]} : vector<8x32xf32> to vector<8x8xf32>
    %cst_199 = arith.constant dense<0.000000e+00> : vector<8x8xf32>
    %545 = tpu.matmul %543, %544, %cst_199 {dimension_numbers = #tpu.dot_dimension_numbers<[1], [1], [0], [0], [0, 0, 1, 0], [], []>} : vector<8x8xf32>, vector<8x8xf32>, vector<8x8xf32> -> vector<8x8xf32>
    %cst_200 = arith.constant dense<0xFF800000> : vector<8xf32>
    %546 = vector.multi_reduction <maximumf>, %545, %cst_200 [1] : vector<8x8xf32> to vector<8xf32>
    %547 = vector.shape_cast %546 : vector<8xf32> to vector<8x1xf32>
    %548 = vector.broadcast %547 : vector<8x1xf32> to vector<8x8xf32>
    %549 = arith.subf %545, %548 : vector<8x8xf32>
    %550 = math.exp %549 : vector<8x8xf32>
    %cst_201 = arith.constant dense<0.000000e+00> : vector<8xf32>
    %551 = vector.multi_reduction <add>, %550, %cst_201 [1] : vector<8x8xf32> to vector<8xf32>
    %552 = vector.shape_cast %551 : vector<8xf32> to vector<8x1xf32>
    %553 = tpu.reciprocal %552 {approx = true} : vector<8x1xf32> -> vector<8x1xf32>
    %554 = vector.broadcast %553 : vector<8x1xf32> to vector<8x8xf32>
    %555 = arith.mulf %550, %554 : vector<8x8xf32>
    %556 = vector.extract_strided_slice %523 {offsets = [0, 8], sizes = [8, 8], strides = [1, 1]} : vector<8x32xf32> to vector<8x8xf32>
    %cst_202 = arith.constant dense<0.000000e+00> : vector<8x8xf32>
    %557 = tpu.matmul %555, %556, %cst_202 {dimension_numbers = #tpu.dot_dimension_numbers<[1], [0], [0], [1], [0, 0, 1, 1], [], []>} : vector<8x8xf32>, vector<8x8xf32>, vector<8x8xf32> -> vector<8x8xf32>
    %558 = vector.extract_strided_slice %521 {offsets = [0, 16], sizes = [8, 8], strides = [1, 1]} : vector<8x32xf32> to vector<8x8xf32>
    %cst_203 = arith.constant 0.353553385 : f32
    %559 = vector.broadcast %cst_203 : f32 to vector<8x8xf32>
    %560 = arith.mulf %558, %559 : vector<8x8xf32>
    %561 = vector.extract_strided_slice %522 {offsets = [0, 16], sizes = [8, 8], strides = [1, 1]} : vector<8x32xf32> to vector<8x8xf32>
    %cst_204 = arith.constant dense<0.000000e+00> : vector<8x8xf32>
    %562 = tpu.matmul %560, %561, %cst_204 {dimension_numbers = #tpu.dot_dimension_numbers<[1], [1], [0], [0], [0, 0, 1, 0], [], []>} : vector<8x8xf32>, vector<8x8xf32>, vector<8x8xf32> -> vector<8x8xf32>
    %cst_205 = arith.constant dense<0xFF800000> : vector<8xf32>
    %563 = vector.multi_reduction <maximumf>, %562, %cst_205 [1] : vector<8x8xf32> to vector<8xf32>
    %564 = vector.shape_cast %563 : vector<8xf32> to vector<8x1xf32>
    %565 = vector.broadcast %564 : vector<8x1xf32> to vector<8x8xf32>
    %566 = arith.subf %562, %565 : vector<8x8xf32>
    %567 = math.exp %566 : vector<8x8xf32>
    %cst_206 = arith.constant dense<0.000000e+00> : vector<8xf32>
    %568 = vector.multi_reduction <add>, %567, %cst_206 [1] : vector<8x8xf32> to vector<8xf32>
    %569 = vector.shape_cast %568 : vector<8xf32> to vector<8x1xf32>
    %570 = tpu.reciprocal %569 {approx = true} : vector<8x1xf32> -> vector<8x1xf32>
    %571 = vector.broadcast %570 : vector<8x1xf32> to vector<8x8xf32>
    %572 = arith.mulf %567, %571 : vector<8x8xf32>
    %573 = vector.extract_strided_slice %523 {offsets = [0, 16], sizes = [8, 8], strides = [1, 1]} : vector<8x32xf32> to vector<8x8xf32>
    %cst_207 = arith.constant dense<0.000000e+00> : vector<8x8xf32>
    %574 = tpu.matmul %572, %573, %cst_207 {dimension_numbers = #tpu.dot_dimension_numbers<[1], [0], [0], [1], [0, 0, 1, 1], [], []>} : vector<8x8xf32>, vector<8x8xf32>, vector<8x8xf32> -> vector<8x8xf32>
    %575 = vector.extract_strided_slice %521 {offsets = [0, 24], sizes = [8, 8], strides = [1, 1]} : vector<8x32xf32> to vector<8x8xf32>
    %cst_208 = arith.constant 0.353553385 : f32
    %576 = vector.broadcast %cst_208 : f32 to vector<8x8xf32>
    %577 = arith.mulf %575, %576 : vector<8x8xf32>
    %578 = vector.extract_strided_slice %522 {offsets = [0, 24], sizes = [8, 8], strides = [1, 1]} : vector<8x32xf32> to vector<8x8xf32>
    %cst_209 = arith.constant dense<0.000000e+00> : vector<8x8xf32>
    %579 = tpu.matmul %577, %578, %cst_209 {dimension_numbers = #tpu.dot_dimension_numbers<[1], [1], [0], [0], [0, 0, 1, 0], [], []>} : vector<8x8xf32>, vector<8x8xf32>, vector<8x8xf32> -> vector<8x8xf32>
    %cst_210 = arith.constant dense<0xFF800000> : vector<8xf32>
    %580 = vector.multi_reduction <maximumf>, %579, %cst_210 [1] : vector<8x8xf32> to vector<8xf32>
    %581 = vector.shape_cast %580 : vector<8xf32> to vector<8x1xf32>
    %582 = vector.broadcast %581 : vector<8x1xf32> to vector<8x8xf32>
    %583 = arith.subf %579, %582 : vector<8x8xf32>
    %584 = math.exp %583 : vector<8x8xf32>
    %cst_211 = arith.constant dense<0.000000e+00> : vector<8xf32>
    %585 = vector.multi_reduction <add>, %584, %cst_211 [1] : vector<8x8xf32> to vector<8xf32>
    %586 = vector.shape_cast %585 : vector<8xf32> to vector<8x1xf32>
    %587 = tpu.reciprocal %586 {approx = true} : vector<8x1xf32> -> vector<8x1xf32>
    %588 = vector.broadcast %587 : vector<8x1xf32> to vector<8x8xf32>
    %589 = arith.mulf %584, %588 : vector<8x8xf32>
    %590 = vector.extract_strided_slice %523 {offsets = [0, 24], sizes = [8, 8], strides = [1, 1]} : vector<8x32xf32> to vector<8x8xf32>
    %cst_212 = arith.constant dense<0.000000e+00> : vector<8x8xf32>
    %591 = tpu.matmul %589, %590, %cst_212 {dimension_numbers = #tpu.dot_dimension_numbers<[1], [0], [0], [1], [0, 0, 1, 1], [], []>} : vector<8x8xf32>, vector<8x8xf32>, vector<8x8xf32> -> vector<8x8xf32>
    %592 = tpu.concatenate %540, %557, %574, %591 in 1 : vector<8x8xf32>, vector<8x8xf32>, vector<8x8xf32>, vector<8x8xf32> -> vector<8x32xf32>
    %593 = tpu.concatenate %520, %592 in 0 : vector<8x32xf32>, vector<8x32xf32> -> vector<16x32xf32>
    %cst_213 = arith.constant dense<0.000000e+00> : vector<16x32xf32>
    %594 = tpu.matmul %593, %434, %cst_213 {dimension_numbers = #tpu.dot_dimension_numbers<[1], [0], [0], [1], [0, 0, 1, 1], [], []>} : vector<16x32xf32>, vector<32x32xf32>, vector<16x32xf32> -> vector<16x32xf32>
    %595 = vector.broadcast %436 : vector<1x32xf32> to vector<16x32xf32>
    %596 = arith.addf %594, %595 : vector<16x32xf32>
    %c1_214 = arith.constant 1 : index
    %c0_215 = arith.constant 0 : index
    %c0_216 = arith.constant 0 : index
    %597 = vector.load %arg10[%c1_214, %c0_215, %c0_216] : memref<2x1x32xf32, #tpu.memory_space<vmem>>, vector<1x1x32xf32>
    %598 = vector.shape_cast %597 : vector<1x1x32xf32> to vector<1x32xf32>
    %c1_217 = arith.constant 1 : index
    %c0_218 = arith.constant 0 : index
    %c0_219 = arith.constant 0 : index
    %599 = vector.load %arg11[%c1_217, %c0_218, %c0_219] : memref<2x1x32xf32, #tpu.memory_space<vmem>>, vector<1x1x32xf32>
    %600 = vector.shape_cast %599 : vector<1x1x32xf32> to vector<1x32xf32>
    %601 = arith.addf %428, %596 : vector<16x32xf32>
    %cst_220 = arith.constant dense<0.000000e+00> : vector<16xf32>
    %602 = vector.multi_reduction <add>, %601, %cst_220 [1] : vector<16x32xf32> to vector<16xf32>
    %603 = vector.shape_cast %602 : vector<16xf32> to vector<16x1xf32>
    %cst_221 = arith.constant 3.200000e+01 : f32
    %604 = vector.broadcast %cst_221 : f32 to vector<16x1xf32>
    %605 = arith.divf %603, %604 : vector<16x1xf32>
    %606 = vector.broadcast %605 : vector<16x1xf32> to vector<16x32xf32>
    %607 = arith.subf %601, %606 : vector<16x32xf32>
    %608 = arith.mulf %607, %607 : vector<16x32xf32>
    %cst_222 = arith.constant dense<0.000000e+00> : vector<16xf32>
    %609 = vector.multi_reduction <add>, %608, %cst_222 [1] : vector<16x32xf32> to vector<16xf32>
    %610 = vector.shape_cast %609 : vector<16xf32> to vector<16x1xf32>
    %cst_223 = arith.constant 3.200000e+01 : f32
    %611 = vector.broadcast %cst_223 : f32 to vector<16x1xf32>
    %612 = arith.divf %610, %611 : vector<16x1xf32>
    %cst_224 = arith.constant 9.99999974E-6 : f32
    %613 = vector.broadcast %cst_224 : f32 to vector<16x1xf32>
    %614 = arith.addf %612, %613 : vector<16x1xf32>
    %615 = math.rsqrt %614 : vector<16x1xf32>
    %616 = vector.broadcast %615 : vector<16x1xf32> to vector<16x32xf32>
    %617 = arith.mulf %607, %616 : vector<16x32xf32>
    %618 = vector.broadcast %598 : vector<1x32xf32> to vector<16x32xf32>
    %619 = arith.mulf %617, %618 : vector<16x32xf32>
    %620 = vector.broadcast %600 : vector<1x32xf32> to vector<16x32xf32>
    %621 = arith.addf %619, %620 : vector<16x32xf32>
    %c1_225 = arith.constant 1 : index
    %c0_226 = arith.constant 0 : index
    %c0_227 = arith.constant 0 : index
    %622 = vector.load %arg6[%c1_225, %c0_226, %c0_227] : memref<2x32x96xf32, #tpu.memory_space<vmem>>, vector<1x32x96xf32>
    %623 = vector.shape_cast %622 : vector<1x32x96xf32> to vector<32x96xf32>
    %c1_228 = arith.constant 1 : index
    %c0_229 = arith.constant 0 : index
    %c0_230 = arith.constant 0 : index
    %624 = vector.load %arg7[%c1_228, %c0_229, %c0_230] : memref<2x1x96xf32, #tpu.memory_space<vmem>>, vector<1x1x96xf32>
    %625 = vector.shape_cast %624 : vector<1x1x96xf32> to vector<1x96xf32>
    %c1_231 = arith.constant 1 : index
    %c0_232 = arith.constant 0 : index
    %c0_233 = arith.constant 0 : index
    %626 = vector.load %arg8[%c1_231, %c0_232, %c0_233] : memref<2x32x32xf32, #tpu.memory_space<vmem>>, vector<1x32x32xf32>
    %627 = vector.shape_cast %626 : vector<1x32x32xf32> to vector<32x32xf32>
    %c1_234 = arith.constant 1 : index
    %c0_235 = arith.constant 0 : index
    %c0_236 = arith.constant 0 : index
    %628 = vector.load %arg9[%c1_234, %c0_235, %c0_236] : memref<2x1x32xf32, #tpu.memory_space<vmem>>, vector<1x1x32xf32>
    %629 = vector.shape_cast %628 : vector<1x1x32xf32> to vector<1x32xf32>
    %630 = vector.extract_strided_slice %623 {offsets = [0, 0], sizes = [32, 32], strides = [1, 1]} : vector<32x96xf32> to vector<32x32xf32>
    %cst_237 = arith.constant dense<0.000000e+00> : vector<16x32xf32>
    %631 = tpu.matmul %621, %630, %cst_237 {dimension_numbers = #tpu.dot_dimension_numbers<[1], [0], [0], [1], [0, 0, 1, 1], [], []>} : vector<16x32xf32>, vector<32x32xf32>, vector<16x32xf32> -> vector<16x32xf32>
    %632 = vector.extract_strided_slice %625 {offsets = [0, 0], sizes = [1, 32], strides = [1, 1]} : vector<1x96xf32> to vector<1x32xf32>
    %633 = vector.broadcast %632 : vector<1x32xf32> to vector<16x32xf32>
    %634 = arith.addf %631, %633 : vector<16x32xf32>
    %635 = vector.extract_strided_slice %623 {offsets = [0, 32], sizes = [32, 64], strides = [1, 1]} : vector<32x96xf32> to vector<32x64xf32>
    %cst_238 = arith.constant dense<0.000000e+00> : vector<20x64xf32>
    %636 = tpu.matmul %1, %635, %cst_238 {dimension_numbers = #tpu.dot_dimension_numbers<[1], [0], [0], [1], [0, 0, 1, 1], [], []>} : vector<20x32xf32>, vector<32x64xf32>, vector<20x64xf32> -> vector<20x64xf32>
    %637 = vector.extract_strided_slice %625 {offsets = [0, 32], sizes = [1, 64], strides = [1, 1]} : vector<1x96xf32> to vector<1x64xf32>
    %638 = vector.broadcast %637 : vector<1x64xf32> to vector<20x64xf32>
    %639 = arith.addf %636, %638 : vector<20x64xf32>
    %640 = vector.extract_strided_slice %639 {offsets = [0, 0], sizes = [20, 32], strides = [1, 1]} : vector<20x64xf32> to vector<20x32xf32>
    %641 = vector.extract_strided_slice %639 {offsets = [0, 32], sizes = [20, 32], strides = [1, 1]} : vector<20x64xf32> to vector<20x32xf32>
    %642 = vector.extract_strided_slice %634 {offsets = [0, 0], sizes = [8, 32], strides = [1, 1]} : vector<16x32xf32> to vector<8x32xf32>
    %643 = vector.extract_strided_slice %640 {offsets = [0, 0], sizes = [10, 32], strides = [1, 1]} : vector<20x32xf32> to vector<10x32xf32>
    %644 = vector.extract_strided_slice %641 {offsets = [0, 0], sizes = [10, 32], strides = [1, 1]} : vector<20x32xf32> to vector<10x32xf32>
    %645 = vector.extract_strided_slice %642 {offsets = [0, 0], sizes = [8, 8], strides = [1, 1]} : vector<8x32xf32> to vector<8x8xf32>
    %cst_239 = arith.constant 0.353553385 : f32
    %646 = vector.broadcast %cst_239 : f32 to vector<8x8xf32>
    %647 = arith.mulf %645, %646 : vector<8x8xf32>
    %648 = vector.extract_strided_slice %643 {offsets = [0, 0], sizes = [10, 8], strides = [1, 1]} : vector<10x32xf32> to vector<10x8xf32>
    %cst_240 = arith.constant dense<0.000000e+00> : vector<8x10xf32>
    %649 = tpu.matmul %647, %648, %cst_240 {dimension_numbers = #tpu.dot_dimension_numbers<[1], [1], [0], [0], [0, 0, 1, 0], [], []>} : vector<8x8xf32>, vector<10x8xf32>, vector<8x10xf32> -> vector<8x10xf32>
    %cst_241 = arith.constant dense<0xFF800000> : vector<8xf32>
    %650 = vector.multi_reduction <maximumf>, %649, %cst_241 [1] : vector<8x10xf32> to vector<8xf32>
    %651 = vector.shape_cast %650 : vector<8xf32> to vector<8x1xf32>
    %652 = vector.broadcast %651 : vector<8x1xf32> to vector<8x10xf32>
    %653 = arith.subf %649, %652 : vector<8x10xf32>
    %654 = math.exp %653 : vector<8x10xf32>
    %cst_242 = arith.constant dense<0.000000e+00> : vector<8xf32>
    %655 = vector.multi_reduction <add>, %654, %cst_242 [1] : vector<8x10xf32> to vector<8xf32>
    %656 = vector.shape_cast %655 : vector<8xf32> to vector<8x1xf32>
    %657 = tpu.reciprocal %656 {approx = true} : vector<8x1xf32> -> vector<8x1xf32>
    %658 = vector.broadcast %657 : vector<8x1xf32> to vector<8x10xf32>
    %659 = arith.mulf %654, %658 : vector<8x10xf32>
    %660 = vector.extract_strided_slice %644 {offsets = [0, 0], sizes = [10, 8], strides = [1, 1]} : vector<10x32xf32> to vector<10x8xf32>
    %cst_243 = arith.constant dense<0.000000e+00> : vector<8x8xf32>
    %661 = tpu.matmul %659, %660, %cst_243 {dimension_numbers = #tpu.dot_dimension_numbers<[1], [0], [0], [1], [0, 0, 1, 1], [], []>} : vector<8x10xf32>, vector<10x8xf32>, vector<8x8xf32> -> vector<8x8xf32>
    %662 = vector.extract_strided_slice %642 {offsets = [0, 8], sizes = [8, 8], strides = [1, 1]} : vector<8x32xf32> to vector<8x8xf32>
    %cst_244 = arith.constant 0.353553385 : f32
    %663 = vector.broadcast %cst_244 : f32 to vector<8x8xf32>
    %664 = arith.mulf %662, %663 : vector<8x8xf32>
    %665 = vector.extract_strided_slice %643 {offsets = [0, 8], sizes = [10, 8], strides = [1, 1]} : vector<10x32xf32> to vector<10x8xf32>
    %cst_245 = arith.constant dense<0.000000e+00> : vector<8x10xf32>
    %666 = tpu.matmul %664, %665, %cst_245 {dimension_numbers = #tpu.dot_dimension_numbers<[1], [1], [0], [0], [0, 0, 1, 0], [], []>} : vector<8x8xf32>, vector<10x8xf32>, vector<8x10xf32> -> vector<8x10xf32>
    %cst_246 = arith.constant dense<0xFF800000> : vector<8xf32>
    %667 = vector.multi_reduction <maximumf>, %666, %cst_246 [1] : vector<8x10xf32> to vector<8xf32>
    %668 = vector.shape_cast %667 : vector<8xf32> to vector<8x1xf32>
    %669 = vector.broadcast %668 : vector<8x1xf32> to vector<8x10xf32>
    %670 = arith.subf %666, %669 : vector<8x10xf32>
    %671 = math.exp %670 : vector<8x10xf32>
    %cst_247 = arith.constant dense<0.000000e+00> : vector<8xf32>
    %672 = vector.multi_reduction <add>, %671, %cst_247 [1] : vector<8x10xf32> to vector<8xf32>
    %673 = vector.shape_cast %672 : vector<8xf32> to vector<8x1xf32>
    %674 = tpu.reciprocal %673 {approx = true} : vector<8x1xf32> -> vector<8x1xf32>
    %675 = vector.broadcast %674 : vector<8x1xf32> to vector<8x10xf32>
    %676 = arith.mulf %671, %675 : vector<8x10xf32>
    %677 = vector.extract_strided_slice %644 {offsets = [0, 8], sizes = [10, 8], strides = [1, 1]} : vector<10x32xf32> to vector<10x8xf32>
    %cst_248 = arith.constant dense<0.000000e+00> : vector<8x8xf32>
    %678 = tpu.matmul %676, %677, %cst_248 {dimension_numbers = #tpu.dot_dimension_numbers<[1], [0], [0], [1], [0, 0, 1, 1], [], []>} : vector<8x10xf32>, vector<10x8xf32>, vector<8x8xf32> -> vector<8x8xf32>
    %679 = vector.extract_strided_slice %642 {offsets = [0, 16], sizes = [8, 8], strides = [1, 1]} : vector<8x32xf32> to vector<8x8xf32>
    %cst_249 = arith.constant 0.353553385 : f32
    %680 = vector.broadcast %cst_249 : f32 to vector<8x8xf32>
    %681 = arith.mulf %679, %680 : vector<8x8xf32>
    %682 = vector.extract_strided_slice %643 {offsets = [0, 16], sizes = [10, 8], strides = [1, 1]} : vector<10x32xf32> to vector<10x8xf32>
    %cst_250 = arith.constant dense<0.000000e+00> : vector<8x10xf32>
    %683 = tpu.matmul %681, %682, %cst_250 {dimension_numbers = #tpu.dot_dimension_numbers<[1], [1], [0], [0], [0, 0, 1, 0], [], []>} : vector<8x8xf32>, vector<10x8xf32>, vector<8x10xf32> -> vector<8x10xf32>
    %cst_251 = arith.constant dense<0xFF800000> : vector<8xf32>
    %684 = vector.multi_reduction <maximumf>, %683, %cst_251 [1] : vector<8x10xf32> to vector<8xf32>
    %685 = vector.shape_cast %684 : vector<8xf32> to vector<8x1xf32>
    %686 = vector.broadcast %685 : vector<8x1xf32> to vector<8x10xf32>
    %687 = arith.subf %683, %686 : vector<8x10xf32>
    %688 = math.exp %687 : vector<8x10xf32>
    %cst_252 = arith.constant dense<0.000000e+00> : vector<8xf32>
    %689 = vector.multi_reduction <add>, %688, %cst_252 [1] : vector<8x10xf32> to vector<8xf32>
    %690 = vector.shape_cast %689 : vector<8xf32> to vector<8x1xf32>
    %691 = tpu.reciprocal %690 {approx = true} : vector<8x1xf32> -> vector<8x1xf32>
    %692 = vector.broadcast %691 : vector<8x1xf32> to vector<8x10xf32>
    %693 = arith.mulf %688, %692 : vector<8x10xf32>
    %694 = vector.extract_strided_slice %644 {offsets = [0, 16], sizes = [10, 8], strides = [1, 1]} : vector<10x32xf32> to vector<10x8xf32>
    %cst_253 = arith.constant dense<0.000000e+00> : vector<8x8xf32>
    %695 = tpu.matmul %693, %694, %cst_253 {dimension_numbers = #tpu.dot_dimension_numbers<[1], [0], [0], [1], [0, 0, 1, 1], [], []>} : vector<8x10xf32>, vector<10x8xf32>, vector<8x8xf32> -> vector<8x8xf32>
    %696 = vector.extract_strided_slice %642 {offsets = [0, 24], sizes = [8, 8], strides = [1, 1]} : vector<8x32xf32> to vector<8x8xf32>
    %cst_254 = arith.constant 0.353553385 : f32
    %697 = vector.broadcast %cst_254 : f32 to vector<8x8xf32>
    %698 = arith.mulf %696, %697 : vector<8x8xf32>
    %699 = vector.extract_strided_slice %643 {offsets = [0, 24], sizes = [10, 8], strides = [1, 1]} : vector<10x32xf32> to vector<10x8xf32>
    %cst_255 = arith.constant dense<0.000000e+00> : vector<8x10xf32>
    %700 = tpu.matmul %698, %699, %cst_255 {dimension_numbers = #tpu.dot_dimension_numbers<[1], [1], [0], [0], [0, 0, 1, 0], [], []>} : vector<8x8xf32>, vector<10x8xf32>, vector<8x10xf32> -> vector<8x10xf32>
    %cst_256 = arith.constant dense<0xFF800000> : vector<8xf32>
    %701 = vector.multi_reduction <maximumf>, %700, %cst_256 [1] : vector<8x10xf32> to vector<8xf32>
    %702 = vector.shape_cast %701 : vector<8xf32> to vector<8x1xf32>
    %703 = vector.broadcast %702 : vector<8x1xf32> to vector<8x10xf32>
    %704 = arith.subf %700, %703 : vector<8x10xf32>
    %705 = math.exp %704 : vector<8x10xf32>
    %cst_257 = arith.constant dense<0.000000e+00> : vector<8xf32>
    %706 = vector.multi_reduction <add>, %705, %cst_257 [1] : vector<8x10xf32> to vector<8xf32>
    %707 = vector.shape_cast %706 : vector<8xf32> to vector<8x1xf32>
    %708 = tpu.reciprocal %707 {approx = true} : vector<8x1xf32> -> vector<8x1xf32>
    %709 = vector.broadcast %708 : vector<8x1xf32> to vector<8x10xf32>
    %710 = arith.mulf %705, %709 : vector<8x10xf32>
    %711 = vector.extract_strided_slice %644 {offsets = [0, 24], sizes = [10, 8], strides = [1, 1]} : vector<10x32xf32> to vector<10x8xf32>
    %cst_258 = arith.constant dense<0.000000e+00> : vector<8x8xf32>
    %712 = tpu.matmul %710, %711, %cst_258 {dimension_numbers = #tpu.dot_dimension_numbers<[1], [0], [0], [1], [0, 0, 1, 1], [], []>} : vector<8x10xf32>, vector<10x8xf32>, vector<8x8xf32> -> vector<8x8xf32>
    %713 = tpu.concatenate %661, %678, %695, %712 in 1 : vector<8x8xf32>, vector<8x8xf32>, vector<8x8xf32>, vector<8x8xf32> -> vector<8x32xf32>
    %714 = vector.extract_strided_slice %634 {offsets = [8, 0], sizes = [8, 32], strides = [1, 1]} : vector<16x32xf32> to vector<8x32xf32>
    %715 = vector.extract_strided_slice %640 {offsets = [10, 0], sizes = [10, 32], strides = [1, 1]} : vector<20x32xf32> to vector<10x32xf32>
    %716 = vector.extract_strided_slice %641 {offsets = [10, 0], sizes = [10, 32], strides = [1, 1]} : vector<20x32xf32> to vector<10x32xf32>
    %717 = vector.extract_strided_slice %714 {offsets = [0, 0], sizes = [8, 8], strides = [1, 1]} : vector<8x32xf32> to vector<8x8xf32>
    %cst_259 = arith.constant 0.353553385 : f32
    %718 = vector.broadcast %cst_259 : f32 to vector<8x8xf32>
    %719 = arith.mulf %717, %718 : vector<8x8xf32>
    %720 = vector.extract_strided_slice %715 {offsets = [0, 0], sizes = [10, 8], strides = [1, 1]} : vector<10x32xf32> to vector<10x8xf32>
    %cst_260 = arith.constant dense<0.000000e+00> : vector<8x10xf32>
    %721 = tpu.matmul %719, %720, %cst_260 {dimension_numbers = #tpu.dot_dimension_numbers<[1], [1], [0], [0], [0, 0, 1, 0], [], []>} : vector<8x8xf32>, vector<10x8xf32>, vector<8x10xf32> -> vector<8x10xf32>
    %cst_261 = arith.constant dense<0xFF800000> : vector<8xf32>
    %722 = vector.multi_reduction <maximumf>, %721, %cst_261 [1] : vector<8x10xf32> to vector<8xf32>
    %723 = vector.shape_cast %722 : vector<8xf32> to vector<8x1xf32>
    %724 = vector.broadcast %723 : vector<8x1xf32> to vector<8x10xf32>
    %725 = arith.subf %721, %724 : vector<8x10xf32>
    %726 = math.exp %725 : vector<8x10xf32>
    %cst_262 = arith.constant dense<0.000000e+00> : vector<8xf32>
    %727 = vector.multi_reduction <add>, %726, %cst_262 [1] : vector<8x10xf32> to vector<8xf32>
    %728 = vector.shape_cast %727 : vector<8xf32> to vector<8x1xf32>
    %729 = tpu.reciprocal %728 {approx = true} : vector<8x1xf32> -> vector<8x1xf32>
    %730 = vector.broadcast %729 : vector<8x1xf32> to vector<8x10xf32>
    %731 = arith.mulf %726, %730 : vector<8x10xf32>
    %732 = vector.extract_strided_slice %716 {offsets = [0, 0], sizes = [10, 8], strides = [1, 1]} : vector<10x32xf32> to vector<10x8xf32>
    %cst_263 = arith.constant dense<0.000000e+00> : vector<8x8xf32>
    %733 = tpu.matmul %731, %732, %cst_263 {dimension_numbers = #tpu.dot_dimension_numbers<[1], [0], [0], [1], [0, 0, 1, 1], [], []>} : vector<8x10xf32>, vector<10x8xf32>, vector<8x8xf32> -> vector<8x8xf32>
    %734 = vector.extract_strided_slice %714 {offsets = [0, 8], sizes = [8, 8], strides = [1, 1]} : vector<8x32xf32> to vector<8x8xf32>
    %cst_264 = arith.constant 0.353553385 : f32
    %735 = vector.broadcast %cst_264 : f32 to vector<8x8xf32>
    %736 = arith.mulf %734, %735 : vector<8x8xf32>
    %737 = vector.extract_strided_slice %715 {offsets = [0, 8], sizes = [10, 8], strides = [1, 1]} : vector<10x32xf32> to vector<10x8xf32>
    %cst_265 = arith.constant dense<0.000000e+00> : vector<8x10xf32>
    %738 = tpu.matmul %736, %737, %cst_265 {dimension_numbers = #tpu.dot_dimension_numbers<[1], [1], [0], [0], [0, 0, 1, 0], [], []>} : vector<8x8xf32>, vector<10x8xf32>, vector<8x10xf32> -> vector<8x10xf32>
    %cst_266 = arith.constant dense<0xFF800000> : vector<8xf32>
    %739 = vector.multi_reduction <maximumf>, %738, %cst_266 [1] : vector<8x10xf32> to vector<8xf32>
    %740 = vector.shape_cast %739 : vector<8xf32> to vector<8x1xf32>
    %741 = vector.broadcast %740 : vector<8x1xf32> to vector<8x10xf32>
    %742 = arith.subf %738, %741 : vector<8x10xf32>
    %743 = math.exp %742 : vector<8x10xf32>
    %cst_267 = arith.constant dense<0.000000e+00> : vector<8xf32>
    %744 = vector.multi_reduction <add>, %743, %cst_267 [1] : vector<8x10xf32> to vector<8xf32>
    %745 = vector.shape_cast %744 : vector<8xf32> to vector<8x1xf32>
    %746 = tpu.reciprocal %745 {approx = true} : vector<8x1xf32> -> vector<8x1xf32>
    %747 = vector.broadcast %746 : vector<8x1xf32> to vector<8x10xf32>
    %748 = arith.mulf %743, %747 : vector<8x10xf32>
    %749 = vector.extract_strided_slice %716 {offsets = [0, 8], sizes = [10, 8], strides = [1, 1]} : vector<10x32xf32> to vector<10x8xf32>
    %cst_268 = arith.constant dense<0.000000e+00> : vector<8x8xf32>
    %750 = tpu.matmul %748, %749, %cst_268 {dimension_numbers = #tpu.dot_dimension_numbers<[1], [0], [0], [1], [0, 0, 1, 1], [], []>} : vector<8x10xf32>, vector<10x8xf32>, vector<8x8xf32> -> vector<8x8xf32>
    %751 = vector.extract_strided_slice %714 {offsets = [0, 16], sizes = [8, 8], strides = [1, 1]} : vector<8x32xf32> to vector<8x8xf32>
    %cst_269 = arith.constant 0.353553385 : f32
    %752 = vector.broadcast %cst_269 : f32 to vector<8x8xf32>
    %753 = arith.mulf %751, %752 : vector<8x8xf32>
    %754 = vector.extract_strided_slice %715 {offsets = [0, 16], sizes = [10, 8], strides = [1, 1]} : vector<10x32xf32> to vector<10x8xf32>
    %cst_270 = arith.constant dense<0.000000e+00> : vector<8x10xf32>
    %755 = tpu.matmul %753, %754, %cst_270 {dimension_numbers = #tpu.dot_dimension_numbers<[1], [1], [0], [0], [0, 0, 1, 0], [], []>} : vector<8x8xf32>, vector<10x8xf32>, vector<8x10xf32> -> vector<8x10xf32>
    %cst_271 = arith.constant dense<0xFF800000> : vector<8xf32>
    %756 = vector.multi_reduction <maximumf>, %755, %cst_271 [1] : vector<8x10xf32> to vector<8xf32>
    %757 = vector.shape_cast %756 : vector<8xf32> to vector<8x1xf32>
    %758 = vector.broadcast %757 : vector<8x1xf32> to vector<8x10xf32>
    %759 = arith.subf %755, %758 : vector<8x10xf32>
    %760 = math.exp %759 : vector<8x10xf32>
    %cst_272 = arith.constant dense<0.000000e+00> : vector<8xf32>
    %761 = vector.multi_reduction <add>, %760, %cst_272 [1] : vector<8x10xf32> to vector<8xf32>
    %762 = vector.shape_cast %761 : vector<8xf32> to vector<8x1xf32>
    %763 = tpu.reciprocal %762 {approx = true} : vector<8x1xf32> -> vector<8x1xf32>
    %764 = vector.broadcast %763 : vector<8x1xf32> to vector<8x10xf32>
    %765 = arith.mulf %760, %764 : vector<8x10xf32>
    %766 = vector.extract_strided_slice %716 {offsets = [0, 16], sizes = [10, 8], strides = [1, 1]} : vector<10x32xf32> to vector<10x8xf32>
    %cst_273 = arith.constant dense<0.000000e+00> : vector<8x8xf32>
    %767 = tpu.matmul %765, %766, %cst_273 {dimension_numbers = #tpu.dot_dimension_numbers<[1], [0], [0], [1], [0, 0, 1, 1], [], []>} : vector<8x10xf32>, vector<10x8xf32>, vector<8x8xf32> -> vector<8x8xf32>
    %768 = vector.extract_strided_slice %714 {offsets = [0, 24], sizes = [8, 8], strides = [1, 1]} : vector<8x32xf32> to vector<8x8xf32>
    %cst_274 = arith.constant 0.353553385 : f32
    %769 = vector.broadcast %cst_274 : f32 to vector<8x8xf32>
    %770 = arith.mulf %768, %769 : vector<8x8xf32>
    %771 = vector.extract_strided_slice %715 {offsets = [0, 24], sizes = [10, 8], strides = [1, 1]} : vector<10x32xf32> to vector<10x8xf32>
    %cst_275 = arith.constant dense<0.000000e+00> : vector<8x10xf32>
    %772 = tpu.matmul %770, %771, %cst_275 {dimension_numbers = #tpu.dot_dimension_numbers<[1], [1], [0], [0], [0, 0, 1, 0], [], []>} : vector<8x8xf32>, vector<10x8xf32>, vector<8x10xf32> -> vector<8x10xf32>
    %cst_276 = arith.constant dense<0xFF800000> : vector<8xf32>
    %773 = vector.multi_reduction <maximumf>, %772, %cst_276 [1] : vector<8x10xf32> to vector<8xf32>
    %774 = vector.shape_cast %773 : vector<8xf32> to vector<8x1xf32>
    %775 = vector.broadcast %774 : vector<8x1xf32> to vector<8x10xf32>
    %776 = arith.subf %772, %775 : vector<8x10xf32>
    %777 = math.exp %776 : vector<8x10xf32>
    %cst_277 = arith.constant dense<0.000000e+00> : vector<8xf32>
    %778 = vector.multi_reduction <add>, %777, %cst_277 [1] : vector<8x10xf32> to vector<8xf32>
    %779 = vector.shape_cast %778 : vector<8xf32> to vector<8x1xf32>
    %780 = tpu.reciprocal %779 {approx = true} : vector<8x1xf32> -> vector<8x1xf32>
    %781 = vector.broadcast %780 : vector<8x1xf32> to vector<8x10xf32>
    %782 = arith.mulf %777, %781 : vector<8x10xf32>
    %783 = vector.extract_strided_slice %716 {offsets = [0, 24], sizes = [10, 8], strides = [1, 1]} : vector<10x32xf32> to vector<10x8xf32>
    %cst_278 = arith.constant dense<0.000000e+00> : vector<8x8xf32>
    %784 = tpu.matmul %782, %783, %cst_278 {dimension_numbers = #tpu.dot_dimension_numbers<[1], [0], [0], [1], [0, 0, 1, 1], [], []>} : vector<8x10xf32>, vector<10x8xf32>, vector<8x8xf32> -> vector<8x8xf32>
    %785 = tpu.concatenate %733, %750, %767, %784 in 1 : vector<8x8xf32>, vector<8x8xf32>, vector<8x8xf32>, vector<8x8xf32> -> vector<8x32xf32>
    %786 = tpu.concatenate %713, %785 in 0 : vector<8x32xf32>, vector<8x32xf32> -> vector<16x32xf32>
    %cst_279 = arith.constant dense<0.000000e+00> : vector<16x32xf32>
    %787 = tpu.matmul %786, %627, %cst_279 {dimension_numbers = #tpu.dot_dimension_numbers<[1], [0], [0], [1], [0, 0, 1, 1], [], []>} : vector<16x32xf32>, vector<32x32xf32>, vector<16x32xf32> -> vector<16x32xf32>
    %788 = vector.broadcast %629 : vector<1x32xf32> to vector<16x32xf32>
    %789 = arith.addf %787, %788 : vector<16x32xf32>
    %c1_280 = arith.constant 1 : index
    %c0_281 = arith.constant 0 : index
    %c0_282 = arith.constant 0 : index
    %790 = vector.load %arg12[%c1_280, %c0_281, %c0_282] : memref<2x1x32xf32, #tpu.memory_space<vmem>>, vector<1x1x32xf32>
    %791 = vector.shape_cast %790 : vector<1x1x32xf32> to vector<1x32xf32>
    %c1_283 = arith.constant 1 : index
    %c0_284 = arith.constant 0 : index
    %c0_285 = arith.constant 0 : index
    %792 = vector.load %arg13[%c1_283, %c0_284, %c0_285] : memref<2x1x32xf32, #tpu.memory_space<vmem>>, vector<1x1x32xf32>
    %793 = vector.shape_cast %792 : vector<1x1x32xf32> to vector<1x32xf32>
    %794 = arith.addf %621, %789 : vector<16x32xf32>
    %cst_286 = arith.constant dense<0.000000e+00> : vector<16xf32>
    %795 = vector.multi_reduction <add>, %794, %cst_286 [1] : vector<16x32xf32> to vector<16xf32>
    %796 = vector.shape_cast %795 : vector<16xf32> to vector<16x1xf32>
    %cst_287 = arith.constant 3.200000e+01 : f32
    %797 = vector.broadcast %cst_287 : f32 to vector<16x1xf32>
    %798 = arith.divf %796, %797 : vector<16x1xf32>
    %799 = vector.broadcast %798 : vector<16x1xf32> to vector<16x32xf32>
    %800 = arith.subf %794, %799 : vector<16x32xf32>
    %801 = arith.mulf %800, %800 : vector<16x32xf32>
    %cst_288 = arith.constant dense<0.000000e+00> : vector<16xf32>
    %802 = vector.multi_reduction <add>, %801, %cst_288 [1] : vector<16x32xf32> to vector<16xf32>
    %803 = vector.shape_cast %802 : vector<16xf32> to vector<16x1xf32>
    %cst_289 = arith.constant 3.200000e+01 : f32
    %804 = vector.broadcast %cst_289 : f32 to vector<16x1xf32>
    %805 = arith.divf %803, %804 : vector<16x1xf32>
    %cst_290 = arith.constant 9.99999974E-6 : f32
    %806 = vector.broadcast %cst_290 : f32 to vector<16x1xf32>
    %807 = arith.addf %805, %806 : vector<16x1xf32>
    %808 = math.rsqrt %807 : vector<16x1xf32>
    %809 = vector.broadcast %808 : vector<16x1xf32> to vector<16x32xf32>
    %810 = arith.mulf %800, %809 : vector<16x32xf32>
    %811 = vector.broadcast %791 : vector<1x32xf32> to vector<16x32xf32>
    %812 = arith.mulf %810, %811 : vector<16x32xf32>
    %813 = vector.broadcast %793 : vector<1x32xf32> to vector<16x32xf32>
    %814 = arith.addf %812, %813 : vector<16x32xf32>
    %c1_291 = arith.constant 1 : index
    %c0_292 = arith.constant 0 : index
    %c0_293 = arith.constant 0 : index
    %815 = vector.load %arg16[%c1_291, %c0_292, %c0_293] : memref<2x32x64xf32, #tpu.memory_space<vmem>>, vector<1x32x64xf32>
    %816 = vector.shape_cast %815 : vector<1x32x64xf32> to vector<32x64xf32>
    %cst_294 = arith.constant dense<0.000000e+00> : vector<16x64xf32>
    %817 = tpu.matmul %814, %816, %cst_294 {dimension_numbers = #tpu.dot_dimension_numbers<[1], [0], [0], [1], [0, 0, 1, 1], [], []>} : vector<16x32xf32>, vector<32x64xf32>, vector<16x64xf32> -> vector<16x64xf32>
    %c1_295 = arith.constant 1 : index
    %c0_296 = arith.constant 0 : index
    %c0_297 = arith.constant 0 : index
    %818 = vector.load %arg17[%c1_295, %c0_296, %c0_297] : memref<2x1x64xf32, #tpu.memory_space<vmem>>, vector<1x1x64xf32>
    %819 = vector.shape_cast %818 : vector<1x1x64xf32> to vector<1x64xf32>
    %820 = vector.broadcast %819 : vector<1x64xf32> to vector<16x64xf32>
    %821 = arith.addf %817, %820 : vector<16x64xf32>
    %cst_298 = arith.constant 0.000000e+00 : f32
    %822 = vector.broadcast %cst_298 : f32 to vector<16x64xf32>
    %823 = arith.maximumf %821, %822 : vector<16x64xf32>
    %c1_299 = arith.constant 1 : index
    %c0_300 = arith.constant 0 : index
    %c0_301 = arith.constant 0 : index
    %824 = vector.load %arg18[%c1_299, %c0_300, %c0_301] : memref<2x64x32xf32, #tpu.memory_space<vmem>>, vector<1x64x32xf32>
    %825 = vector.shape_cast %824 : vector<1x64x32xf32> to vector<64x32xf32>
    %cst_302 = arith.constant dense<0.000000e+00> : vector<16x32xf32>
    %826 = tpu.matmul %823, %825, %cst_302 {dimension_numbers = #tpu.dot_dimension_numbers<[1], [0], [0], [1], [0, 0, 1, 1], [], []>} : vector<16x64xf32>, vector<64x32xf32>, vector<16x32xf32> -> vector<16x32xf32>
    %c1_303 = arith.constant 1 : index
    %c0_304 = arith.constant 0 : index
    %c0_305 = arith.constant 0 : index
    %827 = vector.load %arg19[%c1_303, %c0_304, %c0_305] : memref<2x1x32xf32, #tpu.memory_space<vmem>>, vector<1x1x32xf32>
    %828 = vector.shape_cast %827 : vector<1x1x32xf32> to vector<1x32xf32>
    %829 = vector.broadcast %828 : vector<1x32xf32> to vector<16x32xf32>
    %830 = arith.addf %826, %829 : vector<16x32xf32>
    %c1_306 = arith.constant 1 : index
    %c0_307 = arith.constant 0 : index
    %c0_308 = arith.constant 0 : index
    %831 = vector.load %arg14[%c1_306, %c0_307, %c0_308] : memref<2x1x32xf32, #tpu.memory_space<vmem>>, vector<1x1x32xf32>
    %832 = vector.shape_cast %831 : vector<1x1x32xf32> to vector<1x32xf32>
    %c1_309 = arith.constant 1 : index
    %c0_310 = arith.constant 0 : index
    %c0_311 = arith.constant 0 : index
    %833 = vector.load %arg15[%c1_309, %c0_310, %c0_311] : memref<2x1x32xf32, #tpu.memory_space<vmem>>, vector<1x1x32xf32>
    %834 = vector.shape_cast %833 : vector<1x1x32xf32> to vector<1x32xf32>
    %835 = arith.addf %814, %830 : vector<16x32xf32>
    %cst_312 = arith.constant dense<0.000000e+00> : vector<16xf32>
    %836 = vector.multi_reduction <add>, %835, %cst_312 [1] : vector<16x32xf32> to vector<16xf32>
    %837 = vector.shape_cast %836 : vector<16xf32> to vector<16x1xf32>
    %cst_313 = arith.constant 3.200000e+01 : f32
    %838 = vector.broadcast %cst_313 : f32 to vector<16x1xf32>
    %839 = arith.divf %837, %838 : vector<16x1xf32>
    %840 = vector.broadcast %839 : vector<16x1xf32> to vector<16x32xf32>
    %841 = arith.subf %835, %840 : vector<16x32xf32>
    %842 = arith.mulf %841, %841 : vector<16x32xf32>
    %cst_314 = arith.constant dense<0.000000e+00> : vector<16xf32>
    %843 = vector.multi_reduction <add>, %842, %cst_314 [1] : vector<16x32xf32> to vector<16xf32>
    %844 = vector.shape_cast %843 : vector<16xf32> to vector<16x1xf32>
    %cst_315 = arith.constant 3.200000e+01 : f32
    %845 = vector.broadcast %cst_315 : f32 to vector<16x1xf32>
    %846 = arith.divf %844, %845 : vector<16x1xf32>
    %cst_316 = arith.constant 9.99999974E-6 : f32
    %847 = vector.broadcast %cst_316 : f32 to vector<16x1xf32>
    %848 = arith.addf %846, %847 : vector<16x1xf32>
    %849 = math.rsqrt %848 : vector<16x1xf32>
    %850 = vector.broadcast %849 : vector<16x1xf32> to vector<16x32xf32>
    %851 = arith.mulf %841, %850 : vector<16x32xf32>
    %852 = vector.broadcast %832 : vector<1x32xf32> to vector<16x32xf32>
    %853 = arith.mulf %851, %852 : vector<16x32xf32>
    %854 = vector.broadcast %834 : vector<1x32xf32> to vector<16x32xf32>
    %855 = arith.addf %853, %854 : vector<16x32xf32>
    %856 = vector.extract_strided_slice %855 {offsets = [7, 0], sizes = [1, 32], strides = [1, 1]} : vector<16x32xf32> to vector<1x32xf32>
    %857 = vector.extract_strided_slice %855 {offsets = [15, 0], sizes = [1, 32], strides = [1, 1]} : vector<16x32xf32> to vector<1x32xf32>
    %858 = tpu.concatenate %856, %857 in 0 : vector<1x32xf32>, vector<1x32xf32> -> vector<2x32xf32>
    %c0_317 = arith.constant 0 : index
    %c0_318 = arith.constant 0 : index
    %859 = vector.load %arg20[%c0_317, %c0_318] : memref<32x1xf32, #tpu.memory_space<vmem>>, vector<32x1xf32>
    %cst_319 = arith.constant dense<0.000000e+00> : vector<2x1xf32>
    %860 = tpu.matmul %858, %859, %cst_319 {dimension_numbers = #tpu.dot_dimension_numbers<[1], [0], [0], [1], [0, 0, 1, 1], [], []>} : vector<2x32xf32>, vector<32x1xf32>, vector<2x1xf32> -> vector<2x1xf32>
    %c0_320 = arith.constant 0 : index
    %c0_321 = arith.constant 0 : index
    %861 = vector.load %arg21[%c0_320, %c0_321] : memref<1x1xf32, #tpu.memory_space<vmem>>, vector<1x1xf32>
    %862 = vector.broadcast %861 : vector<1x1xf32> to vector<2x1xf32>
    %863 = arith.addf %860, %862 : vector<2x1xf32>
    %c0_322 = arith.constant 0 : index
    %c0_323 = arith.constant 0 : index
    %864 = vector.load %arg22[%c0_322, %c0_323] : memref<2x1xf32, #tpu.memory_space<vmem>>, vector<2x1xf32>
    tpu.vector_store %arg22[%c0_322, %c0_323], %863 {strides = array<i32>} : memref<2x1xf32, #tpu.memory_space<vmem>>, vector<2x1xf32>,
    return
  }
}

</mosaic_0001>

<bundles_post_ra>
// kernel: informer_decoder_forward.1
= control target key start
LH: loop header
LB: loop body
LE: loop exit
PB: predicated region body
PF: predicated region fallthrough
CT: control target
= control target key end

     0   :  { %s5067_s0 = inlined_call_operand.vmem [shape: f32[16,32], index: 0, kind: input, shape index: {}]   ;;  %s5068_s1 = inlined_call_operand.vmem [shape: f32[20,32], index: 1, kind: input, shape index: {}]   ;;  %s5069_s2 = inlined_call_operand.vmem [shape: f32[2,32,96], index: 2, kind: input, shape index: {}]   ;;  %s5070_s3 = inlined_call_operand.vmem [shape: f32[2,1,96], index: 3, kind: input, shape index: {}]   ;;  %s5071_s4 = inlined_call_operand.vmem [shape: f32[2,32,32], index: 4, kind: input, shape index: {}]   ;;  %s5072_s5 = inlined_call_operand.vmem [shape: f32[2,1,32], index: 5, kind: input, shape index: {}]   ;;  %s5073_s6 = inlined_call_operand.vmem [shape: f32[2,32,96], index: 6, kind: input, shape index: {}]   ;;  %s5074_s7 = inlined_call_operand.vmem [shape: f32[2,1,96], index: 7, kind: input, shape index: {}]   ;;  %s5075_s8 = inlined_call_operand.vmem [shape: f32[2,32,32], index: 8, kind: input, shape index: {}]   ;;  %s5076_s9 = inlined_call_operand.vmem [shape: f32[2,1,32], index: 9, kind: input, shape index: {}]   ;;  %s5077_s10 = inlined_call_operand.vmem [shape: f32[2,1,32], index: 10, kind: input, shape index: {}]   ;;  %s5078_s11 = inlined_call_operand.vmem [shape: f32[2,1,32], index: 11, kind: input, shape index: {}]   ;;  %s5079_s12 = inlined_call_operand.vmem [shape: f32[2,1,32], index: 12, kind: input, shape index: {}]   ;;  %s5080_s13 = inlined_call_operand.vmem [shape: f32[2,1,32], index: 13, kind: input, shape index: {}]   ;;  %s5081_s14 = inlined_call_operand.vmem [shape: f32[2,1,32], index: 14, kind: input, shape index: {}]   ;;  %s5082_s15 = inlined_call_operand.vmem [shape: f32[2,1,32], index: 15, kind: input, shape index: {}]   ;;  %s5083_s16 = inlined_call_operand.hbm [shape: f32[2,32,64], index: 16, kind: input, shape index: {}]   ;;  %s5084_s17 = inlined_call_operand.vmem [shape: f32[2,1,64], index: 17, kind: input, shape index: {}]   ;;  %s5085_s18 = inlined_call_operand.vmem [shape: f32[2,64,32], index: 18, kind: input, shape index: {}]   ;;  %s5086_s19 = inlined_call_operand.vmem [shape: f32[2,1,32], index: 19, kind: input, shape index: {}]   ;;  %s5087_s20 = inlined_call_operand.vmem [shape: f32[32,1], index: 20, kind: input, shape index: {}]   ;;  %s5088_s21 = inlined_call_operand.<no memory space> [shape: f32[1,1], index: 21, kind: input, shape index: {}]   ;;  %s5089_s22 = inlined_call_operand.vmem [shape: f32[2,1], index: 22, kind: output, shape index: {}]  }
   0x1   :  { %5126 = sst [smem:[#allocation6_spill]] %s5067_s0  ;;  %v27_v0 = vstv %s5088_s21 }
   0x2   :  { %5127 = sst [smem:[#allocation7_spill]] %s5068_s1  ;;  %28 = vst [vmem:[#allocation2] sm:$0x1] %v27_v0 }
   0x3   :  { %5128 = sst [smem:[#allocation8_spill]] %s5069_s2 }
   0x4   :  { %5129 = sst [smem:[#allocation9_spill]] %s5070_s3 }
   0x5   :  { %5130 = sst [smem:[#allocation10_spill]] %s5071_s4 }
   0x6   :  { %5131 = sst [smem:[#allocation11_spill]] %s5072_s5 }
   0x7   :  { %5132 = sst [smem:[#allocation12_spill]] %s5073_s6 }
   0x8   :  { %5133 = sst [smem:[#allocation13_spill]] %s5074_s7 }
   0x9   :  { %5134 = sst [smem:[#allocation14_spill]] %s5075_s8 }
   0xa   :  { %5135 = sst [smem:[#allocation15_spill]] %s5076_s9 }
   0xb   :  { %5136 = sst [smem:[#allocation16_spill]] %s5077_s10 }
   0xc   :  { %5137 = sst [smem:[#allocation17_spill]] %s5078_s11 }
   0xd   :  { %5138 = sst [smem:[#allocation18_spill]] %s5079_s12 }
   0xe   :  { %5139 = sst [smem:[#allocation19_spill]] %s5080_s13 }
   0xf   :  { %5140 = sst [smem:[#allocation20_spill]] %s5087_s20 }
  0x10   :  { %5141 = sst [smem:[#allocation21_spill]] %s5089_s22 }
  0x11   :  { %29 = vsyncpa [#allocation4], 0  ;;  %s66_s4 = sshll.u32 %s5083_s16, 4  ;;  %s3940_s0 = smov [#allocation3]   ;;  %s67_s4 = int_to_ptr.hbm [resolvable:$true] %s66_s4 }
  0x12   :  { %s68_s23 = sshll.u32 %s3940_s0, 4  ;;  %s3941_s1 = smov 128   ;;  %s69_s23 = int_to_ptr.vmem [resolvable:$true] %s68_s23 }
  0x13   :  { %s5109_s5 = smov 8  }
  0x14   :  { %74 = dma.hbm_to_vmem [thread:$0]  %s67_s4, 1024, %s69_s23, [#allocation4], %s3941_s1, %s3941_s1, %s5109_s5  }
  0x15   :  { %3938 = dma.done.wait [#allocation4], 1024  }
  0x16   :  { %3939 = vsyncadd [#allocation4], 4294966272  ;;  %s5142_s25 = sld [smem:[#allocation8_spill]]  ;;  %s5115_s28 = smov 96   ;;  %vm107_vm0 = vcmask 261120   ;;  %vm180_vm1 = vcmask 64512  }
  0x17   :  { %s5143_s4 = sld [smem:[#allocation6_spill]]  ;;  %s5099_s21 = smov 120   ;;  %vm452_vm2 = vcmask 130048   ;;  %vm454_vm3 = vcmask 195584   ;;  %vm973_vm8 = vcmask 1041408   ;;  %vm953_vm9 = vcmask 80896  }
  0x18   :  { %s5144_s6 = sld [smem:[#allocation9_spill]]  ;;  %s5097_s26 = smov 112   ;;  %vm1232_vm13 = vcmask 1045504  }
  0x19   :  { %s5101_s16 = smov 104   ;;  %s5113_s2 = smov 80  }
  0x1a   :  { %s5105_s27 = smov 72   ;;  %s5111_s3 = smov 88  }
  0x1b   :  { %s5103_s29 = smov 24   ;;  %s5107_s30 = smov 16  }
  0x1c   :  { %v96_v1 = vld [vmem:[%s5142_s25 + $0x10] sm:$0xff]  ;;  %v97_v2 = vld [vmem:[%s5142_s25 + $0x18] sm:$0xff]  ;;  %v94_v4 = vld [vmem:[%s5142_s25] sm:$0xff]  ;;  %s5145_s23 = sld [smem:[#allocation10_spill]]  ;;  %s5149_s24 = smov 16  }
  0x1d   :  { %v3692_v3 = vpack.i.bf16 %v96_v1, %v97_v2  ;;  %126 = vmatpush.msra.mxu0 %v97_v2  ;;  %v95_v5 = vld [vmem:[%s5142_s25 + $0x8] sm:$0xff]  ;;  %v4092_v7 = vld [vmem:[%s5143_s4] sm:$0xff]  ;;  %s5147_s0 = sld [smem:[#allocation12_spill]]  ;;  %s5155_s20 = smov 96  }
  0x1e   :  { %v3697_v6 = vpack.i.bf16 %v94_v4, %v95_v5  ;;  %v4099_v8 = vld [vmem:[%s5143_s4 + $0x8] sm:$0xff]  ;;  %v4104_v9 = vld [vmem:[%s5144_s6] ss:$0 sm:$0xff]  ;;  %s5154_s4 = smov 72   ;;  %s5157_s22 = smov 88  }
  0x1f   :  { %3693 = vrot.lane.b32.xlu0 %v3692_v3, %s5115_s28  ;;  %127 = vmatpush.msra.mxu0 %v96_v1 }
  0x20   :  { %153 = vrot.lane.b32.xlu1 %v4104_v9, %s5115_s28 }
  0x21   :  { %128 = vmatpush.msra.mxu0 %v95_v5 }
  0x23   :  { %129 = vmatpush.msra.mxu0 %v94_v4 }
  0x24   :  { %3480 = vmatmul.msk.f32.vlgmr.msra.gmra.mxu0 %vm107_vm0, %v4092_v7 }
  0x27   :  { %3698 = vrot.lane.b32.xlu0 %v3697_v6, %s5115_s28 }
  0x2c   :  { %3481 = vmatmul.msk.f32.gmra.mxu0 %vm107_vm0, %v4099_v8 }
  0x91   :  { %v3694_v10 = vpop.permute.xlu0 %3693 }
  0x92   :  { %v3695_v11 = vunpack.i.l.bf16 %v3694_v10  ;;  %v3696_v12 = vunpack.i.h.bf16 %v3694_v10  ;;  %v154_v17 = vpop.permute.xlu1 %153 }
  0x94   :  { %168 = vmatpush.msra.mxu1 %v3695_v11 }
  0x96   :  { %169 = vmatpush.msra.mxu1 %v3696_v12 }
  0x99   :  { %v3699_v13 = vpop.permute.xlu0 %3698 }
  0x9a   :  { %v3700_v14 = vunpack.i.l.bf16 %v3699_v13  ;;  %v3701_v15 = vunpack.i.h.bf16 %v3699_v13 }
  0x9c   :  { %170 = vmatpush.msra.mxu1 %v3700_v14 }
  0x9e   :  { %171 = vmatpush.msra.mxu1 %v3701_v15 }
  0x9f   :  { %3482 = vmatmul.msk.f32.vlgmr.msra.gmra.mxu1 %vm107_vm0, %v4092_v7 }
  0xa1   :  { %v131_v16 = vpop.f32.mrf.mxu0 }
  0xa2   :  { %v132_v18 = vadd.f32 %v4104_v9, %v131_v16 }
  0xa4   :  { %v179_v21 = vmul.f32 0.35355338, %v132_v18 }
  0xa7   :  { %3483 = vmatmul.msk.f32.gmra.mxu1 %vm107_vm0, %v4099_v8 }
  0xa9   :  { %v134_v39 = vpop.f32.mrf.mxu0 }
  0xaa   :  { %v135_v2 = vadd.f32 %v4104_v9, %v134_v39 }
  0xac   :  { %v456_v3 = vmul.f32 0.35355338, %v135_v2 }
 0x11c   :  { %v173_v19 = vpop.f32.mrf.mxu1 }
 0x11d   :  { %v4115_v20 = vadd.f32 %v173_v19, %v154_v17 }
 0x11f   :  { %246 = vrot.lane.b32.xlu0 %v4115_v20, %s5099_s21  ;;  %218 = vrot.lane.b32.xlu2 %v4115_v20, %s5115_s28 }
 0x120   :  { %3484 = vmatpush.xpose.msk.msra.mxu2 %vm180_vm1, %v4115_v20 }
 0x123   :  { %3485 = vmatmul.msk.f32.vlgmr.msra.gmra.mxu2 %vm180_vm1, %v179_v21 }
 0x124   :  { %v176_v47 = vpop.f32.mrf.mxu1 }
 0x125   :  { %v4147_v48 = vadd.f32 %v176_v47, %v154_v17 }
 0x127   :  { %309 = vrot.lane.b32.xlu2 %v179_v21, %s5097_s26  ;;  %244 = vrot.lane.b32.xlu0 %v179_v21, %s5099_s21 }
 0x12f   :  { %311 = vrot.lane.b32.xlu0 %v4115_v20, %s5097_s26 }
 0x137   :  { %376 = vrot.lane.b32.xlu0 %v4115_v20, %s5101_s16 }
 0x179   :  { %v219_v22 = vpop.permute.xlu2 %218 }
 0x17a   :  { %239 = vmatpush.msra.mxu3 %v219_v22 }
 0x181   :  { %v310_v34 = vpop.permute.xlu2 %309 }
 0x191   :  { %v247_v23 = vpop.permute.xlu0 %246 }
 0x192   :  { %3487 = vmatpush.xpose.msk.msrb.mxu3 %vm180_vm1, %v247_v23 }
 0x199   :  { %v245_v24 = vpop.permute.xlu0 %244 }
 0x1a1   :  { %v312_v25 = vpop.permute.xlu0 %311 }
 0x1a6   :  { %v204_v26 = vpop.f32.mrf.mxu2 }
 0x1a7   :  { %v207_v27 = vsel %vm180_vm1, %v204_v26, -inf }
 0x1a8   :  { %208 = vmax.xlane.f32.xlu1 %v207_v27  ;;  %v101_v27 = vld [vmem:[%s5145_s23 + $0x10] sm:$0xff] }
 0x1a9   :  { %v377_v28 = vpop.permute.xlu0 %376 }
 0x1aa   :  { %3493 = vmatpush.xpose.msk.msrb.mxu0 %vm180_vm1, %v377_v28  ;;  %v100_v28 = vld [vmem:[%s5145_s23 + $0x8] sm:$0xff] }
 0x21b   :  { %v209_v29 = vpop.xlane.xlu1 %208 }
 0x21c   :  { %v210_v30 = vsub.f32 %v204_v26, %v209_v29  ;;  %v102_v26 = vld [vmem:[%s5145_s23 + $0x18] sm:$0xff]  ;;  %v99_v29 = vld [vmem:[%s5145_s23] sm:$0xff] }
 0x21e   :  { %v211_v31 = vmul.f32 1.442695, %v210_v30 }
 0x220   :  { %3757 = vpow2.f32 %v211_v31 }
 0x226   :  { %v3758_v32 = vpop.eup %3757 }
 0x227   :  { %v213_v33 = vsel %vm180_vm1, %v3758_v32, 0.0 }
 0x228   :  { %214 = vadd.xlane.f32.xlu2 %v213_v33 }
 0x240   :  { %374 = vrot.lane.b32.xlu2 %v179_v21, %s5101_s16 }
 0x29b   :  { %v215_v35 = vpop.xlane.xlu2 %214 }
 0x29c   :  { %3759 = vrcp.f32 %v215_v35 }
 0x2a2   :  { %v3760_v36 = vpop.eup %3759 }
 0x2a3   :  { %v375_v37 = vpop.permute.xlu2 %374  ;;  %v217_v38 = vmul.f32 %v3760_v36, %v3758_v32 }
 0x2a4   :  { %3494 = vmatmul.msk.f32.vlgmr.msrb.gmra.mxu0 %vm180_vm1, %v375_v37 }
 0x2a5   :  { %3486 = vmatmul.msk.f32.vlgmr.msra.gmra.mxu3 %vm180_vm1, %v217_v38 }
 0x2a6   :  { %3490 = vmatpush.xpose.msk.msra.mxu3 %vm180_vm1, %v312_v25 }
 0x2ad   :  { %3488 = vmatmul.msk.f32.vlgmr.msrb.gmra.mxu3 %vm180_vm1, %v245_v24 }
 0x2b5   :  { %3491 = vmatmul.msk.f32.vlgmr.msra.gmra.mxu3 %vm180_vm1, %v310_v34 }
 0x321   :  { %v399_v40 = vpop.f32.mrf.mxu0 }
 0x322   :  { %v402_v41 = vsel %vm180_vm1, %v399_v40, -inf }
 0x323   :  { %403 = vmax.xlane.f32.xlu1 %v402_v41 }
 0x328   :  { %v4141_v42 = vpop.f32.mrf.mxu3 }
 0x330   :  { %v269_v43 = vpop.f32.mrf.mxu3 }
 0x331   :  { %v272_v44 = vsel %vm180_vm1, %v269_v43, -inf }
 0x332   :  { %273 = vmax.xlane.f32.xlu0 %v272_v44 }
 0x338   :  { %v334_v45 = vpop.f32.mrf.mxu3 }
 0x339   :  { %v337_v46 = vsel %vm180_vm1, %v334_v45, -inf }
 0x33a   :  { %338 = vmax.xlane.f32.xlu2 %v337_v46 }
 0x346   :  { %348 = vrot.lane.b32.xlu0 %v4115_v20, %s5113_s2 }
 0x34e   :  { %522 = vrot.lane.b32.xlu0 %v4147_v48, %s5099_s21 }
 0x396   :  { %v404_v49 = vpop.xlane.xlu1 %403 }
 0x397   :  { %v405_v50 = vsub.f32 %v399_v40, %v404_v49 }
 0x399   :  { %v406_v51 = vmul.f32 1.442695, %v405_v50 }
 0x39b   :  { %3761 = vpow2.f32 %v406_v51 }
 0x3a1   :  { %v3762_v52 = vpop.eup %3761 }
 0x3a2   :  { %v408_v53 = vsel %vm180_vm1, %v3762_v52, 0.0 }
 0x3a3   :  { %409 = vadd.xlane.f32.xlu2 %v408_v53 }
 0x3a5   :  { %v274_v54 = vpop.xlane.xlu0 %273 }
 0x3a6   :  { %v275_v55 = vsub.f32 %v269_v43, %v274_v54 }
 0x3a8   :  { %v276_v56 = vmul.f32 1.442695, %v275_v55 }
 0x3aa   :  { %3763 = vpow2.f32 %v276_v56 }
 0x3ad   :  { %v339_v57 = vpop.xlane.xlu2 %338 }
 0x3ae   :  { %v340_v58 = vsub.f32 %v334_v45, %v339_v57 }
 0x3b0   :  { %v3764_v59 = vpop.eup %3763  ;;  %v341_v60 = vmul.f32 1.442695, %v340_v58 }
 0x3b1   :  { %v278_v61 = vsel %vm180_vm1, %v3764_v59, 0.0 }
 0x3b2   :  { %3765 = vpow2.f32 %v341_v60  ;;  %279 = vadd.xlane.f32.xlu1 %v278_v61 }
 0x3b8   :  { %v3766_v62 = vpop.eup %3765  ;;  %v349_v63 = vpop.permute.xlu0 %348 }
 0x3b9   :  { %v343_v0 = vsel %vm180_vm1, %v3766_v62, 0.0 }
 0x3ba   :  { %344 = vadd.xlane.f32.xlu1 %v343_v0 }
 0x3bb   :  { %413 = vrot.lane.b32.xlu2 %v4115_v20, %s5105_s27 }
 0x3c0   :  { %v523_v1 = vpop.permute.xlu0 %522 }
 0x3c1   :  { %3499 = vmatpush.xpose.msk.msra.mxu0 %vm180_vm1, %v523_v1 }
 0x3d3   :  { %283 = vrot.lane.b32.xlu1 %v4115_v20, %s5111_s3 }
 0x3db   :  { %587 = vrot.lane.b32.xlu1 %v4147_v48, %s5097_s26 }
 0x3e3   :  { %585 = vrot.lane.b32.xlu1 %v456_v3, %s5097_s26  ;;  %s5151_s26 = smov 120  }
 0x416   :  { %v410_v4 = vpop.xlane.xlu2 %409 }
 0x417   :  { %3767 = vrcp.f32 %v410_v4 }
 0x41d   :  { %v3768_v5 = vpop.eup %3767 }
 0x41e   :  { %v412_v6 = vmul.f32 %v3768_v5, %v3762_v52  ;;  %v414_v10 = vpop.permute.xlu2 %413 }
 0x41f   :  { %434 = vmatpush.msrb.mxu3 %v414_v10 }
 0x420   :  { %3495 = vmatmul.msk.f32.vlgmr.msrb.gmra.mxu3 %vm180_vm1, %v412_v6 }
 0x421   :  { %3496 = vmatpush.xpose.msk.msra.mxu3 %vm180_vm1, %v4147_v48 }
 0x425   :  { %v280_v11 = vpop.xlane.xlu1 %279 }
 0x426   :  { %3769 = vrcp.f32 %v280_v11 }
 0x428   :  { %3497 = vmatmul.msk.f32.vlgmr.msra.gmra.mxu3 %vm180_vm1, %v456_v3 }
 0x42c   :  { %v3770_v9 = vpop.eup %3769 }
 0x42d   :  { %v345_v12 = vpop.xlane.xlu1 %344  ;;  %v282_v14 = vmul.f32 %v3770_v9, %v3764_v59 }
 0x42e   :  { %3771 = vrcp.f32 %v345_v12 }
 0x434   :  { %v3772_v15 = vpop.eup %3771 }
 0x435   :  { %v347_v16 = vmul.f32 %v3772_v15, %v3766_v62 }
 0x445   :  { %v284_v13 = vpop.permute.xlu1 %283 }
 0x446   :  { %304 = vmatpush.msrb.mxu2 %v284_v13 }
 0x447   :  { %3489 = vmatmul.msk.f32.vlgmr.msrb.gmra.mxu2 %vm180_vm1, %v282_v14 }
 0x448   :  { %369 = vmatpush.msra.mxu2 %v349_v63 }
 0x44d   :  { %v588_v17 = vpop.permute.xlu1 %587 }
 0x44e   :  { %3502 = vmatpush.xpose.msk.msrb.mxu3 %vm180_vm1, %v588_v17 }
 0x44f   :  { %3492 = vmatmul.msk.f32.vlgmr.msra.gmra.mxu2 %vm180_vm1, %v347_v16 }
 0x452   :  { %751 = vmatpush.msra.mxu3 %v102_v26  ;;  %v828_v26 = vld [vmem:[%s5147_s0 + $0x8] sm:$0xff] }
 0x454   :  { %752 = vmatpush.msra.mxu3 %v101_v27 }
 0x455   :  { %v586_v18 = vpop.permute.xlu1 %585 }
 0x456   :  { %3503 = vmatmul.msk.f32.vlgmr.msrb.gmra.mxu3 %vm180_vm1, %v586_v18 }
 0x457   :  { %753 = vmatpush.msra.mxu3 %v100_v28 }
 0x459   :  { %754 = vmatpush.msra.mxu3 %v99_v29 }
 0x4a3   :  { %v436_v19 = vpop.f32.mrf.mxu3 }
 0x4a4   :  { %448 = vrot.lane.b32.xlu2 %v436_v19, %s5103_s29  ;;  %s5153_s29 = smov 104  }
 0x4ab   :  { %v480_v21 = vpop.f32.mrf.mxu3 }
 0x4ac   :  { %650 = vrot.lane.b32.xlu2 %v456_v3, %s5101_s16  ;;  %v483_v25 = vsel %vm180_vm1, %v480_v21, -inf }
 0x4ca   :  { %v306_v20 = vpop.f32.mrf.mxu2 }
 0x4cb   :  { %440 = vrot.lane.b32.xlu1 %v306_v20, %s5109_s5 }
 0x4d2   :  { %v371_v22 = vpop.f32.mrf.mxu2 }
 0x4d3   :  { %520 = vrot.lane.b32.xlu1 %v456_v3, %s5099_s21  ;;  %444 = vrot.lane.b32.xlu0 %v371_v22, %s5107_s30  ;;  %v829_v22 = vld [vmem:[%s5147_s0 + $0x10] sm:$0xff]  ;;  %s5150_s21 = smov 24   ;;  %s5152_s30 = smov 112  }
 0x4d9   :  { %v610_v23 = vpop.f32.mrf.mxu3 }
 0x4da   :  { %v613_v24 = vsel %vm180_vm1, %v610_v23, -inf }
 0x4db   :  { %652 = vrot.lane.b32.xlu0 %v4147_v48, %s5101_s16  ;;  %614 = vmax.xlane.f32.xlu2 %v613_v24  ;;  %s5146_s16 = sld [smem:[#allocation11_spill]] }
 0x4e1   :  { %v4209_v49 = vld [vmem:[%s5146_s16] ss:$0 sm:$0xff] }
 0x4fd   :  { %484 = vmax.xlane.f32.xlu1 %v483_v25  ;;  %v827_v25 = vld [vmem:[%s5147_s0] sm:$0xff] }
 0x4fe   :  { %v449_v34 = vpop.permute.xlu2 %448  ;;  %v3707_v27 = vpack.i.bf16 %v827_v25, %v828_v26 }
 0x506   :  { %v651_v38 = vpop.permute.xlu2 %650 }
 0x53d   :  { %v441_v30 = vpop.permute.xlu1 %440 }
 0x53e   :  { %v451_v31 = vsel %vm180_vm1, %v4141_v42, %v441_v30 }
 0x545   :  { %v445_v32 = vpop.permute.xlu0 %444  ;;  %v521_v33 = vpop.permute.xlu1 %520 }
 0x546   :  { %v453_v35 = vsel %vm452_vm2, %v451_v31, %v445_v32  ;;  %3500 = vmatmul.msk.f32.vlgmr.msra.gmra.mxu0 %vm180_vm1, %v521_v33 }
 0x547   :  { %v455_v36 = vsel %vm454_vm3, %v453_v35, %v449_v34 }
 0x548   :  { %3508 = vmatmul.msk.f32.vlgmr.msra.gmra.mxu3 %vm107_vm0, %v455_v36 }
 0x54d   :  { %v653_v37 = vpop.permute.xlu0 %652 }
 0x54e   :  { %3505 = vmatpush.xpose.msk.msrb.mxu0 %vm180_vm1, %v653_v37  ;;  %v615_v45 = vpop.xlane.xlu2 %614 }
 0x54f   :  { %v616_v47 = vsub.f32 %v610_v23, %v615_v45  ;;  %v830_v23 = vld [vmem:[%s5147_s0 + $0x18] sm:$0xff] }
 0x550   :  { %v3702_v24 = vpack.i.bf16 %v829_v22, %v830_v23 }
 0x551   :  { %3506 = vmatmul.msk.f32.vlgmr.msrb.gmra.mxu0 %vm180_vm1, %v651_v38  ;;  %v617_v50 = vmul.f32 1.442695, %v616_v47  ;;  %v4262_v47 = vld [vmem:[%s5077_s10] ss:$0 sm:$0xff] }
 0x570   :  { %v485_v39 = vpop.xlane.xlu1 %484 }
 0x571   :  { %v486_v40 = vsub.f32 %v480_v21, %v485_v39 }
 0x573   :  { %v487_v41 = vmul.f32 1.442695, %v486_v40 }
 0x575   :  { %3773 = vpow2.f32 %v487_v41 }
 0x576   :  { %3775 = vpow2.f32 %v617_v50 }
 0x57b   :  { %v3774_v42 = vpop.eup %3773 }
 0x57c   :  { %v489_v43 = vsel %vm180_vm1, %v3774_v42, 0.0  ;;  %v4215_v57 = vpop.eup %3775 }
 0x57d   :  { %490 = vadd.xlane.f32.xlu2 %v489_v43  ;;  %v619_v58 = vsel %vm180_vm1, %v4215_v57, 0.0 }
 0x595   :  { %494 = vrot.lane.b32.xlu2 %v4147_v48, %s5115_s28 }
 0x59d   :  { %689 = vrot.lane.b32.xlu2 %v4147_v48, %s5105_s27  ;;  %s5148_s27 = sld [smem:[#allocation7_spill]] }
 0x5a5   :  { %3703 = vrot.lane.b32.xlu2 %v3702_v24, %s5115_s28 }
 0x5c3   :  { %v545_v44 = vpop.f32.mrf.mxu0 }
 0x5c4   :  { %v548_v46 = vsel %vm180_vm1, %v545_v44, -inf }
 0x5c5   :  { %549 = vmax.xlane.f32.xlu0 %v548_v46 }
 0x5cb   :  { %v756_v51 = vpop.f32.mrf.mxu3 }
 0x5cc   :  { %v757_v52 = vadd.f32 %v4209_v49, %v756_v51 }
 0x5ce   :  { %v675_v53 = vpop.f32.mrf.mxu0  ;;  %v764_v54 = vadd.f32 %v757_v52, %v4092_v7  ;;  %v3952_v7 = vmov 32.0  }
 0x5cf   :  { %v678_v55 = vsel %vm180_vm1, %v675_v53, -inf }
 0x5d0   :  { %679 = vmax.xlane.f32.xlu1 %v678_v55  ;;  %v766_v56 = vsel %vm107_vm0, %v764_v54, 0.0 }
 0x5d1   :  { %767 = vadd.xlane.f32.xlu0 %v766_v56  ;;  %v4271_v56 = vld [vmem:[%s5078_s11] ss:$0 sm:$0xff]  ;;  %s5156_s11 = smov 80  }
 0x5d9   :  { %620 = vadd.xlane.f32.xlu0 %v619_v58 }
 0x5f0   :  { %v491_v59 = vpop.xlane.xlu2 %490 }
 0x5f1   :  { %3777 = vrcp.f32 %v491_v59 }
 0x5f2   :  { %3779 = vrcp.f32 %v3952_v7  ;;  %v91_v7 = vld [vmem:[%s5148_s27] sm:$0xff] }
 0x5f7   :  { %v3778_v60 = vpop.eup %3777 }
 0x5f8   :  { %v493_v61 = vmul.f32 %v3778_v60, %v3774_v42  ;;  %v495_v62 = vpop.permute.xlu2 %494  ;;  %v3780_v63 = vpop.eup %3779 }
 0x5f9   :  { %515 = vmatpush.msrb.mxu2 %v495_v62  ;;  %v773_v0 = vmul.f32 32.0, %v3780_v63  ;;  %vm777_vm4 = vweird.f32 %v3780_v63 }
 0x5fa   :  { %3498 = vmatmul.msk.f32.vlgmr.msrb.gmra.mxu2 %vm180_vm1, %v493_v61 }
 0x5fb   :  { %v774_v1 = vsub.f32 1.0, %v773_v0  ;;  %v93_v0 = vld [vmem:[%s5148_s27 + $0x10] sm:$0xf] }
 0x5fd   :  { %v775_v4 = vmul.f32 %v3780_v63, %v774_v1 }
 0x5ff   :  { %v776_v6 = vadd.f32 %v3780_v63, %v775_v4 }
 0x600   :  { %v690_v28 = vpop.permute.xlu2 %689 }
 0x601   :  { %v4220_v10 = vsel %vm777_vm4, %v3780_v63, %v776_v6  ;;  %v92_v63 = vld [vmem:[%s5148_s27 + $0x8] sm:$0xff] }
 0x608   :  { %v3704_v30 = vpop.permute.xlu2 %3703 }
 0x609   :  { %v3706_v31 = vunpack.i.h.bf16 %v3704_v30  ;;  %v3705_v32 = vunpack.i.l.bf16 %v3704_v30 }
 0x60b   :  { %909 = vmatpush.msra.mxu0 %v3705_v32 }
 0x60d   :  { %910 = vmatpush.msra.mxu0 %v3706_v31 }
 0x638   :  { %v550_v2 = vpop.xlane.xlu0 %549 }
 0x639   :  { %v551_v3 = vsub.f32 %v545_v44, %v550_v2 }
 0x63b   :  { %v552_v5 = vmul.f32 1.442695, %v551_v3 }
 0x63d   :  { %3781 = vpow2.f32 %v552_v5 }
 0x643   :  { %v4222_v11 = vpop.eup %3781  ;;  %v680_v12 = vpop.xlane.xlu1 %679 }
 0x644   :  { %v681_v9 = vsub.f32 %v675_v53, %v680_v12  ;;  %v768_v13 = vpop.xlane.xlu0 %767  ;;  %v554_v14 = vsel %vm180_vm1, %v4222_v11, 0.0 }
 0x645   :  { %v779_v15 = vmul.f32 %v4220_v10, %v768_v13  ;;  %555 = vadd.xlane.f32.xlu1 %v554_v14 }
 0x646   :  { %v682_v16 = vmul.f32 1.442695, %v681_v9 }
 0x647   :  { %v781_v17 = vsub.f32 %v764_v54, %v779_v15 }
 0x648   :  { %3783 = vpow2.f32 %v682_v16 }
 0x649   :  { %v783_v18 = vmul.f32 %v781_v17, %v781_v17 }
 0x64b   :  { %v785_v19 = vsel %vm107_vm0, %v783_v18, 0.0 }
 0x64c   :  { %v621_v36 = vpop.xlane.xlu0 %620 }
 0x64d   :  { %786 = vadd.xlane.f32.xlu1 %v785_v19 }
 0x64e   :  { %v4228_v20 = vpop.eup %3783 }
 0x64f   :  { %v684_v21 = vsel %vm180_vm1, %v4228_v20, 0.0 }
 0x650   :  { %685 = vadd.xlane.f32.xlu0 %v684_v21 }
 0x664   :  { %624 = vrot.lane.b32.xlu0 %v4147_v48, %s5113_s2 }
 0x666   :  { %559 = vrot.lane.b32.xlu1 %v4147_v48, %s5111_s3  ;;  %v4254_v48 = vld [vmem:[%s5074_s7] ss:$0 sm:$0xff] }
 0x66c   :  { %3708 = vrot.lane.b32.xlu0 %v3707_v27, %s5115_s28 }
 0x66e   :  { %885 = vrot.lane.b32.xlu1 %v4254_v48, %s5115_s28 }
 0x67d   :  { %v517_v1 = vpop.f32.mrf.mxu2 }
 0x6b8   :  { %v556_v29 = vpop.xlane.xlu1 %555 }
 0x6c0   :  { %v787_v33 = vpop.xlane.xlu1 %786 }
 0x6c1   :  { %v791_v34 = vmul.f32 %v787_v33, %v4220_v10 }
 0x6c3   :  { %v793_v35 = vadd.f32 1e-05, %v791_v34  ;;  %v686_v40 = vpop.xlane.xlu0 %685 }
 0x6c5   :  { %3785 = vrsqrt.f32 %v793_v35  ;;  %vm801_vm6 = vweird.f32 %v793_v35 }
 0x6c6   :  { %3787 = vrcp.f32 %v621_v36 }
 0x6c7   :  { %3789 = vrcp.f32 %v556_v29 }
 0x6c8   :  { %3791 = vrcp.f32 %v686_v40 }
 0x6cb   :  { %v3786_v37 = vpop.eup %3785 }
 0x6cc   :  { %v796_v38 = vmul.f32 %v3786_v37, %v793_v35  ;;  %vm802_vm5 = vweird.f32 %v3786_v37  ;;  %v3788_v43 = vpop.eup %3787 }
 0x6cd   :  { %v3790_v45 = vpop.eup %3789  ;;  %vm803_vm7 = vmor %vm801_vm6, %vm802_vm5  ;;  %v623_v46 = vmul.f32 %v3788_v43, %v4215_v57  ;;  %vm1679_vm5 = vcmask 523264  }
 0x6ce   :  { %v797_v39 = vmul.f32 %v3786_v37, %v796_v38  ;;  %v558_v54 = vmul.f32 %v3790_v45, %v4222_v11  ;;  %v3792_v57 = vpop.eup %3791 }
 0x6cf   :  { %v688_v62 = vmul.f32 %v3792_v57, %v4228_v20 }
 0x6d0   :  { %v798_v41 = vmul.f32 0.5, %v797_v39 }
 0x6d2   :  { %v799_v42 = vsub.f32 1.5, %v798_v41 }
 0x6d4   :  { %v800_v44 = vmul.f32 %v3786_v37, %v799_v42 }
 0x6d6   :  { %v804_v50 = vsel %vm803_vm7, %v3786_v37, %v800_v44  ;;  %v625_v51 = vpop.permute.xlu0 %624 }
 0x6d7   :  { %v815_v52 = vmul.f32 %v804_v50, %v781_v17  ;;  %645 = vmatpush.msra.mxu2 %v625_v51 }
 0x6d8   :  { %3504 = vmatmul.msk.f32.vlgmr.msra.gmra.mxu2 %vm180_vm1, %v623_v46  ;;  %v560_v53 = vpop.permute.xlu1 %559 }
 0x6d9   :  { %580 = vmatpush.msrb.mxu1 %v560_v53  ;;  %858 = vmatpush.msrb.mxu2 %v830_v23  ;;  %v820_v55 = vmul.f32 %v4262_v47, %v815_v52 }
 0x6da   :  { %3501 = vmatmul.msk.f32.vlgmr.msrb.gmra.mxu1 %vm180_vm1, %v558_v54 }
 0x6db   :  { %710 = vmatpush.msra.mxu1 %v690_v28  ;;  %859 = vmatpush.msrb.mxu2 %v829_v22  ;;  %v4274_v59 = vadd.f32 %v4271_v56, %v820_v55 }
 0x6dd   :  { %860 = vmatpush.msrb.mxu2 %v828_v26 }
 0x6de   :  { %v3709_v58 = vpop.permute.xlu0 %3708 }
 0x6df   :  { %v3711_v60 = vunpack.i.h.bf16 %v3709_v58  ;;  %v3710_v61 = vunpack.i.l.bf16 %v3709_v58  ;;  %861 = vmatpush.msrb.mxu2 %v827_v25 }
 0x6e0   :  { %3510 = vmatmul.msk.f32.vlgmr.msrb.gmra.mxu2 %vm107_vm0, %v4274_v59  ;;  %v4294_v5 = vpop.permute.xlu1 %885 }
 0x6e1   :  { %911 = vmatpush.msra.mxu0 %v3710_v61 }
 0x6e2   :  { %3507 = vmatmul.msk.f32.vlgmr.msra.gmra.mxu1 %vm180_vm1, %v688_v62 }
 0x6e3   :  { %912 = vmatpush.msra.mxu0 %v3711_v60 }
 0x6e4   :  { %3512 = vmatmul.msk.f32.vlgmr.msra.gmra.mxu0 %vm107_vm0, %v91_v7 }
 0x6ec   :  { %3513 = vmatmul.msk.f32.gmra.mxu0 %vm107_vm0, %v92_v63 }
 0x6f4   :  { %3514 = vmatmul.msk.f32.gmra.mxu0 %vm107_vm0, %v93_v0 }
 0x757   :  { %v582_v2 = vpop.f32.mrf.mxu1 }
 0x758   :  { %716 = vrot.lane.b32.xlu2 %v582_v2, %s5109_s5 }
 0x75b   :  { %v647_v3 = vpop.f32.mrf.mxu2 }
 0x75c   :  { %720 = vrot.lane.b32.xlu0 %v647_v3, %s5149_s24 }
 0x75f   :  { %v712_v4 = vpop.f32.mrf.mxu1 }
 0x760   :  { %724 = vrot.lane.b32.xlu1 %v712_v4, %s5150_s21 }
 0x761   :  { %v914_v6 = vpop.f32.mrf.mxu0 }
 0x762   :  { %v4298_v11 = vadd.f32 %v914_v6, %v4294_v5 }
 0x763   :  { %v863_v12 = vpop.f32.mrf.mxu2 }
 0x764   :  { %v864_v9 = vadd.f32 %v4254_v48, %v863_v12  ;;  %998 = vrot.lane.b32.xlu0 %v4298_v11, %s5151_s26 }
 0x766   :  { %v4303_v13 = vmul.f32 0.35355338, %v864_v9 }
 0x768   :  { %996 = vrot.lane.b32.xlu1 %v4303_v13, %s5151_s26 }
 0x769   :  { %v917_v14 = vpop.f32.mrf.mxu0 }
 0x76a   :  { %v4308_v15 = vadd.f32 %v917_v14, %v4294_v5 }
 0x76c   :  { %3515 = vmatpush.xpose.msk.msrb.mxu1 %vm180_vm1, %v4308_v15  ;;  %1041 = vrot.lane.b32.xlu0 %v4308_v15, %s5111_s3 }
 0x76d   :  { %1000 = vrot.lane.b32.xlu2 %v4308_v15, %s5151_s26 }
 0x770   :  { %3516 = vmatpush.xpose.msk.msrb.mxu1 %vm180_vm1, %v4298_v11  ;;  %965 = vrot.lane.b32.xlu1 %v4298_v11, %s5115_s28 }
 0x771   :  { %v920_v0 = vpop.f32.mrf.mxu0 }
 0x772   :  { %v921_v2 = vadd.f32 %v920_v0, %v4294_v5 }
 0x773   :  { %3517 = vmatmul.msk.f32.vlgmr.msrb.gmra.mxu1 %vm180_vm1, %v4303_v13 }
 0x774   :  { %1039 = vrot.lane.b32.xlu0 %v4298_v11, %s5111_s3  ;;  %v4361_v12 = vrot.slane %v921_v2, 2  ;;  %s5158_s3 = smov 8  }
 0x7b2   :  { %v717_v16 = vpop.permute.xlu2 %716 }
 0x7b3   :  { %v727_v19 = vsel %vm180_vm1, %v517_v1, %v717_v16 }
 0x7c7   :  { %v1001_v17 = vpop.permute.xlu2 %1000 }
 0x7c8   :  { %3520 = vmatpush.xpose.msk.msrb.mxu3 %vm180_vm1, %v1001_v17 }
 0x7ce   :  { %v721_v18 = vpop.permute.xlu0 %720 }
 0x7cf   :  { %v728_v20 = vsel %vm452_vm2, %v727_v19, %v721_v18 }
 0x7d2   :  { %v725_v21 = vpop.permute.xlu1 %724 }
 0x7d3   :  { %v729_v22 = vsel %vm454_vm3, %v728_v20, %v725_v21 }
 0x7d4   :  { %3509 = vmatmul.msk.f32.gmra.mxu3 %vm107_vm0, %v729_v22 }
 0x7d6   :  { %v999_v23 = vpop.permute.xlu0 %998 }
 0x7d7   :  { %3521 = vmatpush.xpose.msk.msrb.mxu3 %vm180_vm1, %v999_v23 }
 0x7da   :  { %v997_v24 = vpop.permute.xlu1 %996 }
 0x7dc   :  { %3522 = vmatmul.msk.f32.vlgmr.msrb.gmra.mxu3 %vm180_vm1, %v997_v24 }
 0x7de   :  { %v1042_v25 = vpop.permute.xlu0 %1041 }
 0x7df   :  { %3523 = vmatpush.msk.msra.mxu2 %vm973_vm8, %v1042_v25 }
 0x7e6   :  { %v1040_v26 = vpop.permute.xlu0 %1039 }
 0x7e7   :  { %1064 = vmatpush.msra.mxu2 %v1040_v26 }
 0x7f0   :  { %v950_v27 = vpop.f32.mrf.mxu1 }
 0x7f1   :  { %v954_v28 = vsel %vm953_vm9, %v950_v27, -inf }
 0x7f2   :  { %955 = vmax.xlane.f32.xlu0 %v954_v28 }
 0x806   :  { %1071 = vrot.lane.b32.xlu0 %v4298_v11, %s5152_s30 }
 0x857   :  { %v759_v29 = vpop.f32.mrf.mxu3 }
 0x858   :  { %v760_v30 = vadd.f32 %v4209_v49, %v759_v29 }
 0x85a   :  { %v765_v31 = vadd.f32 %v760_v30, %v4099_v8  ;;  %v966_v8 = vpop.permute.xlu1 %965 }
 0x85c   :  { %v769_v32 = vsel %vm107_vm0, %v765_v31, 0.0 }
 0x85d   :  { %770 = vadd.xlane.f32.xlu2 %v769_v32 }
 0x85f   :  { %v1025_v33 = vpop.f32.mrf.mxu3 }
 0x860   :  { %v1028_v34 = vsel %vm953_vm9, %v1025_v33, -inf }
 0x861   :  { %1029 = vmax.xlane.f32.xlu1 %v1028_v34 }
 0x865   :  { %v956_v35 = vpop.xlane.xlu0 %955 }
 0x866   :  { %v957_v36 = vsub.f32 %v950_v27, %v956_v35 }
 0x868   :  { %v958_v37 = vmul.f32 1.442695, %v957_v36 }
 0x86a   :  { %3793 = vpow2.f32 %v958_v37 }
 0x870   :  { %v3794_v38 = vpop.eup %3793 }
 0x871   :  { %v960_v39 = vsel %vm953_vm9, %v3794_v38, 0.0 }
 0x872   :  { %961 = vadd.xlane.f32.xlu0 %v960_v39 }
 0x878   :  { %v1072_v53 = vpop.permute.xlu0 %1071 }
 0x87a   :  { %1146 = vrot.lane.b32.xlu1 %v4308_v15, %s5153_s29 }
 0x886   :  { %1142 = vrot.lane.b32.xlu0 %v4303_v13, %s5153_s29 }
 0x8d0   :  { %v771_v49 = vpop.xlane.xlu2 %770 }
 0x8d1   :  { %v780_v40 = vmul.f32 %v4220_v10, %v771_v49 }
 0x8d3   :  { %v782_v41 = vsub.f32 %v765_v31, %v780_v40 }
 0x8d4   :  { %v1030_v42 = vpop.xlane.xlu1 %1029 }
 0x8d5   :  { %v1031_v43 = vsub.f32 %v1025_v33, %v1030_v42  ;;  %v784_v44 = vmul.f32 %v782_v41, %v782_v41 }
 0x8d7   :  { %v1032_v45 = vmul.f32 1.442695, %v1031_v43  ;;  %v788_v46 = vsel %vm107_vm0, %v784_v44, 0.0 }
 0x8d8   :  { %789 = vadd.xlane.f32.xlu2 %v788_v46 }
 0x8d9   :  { %3795 = vpow2.f32 %v1032_v45 }
 0x8df   :  { %v3796_v50 = vpop.eup %3795 }
 0x8e0   :  { %v1034_v51 = vsel %vm953_vm9, %v3796_v50, 0.0 }
 0x8e1   :  { %1035 = vadd.xlane.f32.xlu1 %v1034_v51 }
 0x8e5   :  { %v962_v54 = vpop.xlane.xlu0 %961 }
 0x8e6   :  { %3797 = vrcp.f32 %v962_v54 }
 0x8ec   :  { %v1147_v52 = vpop.permute.xlu1 %1146  ;;  %v3798_v60 = vpop.eup %3797 }
 0x8ed   :  { %3530 = vmatpush.xpose.msk.msrb.mxu2 %vm180_vm1, %v1147_v52  ;;  %v964_v62 = vmul.f32 %v3798_v60, %v3794_v38 }
 0x8f0   :  { %967 = vrot.lane.b32.xlu2 %v4308_v15, %s5115_s28 }
 0x8f8   :  { %1073 = vrot.lane.b32.xlu2 %v4308_v15, %s5152_s30  ;;  %v1143_v24 = vpop.permute.xlu0 %1142 }
 0x8fa   :  { %1069 = vrot.lane.b32.xlu1 %v4303_v13, %s5152_s30  ;;  %v1233_v13 = vrot.slane %v4308_v15, 2 }
 0x8fc   :  { %v4370_v18 = vsel %vm1232_vm13, %v1233_v13, %v4361_v12 }
 0x900   :  { %1144 = vrot.lane.b32.xlu2 %v4298_v11, %s5153_s29 }
 0x94b   :  { %v790_v55 = vpop.xlane.xlu2 %789 }
 0x94c   :  { %v792_v57 = vmul.f32 %v790_v55, %v4220_v10 }
 0x94e   :  { %v794_v58 = vadd.f32 1e-05, %v792_v57 }
 0x950   :  { %3799 = vrsqrt.f32 %v794_v58  ;;  %vm811_vm11 = vweird.f32 %v794_v58 }
 0x953   :  { %v968_v61 = vpop.permute.xlu2 %967 }
 0x954   :  { %3518 = vmatpush.msk.msra.mxu1 %vm973_vm8, %v968_v61  ;;  %v1036_v14 = vpop.xlane.xlu1 %1035 }
 0x955   :  { %3801 = vrcp.f32 %v1036_v14 }
 0x956   :  { %v3800_v7 = vpop.eup %3799  ;;  %991 = vmatpush.msra.mxu1 %v966_v8 }
 0x957   :  { %v806_v63 = vmul.f32 %v3800_v7, %v794_v58  ;;  %3519 = vmatmul.msk.f32.vlgmr.msra.gmra.mxu1 %vm953_vm9, %v964_v62  ;;  %vm812_vm10 = vweird.f32 %v3800_v7 }
 0x958   :  { %vm813_vm12 = vmor %vm811_vm11, %vm812_vm10 }
 0x959   :  { %v807_v1 = vmul.f32 %v3800_v7, %v806_v63 }
 0x95b   :  { %v808_v3 = vmul.f32 0.5, %v807_v1  ;;  %v1074_v4 = vpop.permute.xlu2 %1073  ;;  %v3802_v21 = vpop.eup %3801 }
 0x95c   :  { %3525 = vmatpush.xpose.msk.msrb.mxu1 %vm180_vm1, %v1074_v4  ;;  %v1038_v23 = vmul.f32 %v3802_v21, %v3796_v50  ;;  %v834_v21 = vld [vmem:[%s5075_s8 + $0x10] sm:$0xff] }
 0x95d   :  { %v809_v6 = vsub.f32 1.5, %v808_v3 }
 0x95f   :  { %v810_v9 = vmul.f32 %v3800_v7, %v809_v6 }
 0x960   :  { %3526 = vmatpush.xpose.msk.msrb.mxu1 %vm180_vm1, %v1072_v53 }
 0x961   :  { %v814_v5 = vsel %vm813_vm12, %v3800_v7, %v810_v9 }
 0x962   :  { %v816_v16 = vmul.f32 %v814_v5, %v782_v41 }
 0x963   :  { %v1145_v17 = vpop.permute.xlu2 %1144 }
 0x964   :  { %3535 = vmatpush.xpose.msk.msra.mxu1 %vm180_vm1, %v4361_v12  ;;  %3531 = vmatpush.xpose.msk.msrb.mxu2 %vm180_vm1, %v1145_v17  ;;  %v821_v19 = vmul.f32 %v4262_v47, %v816_v16 }
 0x966   :  { %v4376_v20 = vadd.f32 %v4271_v56, %v821_v19  ;;  %v835_v19 = vld [vmem:[%s5075_s8 + $0x18] sm:$0xff] }
 0x968   :  { %3536 = vmatpush.xpose.msk.msra.mxu1 %vm180_vm1, %v4370_v18  ;;  %3511 = vmatmul.msk.f32.gmra.mxu2 %vm107_vm0, %v4376_v20 }
 0x96c   :  { %v1070_v22 = vpop.permute.xlu1 %1069 }
 0x96d   :  { %3527 = vmatmul.msk.f32.vlgmr.msrb.gmra.mxu1 %vm180_vm1, %v1070_v22  ;;  %v833_v22 = vld [vmem:[%s5075_s8 + $0x8] sm:$0xff] }
 0x970   :  { %3524 = vmatmul.msk.f32.vlgmr.msra.gmra.mxu2 %vm953_vm9, %v1038_v23  ;;  %v832_v23 = vld [vmem:[%s5075_s8] sm:$0xff]  ;;  %s5161_s8 = sld [smem:[#allocation17_spill]] }
 0x978   :  { %3532 = vmatmul.msk.f32.vlgmr.msrb.gmra.mxu2 %vm180_vm1, %v1143_v24 }
 0x9d4   :  { %v4383_v47 = vpop.f32.mrf.mxu1 }
 0x9ea   :  { %v1098_v25 = vpop.f32.mrf.mxu1 }
 0x9eb   :  { %v866_v26 = vpop.f32.mrf.mxu2  ;;  %v1101_v56 = vsel %vm953_vm9, %v1098_v25, -inf }
 0x9ec   :  { %v867_v27 = vadd.f32 %v4254_v48, %v866_v26  ;;  %1102 = vmax.xlane.f32.xlu2 %v1101_v56 }
 0x9ee   :  { %v1230_v28 = vmul.f32 0.35355338, %v867_v27 }
 0x9f0   :  { %3537 = vmatmul.msk.f32.vlgmr.msra.gmra.mxu1 %vm180_vm1, %v1230_v28 }
 0x9f3   :  { %v1066_v29 = vpop.f32.mrf.mxu2 }
 0x9fb   :  { %v1171_v30 = vpop.f32.mrf.mxu2 }
 0x9fc   :  { %v1174_v31 = vsel %vm953_vm9, %v1171_v30, -inf }
 0x9fd   :  { %1175 = vmax.xlane.f32.xlu1 %v1174_v31 }
 0xa04   :  { %1114 = vrot.lane.b32.xlu2 %v4308_v15, %s5113_s2 }
 0xa0c   :  { %1185 = vrot.lane.b32.xlu2 %v4298_v11, %s5154_s4 }
 0xa14   :  { %1306 = vrot.lane.b32.xlu2 %v4370_v18, %s5151_s26 }
 0xa1c   :  { %1454 = vrot.lane.b32.xlu2 %v4361_v12, %s5153_s29 }
 0xa24   :  { %1377 = vrot.lane.b32.xlu2 %v1230_v28, %s5152_s30 }
 0xa5f   :  { %v1103_v48 = vpop.xlane.xlu2 %1102 }
 0xa60   :  { %v1104_v32 = vsub.f32 %v1098_v25, %v1103_v48 }
 0xa62   :  { %v1105_v33 = vmul.f32 1.442695, %v1104_v32 }
 0xa64   :  { %3803 = vpow2.f32 %v1105_v33 }
 0xa67   :  { %v1115_v34 = vpop.permute.xlu2 %1114 }
 0xa68   :  { %3528 = vmatpush.msk.msra.mxu3 %vm973_vm8, %v1115_v34 }
 0xa6a   :  { %v3804_v35 = vpop.eup %3803 }
 0xa6b   :  { %v1107_v36 = vsel %vm953_vm9, %v3804_v35, 0.0 }
 0xa6c   :  { %1108 = vadd.xlane.f32.xlu0 %v1107_v36 }
 0xa70   :  { %v1176_v37 = vpop.xlane.xlu1 %1175 }
 0xa71   :  { %v1177_v38 = vsub.f32 %v1171_v30, %v1176_v37 }
 0xa73   :  { %v1178_v39 = vmul.f32 1.442695, %v1177_v38 }
 0xa75   :  { %3805 = vpow2.f32 %v1178_v39 }
 0xa7b   :  { %v3806_v8 = vpop.eup %3805 }
 0xa7c   :  { %v1180_v49 = vsel %vm953_vm9, %v3806_v8, 0.0 }
 0xa7d   :  { %1181 = vadd.xlane.f32.xlu1 %v1180_v49 }
 0xa80   :  { %1112 = vrot.lane.b32.xlu0 %v4298_v11, %s5113_s2  ;;  %v1260_v11 = vpop.f32.mrf.mxu1  ;;  %s5159_s2 = sld [smem:[#allocation13_spill]] }
 0xa81   :  { %v1263_v40 = vsel %vm953_vm9, %v1260_v11, -inf }
 0xa88   :  { %1308 = vrot.lane.b32.xlu0 %v4361_v12, %s5151_s26 }
 0xa90   :  { %1304 = vrot.lane.b32.xlu0 %v1230_v28, %s5151_s26 }
 0xa96   :  { %1187 = vrot.lane.b32.xlu1 %v4308_v15, %s5154_s4  ;;  %v1186_v15 = vpop.permute.xlu2 %1185 }
 0xa98   :  { %1379 = vrot.lane.b32.xlu0 %v4370_v18, %s5152_s30 }
 0xa9e   :  { %1381 = vrot.lane.b32.xlu1 %v4361_v12, %s5152_s30  ;;  %v1307_v45 = vpop.permute.xlu2 %1306 }
 0xaa0   :  { %1450 = vrot.lane.b32.xlu0 %v1230_v28, %s5153_s29 }
 0xaa6   :  { %1452 = vrot.lane.b32.xlu1 %v4370_v18, %s5153_s29  ;;  %v1455_v51 = vpop.permute.xlu2 %1454 }
 0xaae   :  { %1216 = vrot.lane.b32.xlu1 %v1066_v29, %s5109_s5  ;;  %v1378_v60 = vpop.permute.xlu2 %1377  ;;  %s5167_s5 = sld [smem:[#allocation21_spill]] }
 0xad8   :  { %1264 = vmax.xlane.f32.xlu1 %v1263_v40 }
 0xadf   :  { %v1109_v41 = vpop.xlane.xlu0 %1108 }
 0xae0   :  { %3807 = vrcp.f32 %v1109_v41 }
 0xae6   :  { %v3808_v42 = vpop.eup %3807 }
 0xae7   :  { %v1111_v43 = vmul.f32 %v3808_v42, %v3804_v35 }
 0xaf0   :  { %v1182_v50 = vpop.xlane.xlu1 %1181 }
 0xaf1   :  { %3809 = vrcp.f32 %v1182_v50 }
 0xaf2   :  { %v1113_v44 = vpop.permute.xlu0 %1112 }
 0xaf3   :  { %1137 = vmatpush.msra.mxu3 %v1113_v44 }
 0xaf4   :  { %3529 = vmatmul.msk.f32.vlgmr.msra.gmra.mxu3 %vm953_vm9, %v1111_v43 }
 0xaf7   :  { %v3810_v53 = vpop.eup %3809 }
 0xaf8   :  { %v1184_v55 = vmul.f32 %v3810_v53, %v3806_v8 }
 0xafa   :  { %v1309_v46 = vpop.permute.xlu0 %1308 }
 0xafb   :  { %3540 = vmatpush.xpose.msk.msra.mxu2 %vm180_vm1, %v1309_v46 }
 0xaff   :  { %3541 = vmatpush.xpose.msk.msra.mxu2 %vm180_vm1, %v1307_v45 }
 0xb02   :  { %v1305_v52 = vpop.permute.xlu0 %1304 }
 0xb03   :  { %3550 = vmatpush.xpose.msk.msrb.mxu2 %vm180_vm1, %v1455_v51 }
 0xb04   :  { %3542 = vmatmul.msk.f32.vlgmr.msra.gmra.mxu2 %vm180_vm1, %v1305_v52 }
 0xb08   :  { %v1188_v54 = vpop.permute.xlu1 %1187 }
 0xb09   :  { %3533 = vmatpush.msk.msrb.mxu0 %vm973_vm8, %v1188_v54 }
 0xb0a   :  { %v1380_v58 = vpop.permute.xlu0 %1379 }
 0xb0b   :  { %1210 = vmatpush.msrb.mxu0 %v1186_v15 }
 0xb0c   :  { %3534 = vmatmul.msk.f32.vlgmr.msrb.gmra.mxu0 %vm953_vm9, %v1184_v55 }
 0xb10   :  { %v1382_v57 = vpop.permute.xlu1 %1381 }
 0xb11   :  { %3545 = vmatpush.xpose.msk.msrb.mxu1 %vm180_vm1, %v1382_v57 }
 0xb12   :  { %v1451_v62 = vpop.permute.xlu0 %1450 }
 0xb15   :  { %3546 = vmatpush.xpose.msk.msrb.mxu1 %vm180_vm1, %v1380_v58 }
 0xb18   :  { %3547 = vmatmul.msk.f32.vlgmr.msrb.gmra.mxu1 %vm180_vm1, %v1378_v60  ;;  %v1453_v61 = vpop.permute.xlu1 %1452 }
 0xb19   :  { %3551 = vmatpush.xpose.msk.msrb.mxu2 %vm180_vm1, %v1453_v61  ;;  %1559 = vmatpush.msra.mxu1 %v835_v19 }
 0xb1b   :  { %1560 = vmatpush.msra.mxu1 %v834_v21 }
 0xb1c   :  { %3552 = vmatmul.msk.f32.vlgmr.msrb.gmra.mxu2 %vm180_vm1, %v1451_v62 }
 0xb1d   :  { %1561 = vmatpush.msra.mxu1 %v833_v22 }
 0xb1f   :  { %1562 = vmatpush.msra.mxu1 %v832_v23 }
 0xb20   :  { %v1217_v7 = vpop.permute.xlu1 %1216 }
 0xb21   :  { %v1227_v25 = vsel %vm180_vm1, %v4383_v47, %v1217_v7 }
 0xb4b   :  { %v1265_v63 = vpop.xlane.xlu1 %1264 }
 0xb4c   :  { %v1266_v0 = vsub.f32 %v1260_v11, %v1265_v63  ;;  %v4476_v11 = vld [vmem:[%s5076_s9] ss:$0 sm:$0xff] }
 0xb4e   :  { %v1267_v1 = vmul.f32 1.442695, %v1266_v0 }
 0xb50   :  { %3811 = vpow2.f32 %v1267_v1 }
 0xb56   :  { %v4429_v2 = vpop.eup %3811 }
 0xb57   :  { %v1269_v3 = vsel %vm953_vm9, %v4429_v2, 0.0 }
 0xb58   :  { %1270 = vadd.xlane.f32.xlu1 %v1269_v3 }
 0xb77   :  { %v1139_v4 = vpop.f32.mrf.mxu3 }
 0xb78   :  { %1220 = vrot.lane.b32.xlu2 %v1139_v4, %s5149_s24 }
 0xb87   :  { %v1333_v9 = vpop.f32.mrf.mxu2 }
 0xb88   :  { %v1336_v13 = vsel %vm953_vm9, %v1333_v9, -inf }
 0xb89   :  { %v1212_v6 = vpop.f32.mrf.mxu0 }
 0xb8a   :  { %1224 = vrot.lane.b32.xlu0 %v1212_v6, %s5150_s21 }
 0xb95   :  { %v1406_v16 = vpop.f32.mrf.mxu1 }
 0xb96   :  { %v1409_v17 = vsel %vm953_vm9, %v1406_v16, -inf }
 0xb9f   :  { %v1479_v5 = vpop.f32.mrf.mxu2 }
 0xba0   :  { %v1482_v14 = vsel %vm953_vm9, %v1479_v5, -inf }
 0xba1   :  { %1337 = vmax.xlane.f32.xlu2 %v1336_v13  ;;  %v1631_v13 = vld [vmem:[#allocation3 + $0x18] sm:$0xff] }
 0xba9   :  { %1483 = vmax.xlane.f32.xlu2 %v1482_v14  ;;  %v1629_v14 = vld [vmem:[#allocation3 + $0x8] sm:$0xff] }
 0xbb4   :  { %1410 = vmax.xlane.f32.xlu0 %v1409_v17 }
 0xbc1   :  { %1276 = vrot.lane.b32.xlu2 %v4361_v12, %s5155_s20 }
 0xbc9   :  { %1422 = vrot.lane.b32.xlu2 %v4361_v12, %s5156_s11 }
 0xbcb   :  { %v1271_v43 = vpop.xlane.xlu1 %1270 }
 0xbd2   :  { %v1221_v24 = vpop.permute.xlu2 %1220 }
 0xbd3   :  { %v1228_v26 = vsel %vm452_vm2, %v1227_v25, %v1221_v24 }
 0xbfc   :  { %v1225_v56 = vpop.permute.xlu0 %1224 }
 0xbfd   :  { %v1229_v27 = vsel %vm454_vm3, %v1228_v26, %v1225_v56 }
 0xbfe   :  { %3555 = vmatmul.msk.f32.vlgmr.msra.gmra.mxu1 %vm107_vm0, %v1229_v27  ;;  %v4499_v27 = vld [vmem:[%s5079_s12] ss:$0 sm:$0xff]  ;;  %s5160_s12 = sld [smem:[#allocation16_spill]] }
 0xc14   :  { %v1338_v28 = vpop.xlane.xlu2 %1337 }
 0xc15   :  { %v1339_v29 = vsub.f32 %v1333_v9, %v1338_v28 }
 0xc17   :  { %v1340_v30 = vmul.f32 1.442695, %v1339_v29 }
 0xc19   :  { %3813 = vpow2.f32 %v1340_v30  ;;  %v4504_v30 = vld [vmem:[%s5080_s13] ss:$0 sm:$0xff] }
 0xc1c   :  { %v1484_v31 = vpop.xlane.xlu2 %1483 }
 0xc1d   :  { %v1485_v48 = vsub.f32 %v1479_v5, %v1484_v31  ;;  %v1630_v5 = vld [vmem:[#allocation3 + $0x10] sm:$0xff] }
 0xc1f   :  { %v3814_v32 = vpop.eup %3813  ;;  %v1486_v33 = vmul.f32 1.442695, %v1485_v48 }
 0xc20   :  { %v1342_v34 = vsel %vm953_vm9, %v3814_v32, 0.0 }
 0xc21   :  { %3815 = vpow2.f32 %v1486_v33  ;;  %1343 = vadd.xlane.f32.xlu1 %v1342_v34  ;;  %v1674_v33 = vld [vmem:[%s5085_s18 + $0x38] sm:$0xff]  ;;  %v1673_v34 = vld [vmem:[%s5085_s18 + $0x30] sm:$0xff] }
 0xc22   :  { %1694 = vmatpush.msra.mxu2 %v1674_v33 }
 0xc24   :  { %v1277_v47 = vpop.permute.xlu2 %1276  ;;  %1695 = vmatpush.msra.mxu2 %v1673_v34 }
 0xc25   :  { %3538 = vmatpush.msk.msrb.mxu3 %vm973_vm8, %v1277_v47  ;;  %v1672_v47 = vld [vmem:[%s5085_s18 + $0x28] sm:$0xff] }
 0xc26   :  { %1696 = vmatpush.msra.mxu2 %v1672_v47 }
 0xc27   :  { %v3816_v35 = vpop.eup %3815  ;;  %v1411_v36 = vpop.xlane.xlu0 %1410 }
 0xc28   :  { %v1412_v37 = vsub.f32 %v1406_v16, %v1411_v36  ;;  %v1488_v38 = vsel %vm953_vm9, %v3816_v35, 0.0  ;;  %v1628_v16 = vld [vmem:[#allocation3] sm:$0xff]  ;;  %v1670_v36 = vld [vmem:[%s5085_s18 + $0x18] sm:$0xff] }
 0xc29   :  { %1489 = vadd.xlane.f32.xlu2 %v1488_v38  ;;  %v1669_v38 = vld [vmem:[%s5085_s18 + $0x10] sm:$0xff] }
 0xc2a   :  { %v1413_v39 = vmul.f32 1.442695, %v1412_v37 }
 0xc2c   :  { %3817 = vpow2.f32 %v1413_v39  ;;  %v1423_v51 = vpop.permute.xlu2 %1422  ;;  %v1668_v39 = vld [vmem:[%s5085_s18 + $0x8] sm:$0xff] }
 0xc2d   :  { %3819 = vrcp.f32 %v1271_v43  ;;  %v4541_v43 = vld [vmem:[%s5084_s17] ss:$0 sm:$0xff] }
 0xc32   :  { %v3818_v8 = vpop.eup %3817 }
 0xc33   :  { %v1415_v49 = vsel %vm953_vm9, %v3818_v8, 0.0  ;;  %v3820_v45 = vpop.eup %3819 }
 0xc34   :  { %1416 = vadd.xlane.f32.xlu0 %v1415_v49  ;;  %v1273_v46 = vmul.f32 %v3820_v45, %v4429_v2 }
 0xc3a   :  { %1274 = vrot.lane.b32.xlu1 %v4370_v18, %s5155_s20 }
 0xc42   :  { %1420 = vrot.lane.b32.xlu1 %v4370_v18, %s5156_s11 }
 0xc48   :  { %1349 = vrot.lane.b32.xlu0 %v4361_v12, %s5157_s22 }
 0xc4a   :  { %1493 = vrot.lane.b32.xlu1 %v4370_v18, %s5154_s4 }
 0xc50   :  { %1347 = vrot.lane.b32.xlu0 %v4370_v18, %s5157_s22 }
 0xc7b   :  { %v1564_v40 = vpop.f32.mrf.mxu1 }
 0xc7c   :  { %v1565_v41 = vadd.f32 %v4476_v11, %v1564_v40 }
 0xc7e   :  { %v1572_v15 = vadd.f32 %v1565_v41, %v4274_v59 }
 0xc80   :  { %v1574_v42 = vsel %vm107_vm0, %v1572_v15, 0.0 }
 0xc81   :  { %1575 = vadd.xlane.f32.xlu0 %v1574_v42 }
 0xc94   :  { %v1344_v44 = vpop.xlane.xlu1 %1343 }
 0xc95   :  { %1495 = vrot.lane.b32.xlu0 %v4361_v12, %s5154_s4 }
 0xc9c   :  { %v1490_v63 = vpop.xlane.xlu2 %1489 }
 0xca7   :  { %v1417_v18 = vpop.xlane.xlu0 %1416 }
 0xca8   :  { %3821 = vrcp.f32 %v1417_v18 }
 0xca9   :  { %3823 = vrcp.f32 %v1344_v44 }
 0xcaa   :  { %3825 = vrcp.f32 %v1490_v63  ;;  %v3562_v63 = vld [vmem:[%s5142_s25 + $0x28] sm:$0xff] }
 0xcac   :  { %v1275_v50 = vpop.permute.xlu1 %1274 }
 0xcad   :  { %1299 = vmatpush.msrb.mxu3 %v1275_v50 }
 0xcae   :  { %3539 = vmatmul.msk.f32.vlgmr.msrb.gmra.mxu3 %vm953_vm9, %v1273_v46  ;;  %v3822_v59 = vpop.eup %3821 }
 0xcaf   :  { %3548 = vmatpush.msk.msra.mxu3 %vm973_vm8, %v1423_v51  ;;  %v1419_v52 = vmul.f32 %v3822_v59, %v3818_v8  ;;  %v3824_v54 = vpop.eup %3823  ;;  %v1667_v8 = vld [vmem:[%s5085_s18] sm:$0xff] }
 0xcb0   :  { %v1346_v55 = vmul.f32 %v3824_v54, %v3814_v32  ;;  %v3826_v0 = vpop.eup %3825 }
 0xcb1   :  { %v1492_v2 = vmul.f32 %v3826_v0, %v3816_v35  ;;  %v1671_v35 = vld [vmem:[%s5085_s18 + $0x20] sm:$0xff] }
 0xcb2   :  { %1697 = vmatpush.msra.mxu2 %v1671_v35  ;;  %v3561_v0 = vld [vmem:[%s5142_s25 + $0x20] sm:$0xff] }
 0xcb4   :  { %v1421_v53 = vpop.permute.xlu1 %1420  ;;  %1698 = vmatpush.msra.mxu2 %v1670_v36 }
 0xcb5   :  { %1445 = vmatpush.msra.mxu3 %v1421_v53 }
 0xcb6   :  { %3549 = vmatmul.msk.f32.vlgmr.msra.gmra.mxu3 %vm953_vm9, %v1419_v52  ;;  %1699 = vmatpush.msra.mxu2 %v1669_v38  ;;  %v4551_v52 = vld [vmem:[%s5086_s19] ss:$0 sm:$0xff] }
 0xcb7   :  { %1654 = vmatpush.msrb.mxu3 %v1631_v13 }
 0xcb8   :  { %1700 = vmatpush.msra.mxu2 %v1668_v39 }
 0xcb9   :  { %1655 = vmatpush.msrb.mxu3 %v1630_v5 }
 0xcba   :  { %v1350_v12 = vpop.permute.xlu0 %1349  ;;  %1701 = vmatpush.msra.mxu2 %v1667_v8 }
 0xcbb   :  { %3543 = vmatpush.msk.msra.mxu0 %vm973_vm8, %v1350_v12  ;;  %1656 = vmatpush.msrb.mxu3 %v1629_v14 }
 0xcbc   :  { %v1494_v3 = vpop.permute.xlu1 %1493 }
 0xcbd   :  { %1657 = vmatpush.msrb.mxu3 %v1628_v16 }
 0xcc2   :  { %v1348_v57 = vpop.permute.xlu0 %1347 }
 0xcc3   :  { %1372 = vmatpush.msra.mxu0 %v1348_v57 }
 0xcc4   :  { %3544 = vmatmul.msk.f32.vlgmr.msra.gmra.mxu0 %vm953_vm9, %v1346_v55 }
 0xcf4   :  { %v1576_v58 = vpop.xlane.xlu0 %1575 }
 0xcf5   :  { %v1580_v60 = vmul.f32 %v1576_v58, %v4220_v10 }
 0xcf7   :  { %v1582_v61 = vsub.f32 %v1572_v15, %v1580_v60  ;;  %v3563_v60 = vld [vmem:[%s5142_s25 + $0x30] sm:$0xff] }
 0xcf9   :  { %v1584_v62 = vmul.f32 %v1582_v61, %v1582_v61 }
 0xcfb   :  { %v1586_v7 = vsel %vm107_vm0, %v1584_v62, 0.0 }
 0xcfc   :  { %1587 = vadd.xlane.f32.xlu0 %v1586_v7 }
 0xd07   :  { %v1496_v1 = vpop.permute.xlu0 %1495 }
 0xd08   :  { %3553 = vmatpush.msk.msrb.mxu0 %vm973_vm8, %v1496_v1 }
 0xd0a   :  { %1518 = vmatpush.msrb.mxu0 %v1494_v3 }
 0xd0b   :  { %3554 = vmatmul.msk.f32.vlgmr.msrb.gmra.mxu0 %vm953_vm9, %v1492_v2 }
 0xd31   :  { %v1301_v4 = vpop.f32.mrf.mxu3 }
 0xd39   :  { %v1447_v9 = vpop.f32.mrf.mxu3 }
 0xd41   :  { %v1374_v6 = vpop.f32.mrf.mxu0 }
 0xd42   :  { %1524 = vrot.lane.b32.xlu1 %v1374_v6, %s5158_s3 }
 0xd4a   :  { %1528 = vrot.lane.b32.xlu1 %v1447_v9, %s5149_s24  ;;  %v3717_v9 = vpack.i.bf16 %v3561_v0, %v3562_v63 }
 0xd6f   :  { %v1588_v17 = vpop.xlane.xlu0 %1587 }
 0xd70   :  { %v1592_v19 = vmul.f32 %v1588_v17, %v4220_v10 }
 0xd72   :  { %v1594_v21 = vadd.f32 1e-05, %v1592_v19 }
 0xd74   :  { %3827 = vrsqrt.f32 %v1594_v21  ;;  %vm1602_vm15 = vweird.f32 %v1594_v21 }
 0xd7a   :  { %v3828_v22 = vpop.eup %3827 }
 0xd7b   :  { %v1597_v23 = vmul.f32 %v3828_v22, %v1594_v21  ;;  %vm1603_vm14 = vweird.f32 %v3828_v22 }
 0xd7c   :  { %vm1604_vm4 = vmor %vm1602_vm15, %vm1603_vm14 }
 0xd7d   :  { %v1598_v24 = vmul.f32 %v3828_v22, %v1597_v23 }
 0xd7f   :  { %v1599_v25 = vmul.f32 0.5, %v1598_v24 }
 0xd81   :  { %v1600_v26 = vsub.f32 1.5, %v1599_v25 }
 0xd83   :  { %v1601_v56 = vmul.f32 %v3828_v22, %v1600_v26 }
 0xd85   :  { %v1605_v28 = vsel %vm1604_vm4, %v3828_v22, %v1601_v56 }
 0xd86   :  { %v1616_v29 = vmul.f32 %v1605_v28, %v1582_v61  ;;  %v3564_v61 = vld [vmem:[%s5142_s25 + $0x38] sm:$0xff]  ;;  %s5164_s25 = sld [smem:[#allocation18_spill]] }
 0xd87   :  { %v3712_v62 = vpack.i.bf16 %v3563_v60, %v3564_v61  ;;  %1802 = vmatpush.msra.mxu0 %v3564_v61 }
 0xd88   :  { %v1621_v31 = vmul.f32 %v4499_v27, %v1616_v29  ;;  %v1520_v48 = vpop.f32.mrf.mxu0 }
 0xd89   :  { %1532 = vrot.lane.b32.xlu1 %v1520_v48, %s5150_s21  ;;  %3713 = vrot.lane.b32.xlu0 %v3712_v62, %s5155_s20 }
 0xd8a   :  { %v1626_v32 = vadd.f32 %v4504_v30, %v1621_v31  ;;  %1803 = vmatpush.msra.mxu0 %v3563_v60  ;;  %v4578_v31 = vld [vmem:[%s5144_s6 + $0x1] ss:$0 sm:$0xff]  ;;  %s5165_s6 = sld [smem:[#allocation19_spill]] }
 0xd8c   :  { %3557 = vmatmul.msk.f32.vlgmr.msrb.gmra.mxu3 %vm107_vm0, %v1626_v32  ;;  %1804 = vmatpush.msra.mxu0 %v3562_v63 }
 0xd8e   :  { %1805 = vmatpush.msra.mxu0 %v3561_v0 }
 0xd91   :  { %1829 = vrot.lane.b32.xlu0 %v4578_v31, %s5155_s20 }
 0xdb4   :  { %v1525_v37 = vpop.permute.xlu1 %1524 }
 0xdb5   :  { %v1535_v40 = vsel %vm180_vm1, %v1301_v4, %v1525_v37 }
 0xdbc   :  { %v1529_v49 = vpop.permute.xlu1 %1528 }
 0xdbd   :  { %v1536_v41 = vsel %vm452_vm2, %v1535_v40, %v1529_v49  ;;  %v4588_v49 = vld [vmem:[%s5081_s14] ss:$0 sm:$0xff] }
 0xdfb   :  { %v1533_v15 = vpop.permute.xlu1 %1532  ;;  %v3714_v22 = vpop.permute.xlu0 %3713 }
 0xdfc   :  { %v1537_v42 = vsel %vm454_vm3, %v1536_v41, %v1533_v15  ;;  %v3715_v24 = vunpack.i.l.bf16 %v3714_v22  ;;  %v3716_v26 = vunpack.i.h.bf16 %v3714_v22  ;;  %v4593_v15 = vld [vmem:[%s5082_s15] ss:$0 sm:$0xff] }
 0xdfd   :  { %3556 = vmatmul.msk.f32.gmra.mxu1 %vm107_vm0, %v1537_v42 }
 0xdfe   :  { %1844 = vmatpush.msrb.mxu1 %v3715_v24 }
 0xe00   :  { %1845 = vmatpush.msrb.mxu1 %v3716_v26 }
 0xe0f   :  { %v1659_v44 = vpop.f32.mrf.mxu3 }
 0xe10   :  { %v1660_v18 = vadd.f32 %v4541_v43, %v1659_v44 }
 0xe12   :  { %v1665_v45 = vmax.f32 %v1660_v18, 0.0 }
 0xe14   :  { %3559 = vmatmul.msk.f32.vlgmr.msra.gmra.mxu2 %vm1679_vm5, %v1665_v45 }
 0xe7a   :  { %v1567_v46 = vpop.f32.mrf.mxu1 }
 0xe7b   :  { %v1568_v50 = vadd.f32 %v4476_v11, %v1567_v46 }
 0xe7d   :  { %v1573_v51 = vadd.f32 %v1568_v50, %v4376_v20  ;;  %v4605_v50 = vpop.permute.xlu0 %1829 }
 0xe7f   :  { %v1577_v59 = vsel %vm107_vm0, %v1573_v51, 0.0 }
 0xe80   :  { %1578 = vadd.xlane.f32.xlu2 %v1577_v59 }
 0xe97   :  { %v1703_v53 = vpop.f32.mrf.mxu2 }
 0xe98   :  { %v1704_v12 = vadd.f32 %v4551_v52, %v1703_v53 }
 0xe9a   :  { %v1711_v54 = vadd.f32 %v1704_v12, %v1626_v32 }
 0xe9c   :  { %v1713_v55 = vsel %vm107_vm0, %v1711_v54, 0.0 }
 0xe9d   :  { %1714 = vadd.xlane.f32.xlu1 %v1713_v55 }
 0xef3   :  { %v1579_v57 = vpop.xlane.xlu2 %1578 }
 0xef4   :  { %v1581_v11 = vmul.f32 %v1579_v57, %v4220_v10 }
 0xef6   :  { %v1583_v58 = vsub.f32 %v1573_v51, %v1581_v11 }
 0xef8   :  { %v1585_v20 = vmul.f32 %v1583_v58, %v1583_v58 }
 0xefa   :  { %v1589_v7 = vsel %vm107_vm0, %v1585_v20, 0.0 }
 0xefb   :  { %1590 = vadd.xlane.f32.xlu2 %v1589_v7 }
 0xf10   :  { %v1715_v1 = vpop.xlane.xlu1 %1714 }
 0xf11   :  { %v1719_v2 = vmul.f32 %v1715_v1, %v4220_v10 }
 0xf13   :  { %v1721_v3 = vsub.f32 %v1711_v54, %v1719_v2 }
 0xf15   :  { %v1723_v4 = vmul.f32 %v1721_v3, %v1721_v3 }
 0xf17   :  { %v1725_v6 = vsel %vm107_vm0, %v1723_v4, 0.0 }
 0xf18   :  { %1726 = vadd.xlane.f32.xlu2 %v1725_v6 }
 0xf30   :  { %3718 = vrot.lane.b32.xlu2 %v3717_v9, %s5155_s20 }
 0xf6e   :  { %v1591_v13 = vpop.xlane.xlu2 %1590 }
 0xf6f   :  { %v1593_v5 = vmul.f32 %v1591_v13, %v4220_v10 }
 0xf71   :  { %v1595_v14 = vadd.f32 1e-05, %v1593_v5 }
 0xf73   :  { %3829 = vrsqrt.f32 %v1595_v14  ;;  %vm1612_vm7 = vweird.f32 %v1595_v14 }
 0xf79   :  { %v3830_v16 = vpop.eup %3829 }
 0xf7a   :  { %v1607_v17 = vmul.f32 %v3830_v16, %v1595_v14  ;;  %vm1613_vm6 = vweird.f32 %v3830_v16 }
 0xf7b   :  { %vm1614_vm10 = vmor %vm1612_vm7, %vm1613_vm6 }
 0xf7c   :  { %v1608_v19 = vmul.f32 %v3830_v16, %v1607_v17 }
 0xf7e   :  { %v1609_v21 = vmul.f32 0.5, %v1608_v19 }
 0xf80   :  { %v1610_v23 = vsub.f32 1.5, %v1609_v21 }
 0xf82   :  { %v1611_v25 = vmul.f32 %v3830_v16, %v1610_v23 }
 0xf84   :  { %v1615_v56 = vsel %vm1614_vm10, %v3830_v16, %v1611_v25 }
 0xf85   :  { %v1617_v28 = vmul.f32 %v1615_v56, %v1583_v58 }
 0xf87   :  { %v1622_v29 = vmul.f32 %v4499_v27, %v1617_v28 }
 0xf89   :  { %v1627_v48 = vadd.f32 %v4504_v30, %v1622_v29 }
 0xf8b   :  { %3558 = vmatmul.msk.f32.gmra.mxu3 %vm107_vm0, %v1627_v48  ;;  %v1727_v32 = vpop.xlane.xlu2 %1726 }
 0xf8c   :  { %v1731_v33 = vmul.f32 %v1727_v32, %v4220_v10 }
 0xf8e   :  { %v1733_v34 = vadd.f32 1e-05, %v1731_v33 }
 0xf90   :  { %3831 = vrsqrt.f32 %v1733_v34  ;;  %vm1741_vm12 = vweird.f32 %v1733_v34 }
 0xf93   :  { %v3719_v47 = vpop.permute.xlu2 %3718 }
 0xf94   :  { %v3721_v35 = vunpack.i.h.bf16 %v3719_v47  ;;  %v3720_v27 = vunpack.i.l.bf16 %v3719_v47 }
 0xf96   :  { %v3832_v36 = vpop.eup %3831  ;;  %1846 = vmatpush.msrb.mxu1 %v3720_v27 }
 0xf97   :  { %v1736_v37 = vmul.f32 %v3832_v36, %v1733_v34  ;;  %vm1742_vm11 = vweird.f32 %v3832_v36 }
 0xf98   :  { %1847 = vmatpush.msrb.mxu1 %v3721_v35  ;;  %vm1743_vm14 = vmor %vm1741_vm12, %vm1742_vm11 }
 0xf99   :  { %v1737_v38 = vmul.f32 %v3832_v36, %v1736_v37 }
 0xf9b   :  { %v1738_v39 = vmul.f32 0.5, %v1737_v38 }
 0xf9d   :  { %v1739_v30 = vsub.f32 1.5, %v1738_v39 }
 0xf9f   :  { %v1740_v8 = vmul.f32 %v3832_v36, %v1739_v30 }
 0xfa1   :  { %v1744_v40 = vsel %vm1743_vm14, %v3832_v36, %v1740_v8 }
 0xfa2   :  { %v1755_v41 = vmul.f32 %v1744_v40, %v1721_v3 }
 0xfa4   :  { %v1760_v42 = vmul.f32 %v4588_v49, %v1755_v41 }
 0xfa6   :  { %v4597_v44 = vadd.f32 %v4593_v15, %v1760_v42 }
 0xfa8   :  { %3571 = vmatmul.msk.f32.vlgmr.msra.gmra.mxu0 %vm107_vm0, %v4597_v44  ;;  %3573 = vmatmul.msk.f32.vlgmr.msrb.gmra.mxu1 %vm107_vm0, %v4597_v44 }
0x100e   :  { %v1662_v18 = vpop.f32.mrf.mxu3 }
0x100f   :  { %v1663_v45 = vadd.f32 %v4541_v43, %v1662_v18 }
0x1011   :  { %v1666_v46 = vmax.f32 %v1663_v45, 0.0 }
0x1013   :  { %3560 = vmatmul.msk.f32.gmra.mxu2 %vm1679_vm5, %v1666_v46 }
0x1025   :  { %v1807_v51 = vpop.f32.mrf.mxu0  ;;  %v1849_v59 = vpop.f32.mrf.mxu1 }
0x1026   :  { %v1808_v53 = vadd.f32 %v4578_v31, %v1807_v51  ;;  %v4609_v12 = vadd.f32 %v1849_v59, %v4605_v50 }
0x1028   :  { %v1855_v54 = vmul.f32 0.35355338, %v1808_v53  ;;  %3575 = vmatpush.xpose.msk.msra.mxu3 %vm180_vm1, %v4609_v12 }
0x102b   :  { %3576 = vmatmul.msk.f32.vlgmr.msra.gmra.mxu3 %vm180_vm1, %v1855_v54 }
0x1096   :  { %v1706_v55 = vpop.f32.mrf.mxu2 }
0x1097   :  { %v1707_v43 = vadd.f32 %v4551_v52, %v1706_v55 }
0x1099   :  { %v1712_v57 = vadd.f32 %v1707_v43, %v1627_v48 }
0x109b   :  { %v1716_v11 = vsel %vm107_vm0, %v1712_v57, 0.0 }
0x109c   :  { %1717 = vadd.xlane.f32.xlu1 %v1716_v11 }
0x10ae   :  { %v1879_v58 = vpop.f32.mrf.mxu3 }
0x10af   :  { %v1882_v20 = vsel %vm180_vm1, %v1879_v58, -inf }
0x10b0   :  { %1883 = vmax.xlane.f32.xlu0 %v1882_v20 }
0x10b5   :  { %1921 = vrot.lane.b32.xlu1 %v4609_v12, %s5151_s26 }
0x10bd   :  { %1919 = vrot.lane.b32.xlu1 %v1855_v54, %s5151_s26 }
0x10c4   :  { %2051 = vrot.lane.b32.xlu0 %v4609_v12, %s5153_s29 }
0x10cc   :  { %1893 = vrot.lane.b32.xlu0 %v4609_v12, %s5155_s20 }
0x10d4   :  { %1984 = vrot.lane.b32.xlu0 %v1855_v54, %s5152_s30 }
0x110f   :  { %v1718_v52 = vpop.xlane.xlu1 %1717 }
0x1110   :  { %v1720_v60 = vmul.f32 %v1718_v52, %v4220_v10 }
0x1112   :  { %v1722_v61 = vsub.f32 %v1712_v57, %v1720_v60 }
0x1114   :  { %v1724_v62 = vmul.f32 %v1722_v61, %v1722_v61 }
0x1116   :  { %v1728_v7 = vsel %vm107_vm0, %v1724_v62, 0.0 }
0x1117   :  { %1729 = vadd.xlane.f32.xlu2 %v1728_v7 }
0x1123   :  { %v1884_v63 = vpop.xlane.xlu0 %1883 }
0x1124   :  { %v1885_v0 = vsub.f32 %v1879_v58, %v1884_v63 }
0x1126   :  { %v1886_v1 = vmul.f32 1.442695, %v1885_v0 }
0x1127   :  { %v1922_v2 = vpop.permute.xlu1 %1921 }
0x1128   :  { %3833 = vpow2.f32 %v1886_v1  ;;  %3578 = vmatpush.xpose.msk.msrb.mxu3 %vm180_vm1, %v1922_v2 }
0x112e   :  { %v3834_v3 = vpop.eup %3833 }
0x112f   :  { %2049 = vrot.lane.b32.xlu2 %v1855_v54, %s5153_s29  ;;  %v1920_v4 = vpop.permute.xlu1 %1919  ;;  %v1888_v6 = vsel %vm180_vm1, %v3834_v3, 0.0 }
0x1130   :  { %1889 = vadd.xlane.f32.xlu1 %v1888_v6  ;;  %3579 = vmatmul.msk.f32.vlgmr.msrb.gmra.mxu3 %vm180_vm1, %v1920_v4 }
0x1136   :  { %v2052_v9 = vpop.permute.xlu0 %2051 }
0x1137   :  { %1986 = vrot.lane.b32.xlu2 %v4609_v12, %s5152_s30  ;;  %3584 = vmatpush.xpose.msk.msra.mxu3 %vm180_vm1, %v2052_v9 }
0x113e   :  { %v1894_v13 = vpop.permute.xlu0 %1893 }
0x113f   :  { %1914 = vmatpush.msrb.mxu0 %v1894_v13 }
0x1146   :  { %v1985_v27 = vpop.permute.xlu0 %1984 }
0x118a   :  { %v1730_v5 = vpop.xlane.xlu2 %1729 }
0x118b   :  { %v1732_v14 = vmul.f32 %v1730_v5, %v4220_v10 }
0x118d   :  { %v1734_v16 = vadd.f32 1e-05, %v1732_v14 }
0x118f   :  { %3835 = vrsqrt.f32 %v1734_v16  ;;  %vm1751_vm4 = vweird.f32 %v1734_v16 }
0x1192   :  { %v2050_v17 = vpop.permute.xlu2 %2049 }
0x1193   :  { %3585 = vmatmul.msk.f32.vlgmr.msra.gmra.mxu3 %vm180_vm1, %v2050_v17 }
0x1195   :  { %v3836_v19 = vpop.eup %3835 }
0x1196   :  { %v1746_v21 = vmul.f32 %v3836_v19, %v1734_v16  ;;  %vm1752_vm15 = vweird.f32 %v3836_v19 }
0x1197   :  { %vm1753_vm6 = vmor %vm1751_vm4, %vm1752_vm15 }
0x1198   :  { %v1747_v22 = vmul.f32 %v3836_v19, %v1746_v21 }
0x119a   :  { %v1748_v23 = vmul.f32 0.5, %v1747_v22  ;;  %v1987_v24 = vpop.permute.xlu2 %1986 }
0x119b   :  { %3581 = vmatpush.xpose.msk.msra.mxu0 %vm180_vm1, %v1987_v24 }
0x119c   :  { %v1749_v25 = vsub.f32 1.5, %v1748_v23 }
0x119e   :  { %v1750_v26 = vmul.f32 %v3836_v19, %v1749_v25 }
0x11a0   :  { %v1754_v56 = vsel %vm1753_vm6, %v3836_v19, %v1750_v26 }
0x11a1   :  { %v1756_v28 = vmul.f32 %v1754_v56, %v1722_v61 }
0x11a3   :  { %v1890_v29 = vpop.xlane.xlu1 %1889  ;;  %v1761_v48 = vmul.f32 %v4588_v49, %v1756_v28 }
0x11a4   :  { %3837 = vrcp.f32 %v1890_v29  ;;  %v3569_v29 = vld [vmem:[%s5145_s23 + $0x38] sm:$0xff] }
0x11a5   :  { %v4639_v32 = vadd.f32 %v4593_v15, %v1761_v48  ;;  %v3568_v48 = vld [vmem:[%s5145_s23 + $0x30] sm:$0xff] }
0x11a7   :  { %3572 = vmatmul.msk.f32.gmra.mxu0 %vm107_vm0, %v4639_v32  ;;  %3574 = vmatmul.msk.f32.gmra.mxu1 %vm107_vm0, %v4639_v32 }
0x11aa   :  { %v3838_v33 = vpop.eup %3837 }
0x11ab   :  { %v1892_v34 = vmul.f32 %v3838_v33, %v3834_v3  ;;  %v3567_v33 = vld [vmem:[%s5145_s23 + $0x28] sm:$0xff] }
0x11af   :  { %3577 = vmatmul.msk.f32.vlgmr.msrb.gmra.mxu0 %vm180_vm1, %v1892_v34  ;;  %v3566_v34 = vld [vmem:[%s5145_s23 + $0x20] sm:$0xff] }
0x11b3   :  { %v1944_v47 = vpop.f32.mrf.mxu3 }
0x11b4   :  { %v1947_v35 = vsel %vm180_vm1, %v1944_v47, -inf }
0x11b5   :  { %1948 = vmax.xlane.f32.xlu2 %v1947_v35 }
0x11b7   :  { %3582 = vmatmul.msk.f32.vlgmr.msra.gmra.mxu0 %vm180_vm1, %v1985_v27 }
0x1216   :  { %v2074_v36 = vpop.f32.mrf.mxu3 }
0x1217   :  { %v2077_v37 = vsel %vm180_vm1, %v2074_v36, -inf }
0x1218   :  { %2078 = vmax.xlane.f32.xlu0 %v2077_v37 }
0x1224   :  { %v1810_v38 = vpop.f32.mrf.mxu0  ;;  %v1852_v39 = vpop.f32.mrf.mxu1 }
0x1225   :  { %v1811_v30 = vadd.f32 %v4578_v31, %v1810_v38  ;;  %v4651_v8 = vadd.f32 %v1852_v39, %v4605_v50 }
0x1227   :  { %v2129_v49 = vmul.f32 0.35355338, %v1811_v30  ;;  %2195 = vrot.lane.b32.xlu2 %v4651_v8, %s5151_s26  ;;  %3587 = vmatpush.xpose.msk.msrb.mxu0 %vm180_vm1, %v4651_v8 }
0x1228   :  { %v1949_v40 = vpop.xlane.xlu2 %1948 }
0x1229   :  { %v1950_v41 = vsub.f32 %v1944_v47, %v1949_v40 }
0x122a   :  { %3588 = vmatmul.msk.f32.vlgmr.msrb.gmra.mxu0 %vm180_vm1, %v2129_v49 }
0x122b   :  { %v1951_v15 = vmul.f32 1.442695, %v1950_v41 }
0x122c   :  { %2088 = vrot.lane.b32.xlu0 %v4609_v12, %s5154_s4  ;;  %v4660_v31 = vpop.f32.mrf.mxu0 }
0x122d   :  { %3839 = vpow2.f32 %v1951_v15 }
0x1233   :  { %v3840_v42 = vpop.eup %3839 }
0x1234   :  { %2325 = vrot.lane.b32.xlu0 %v4651_v8, %s5153_s29  ;;  %v1953_v18 = vsel %vm180_vm1, %v3840_v42, 0.0  ;;  %v2009_v45 = vpop.f32.mrf.mxu0 }
0x1235   :  { %1954 = vadd.xlane.f32.xlu1 %v1953_v18  ;;  %v2012_v46 = vsel %vm180_vm1, %v2009_v45, -inf }
0x123c   :  { %2260 = vrot.lane.b32.xlu0 %v4651_v8, %s5152_s30 }
0x123d   :  { %2013 = vmax.xlane.f32.xlu1 %v2012_v46 }
0x1281   :  { %v2196_v50 = vpop.permute.xlu2 %2195 }
0x1282   :  { %3590 = vmatpush.xpose.msk.msrb.mxu3 %vm180_vm1, %v2196_v50 }
0x128b   :  { %v2079_v51 = vpop.xlane.xlu0 %2078 }
0x128c   :  { %v2080_v59 = vsub.f32 %v2074_v36, %v2079_v51 }
0x128e   :  { %v2081_v53 = vmul.f32 1.442695, %v2080_v59 }
0x1290   :  { %3841 = vpow2.f32 %v2081_v53 }
0x1296   :  { %v3842_v54 = vpop.eup %3841 }
0x1297   :  { %v2083_v55 = vsel %vm180_vm1, %v3842_v54, 0.0 }
0x1298   :  { %2084 = vadd.xlane.f32.xlu1 %v2083_v55 }
0x129e   :  { %v2089_v43 = vpop.permute.xlu0 %2088 }
0x12a6   :  { %v2326_v57 = vpop.permute.xlu0 %2325 }
0x12a7   :  { %3596 = vmatpush.xpose.msk.msra.mxu3 %vm180_vm1, %v2326_v57  ;;  %v2153_v22 = vpop.f32.mrf.mxu0 }
0x12a8   :  { %v1955_v11 = vpop.xlane.xlu1 %1954  ;;  %v2156_v28 = vsel %vm180_vm1, %v2153_v22, -inf }
0x12ae   :  { %v2261_v58 = vpop.permute.xlu0 %2260 }
0x12af   :  { %3593 = vmatpush.xpose.msk.msra.mxu0 %vm180_vm1, %v2261_v58  ;;  %v4725_v58 = vld [vmem:[%s5146_s16 + $0x1] ss:$0 sm:$0xff] }
0x12b0   :  { %v2014_v20 = vpop.xlane.xlu1 %2013 }
0x12b1   :  { %v2015_v52 = vsub.f32 %v2009_v45, %v2014_v20  ;;  %1958 = vrot.lane.b32.xlu1 %v4609_v12, %s5157_s22 }
0x12b3   :  { %v2016_v60 = vmul.f32 1.442695, %v2015_v52  ;;  %2424 = vmatpush.msrb.mxu0 %v3569_v29 }
0x12b5   :  { %3843 = vpow2.f32 %v2016_v60  ;;  %2425 = vmatpush.msrb.mxu0 %v3568_v48 }
0x12b6   :  { %3845 = vrcp.f32 %v1955_v11 }
0x12b7   :  { %2426 = vmatpush.msrb.mxu0 %v3567_v33 }
0x12b9   :  { %2193 = vrot.lane.b32.xlu1 %v2129_v49, %s5151_s26  ;;  %2427 = vmatpush.msrb.mxu0 %v3566_v34 }
0x12bb   :  { %v3844_v61 = vpop.eup %3843 }
0x12bc   :  { %v2018_v62 = vsel %vm180_vm1, %v3844_v61, 0.0  ;;  %v3846_v63 = vpop.eup %3845 }
0x12bd   :  { %2019 = vadd.xlane.f32.xlu2 %v2018_v62  ;;  %v1957_v0 = vmul.f32 %v3846_v63, %v3840_v42 }
0x12c1   :  { %2023 = vrot.lane.b32.xlu1 %v4609_v12, %s5156_s11 }
0x12c9   :  { %2323 = vrot.lane.b32.xlu1 %v2129_v49, %s5153_s29 }
0x12d5   :  { %2258 = vrot.lane.b32.xlu2 %v2129_v49, %s5152_s30 }
0x130b   :  { %v2085_v7 = vpop.xlane.xlu1 %2084 }
0x130c   :  { %3847 = vrcp.f32 %v2085_v7 }
0x1312   :  { %v3848_v2 = vpop.eup %3847 }
0x1313   :  { %v2087_v3 = vmul.f32 %v3848_v2, %v3842_v54 }
0x1323   :  { %v1959_v1 = vpop.permute.xlu1 %1958 }
0x1324   :  { %1979 = vmatpush.msrb.mxu2 %v1959_v1 }
0x1325   :  { %3580 = vmatmul.msk.f32.vlgmr.msrb.gmra.mxu2 %vm180_vm1, %v1957_v0 }
0x1326   :  { %2109 = vmatpush.msra.mxu2 %v2089_v43 }
0x132b   :  { %v2194_v4 = vpop.permute.xlu1 %2193 }
0x132c   :  { %3591 = vmatmul.msk.f32.vlgmr.msrb.gmra.mxu3 %vm180_vm1, %v2194_v4 }
0x132d   :  { %3586 = vmatmul.msk.f32.vlgmr.msra.gmra.mxu2 %vm180_vm1, %v2087_v3 }
0x1330   :  { %v2020_v12 = vpop.xlane.xlu2 %2019 }
0x1331   :  { %3849 = vrcp.f32 %v2020_v12 }
0x1333   :  { %v2024_v6 = vpop.permute.xlu1 %2023 }
0x1334   :  { %2044 = vmatpush.msra.mxu1 %v2024_v6 }
0x1337   :  { %v3850_v9 = vpop.eup %3849 }
0x1338   :  { %v2022_v13 = vmul.f32 %v3850_v9, %v3844_v61  ;;  %v2259_v5 = vpop.permute.xlu2 %2258 }
0x1339   :  { %3594 = vmatmul.msk.f32.vlgmr.msra.gmra.mxu0 %vm180_vm1, %v2259_v5 }
0x133a   :  { %3583 = vmatmul.msk.f32.vlgmr.msra.gmra.mxu1 %vm180_vm1, %v2022_v13 }
0x133b   :  { %v2324_v14 = vpop.permute.xlu1 %2323 }
0x133c   :  { %3597 = vmatmul.msk.f32.vlgmr.msra.gmra.mxu3 %vm180_vm1, %v2324_v14 }
0x13a8   :  { %v1981_v16 = vpop.f32.mrf.mxu2 }
0x13a9   :  { %2115 = vrot.lane.b32.xlu1 %v1981_v16, %s5158_s3  ;;  %v3605_v16 = vld [vmem:[%s5147_s0 + $0x30] sm:$0xff] }
0x13af   :  { %v2218_v21 = vpop.f32.mrf.mxu3 }
0x13b0   :  { %v2111_v17 = vpop.f32.mrf.mxu2  ;;  %v2221_v23 = vsel %vm180_vm1, %v2218_v21, -inf }
0x13b1   :  { %2123 = vrot.lane.b32.xlu2 %v2111_v17, %s5150_s21  ;;  %v3606_v17 = vld [vmem:[%s5147_s0 + $0x38] sm:$0xff] }
0x13b6   :  { %v2283_v25 = vpop.f32.mrf.mxu0 }
0x13b7   :  { %v2046_v19 = vpop.f32.mrf.mxu1  ;;  %v2286_v56 = vsel %vm180_vm1, %v2283_v25, -inf }
0x13b8   :  { %2119 = vrot.lane.b32.xlu0 %v2046_v19, %s5149_s24  ;;  %v3722_v19 = vpack.i.bf16 %v3605_v16, %v3606_v17 }
0x13bf   :  { %v2348_v24 = vpop.f32.mrf.mxu3 }
0x13c0   :  { %v2351_v26 = vsel %vm180_vm1, %v2348_v24, -inf }
0x13d3   :  { %2222 = vmax.xlane.f32.xlu1 %v2221_v23 }
0x13da   :  { %2352 = vmax.xlane.f32.xlu2 %v2351_v26 }
0x13db   :  { %2287 = vmax.xlane.f32.xlu1 %v2286_v56 }
0x13e2   :  { %2157 = vmax.xlane.f32.xlu0 %v2156_v28 }
0x140b   :  { %v2124_v36 = vpop.permute.xlu2 %2123 }
0x141b   :  { %v2116_v47 = vpop.permute.xlu1 %2115 }
0x141c   :  { %v2126_v35 = vsel %vm180_vm1, %v4660_v31, %v2116_v47 }
0x142a   :  { %v2120_v27 = vpop.permute.xlu0 %2119 }
0x142b   :  { %v2127_v37 = vsel %vm452_vm2, %v2126_v35, %v2120_v27 }
0x142c   :  { %v2128_v38 = vsel %vm454_vm3, %v2127_v37, %v2124_v36 }
0x142d   :  { %3599 = vmatmul.msk.f32.vlgmr.msrb.gmra.mxu0 %vm107_vm0, %v2128_v38  ;;  %v3911_v38 = vld [vmem:[%s5148_s27] sm:$0xff] }
0x1446   :  { %v2223_v39 = vpop.xlane.xlu1 %2222 }
0x1447   :  { %v2224_v30 = vsub.f32 %v2218_v21, %v2223_v39  ;;  %v3603_v21 = vld [vmem:[%s5147_s0 + $0x20] sm:$0xff] }
0x1449   :  { %v2225_v49 = vmul.f32 1.442695, %v2224_v30  ;;  %v3912_v30 = vld [vmem:[%s5148_s27 + $0x8] sm:$0xff] }
0x144b   :  { %3851 = vpow2.f32 %v2225_v49  ;;  %v3913_v49 = vld [vmem:[%s5148_s27 + $0x10] sm:$0xf] }
0x144d   :  { %v2353_v40 = vpop.xlane.xlu2 %2352 }
0x144e   :  { %v2354_v41 = vsub.f32 %v2348_v24, %v2353_v40  ;;  %v2288_v31 = vpop.xlane.xlu1 %2287  ;;  %v4768_v40 = vld [vmem:[%s5159_s2 + $0x1] ss:$0 sm:$0xff] }
0x144f   :  { %v2289_v51 = vsub.f32 %v2283_v25, %v2288_v31 }
0x1450   :  { %v2355_v15 = vmul.f32 1.442695, %v2354_v41 }
0x1451   :  { %v3852_v42 = vpop.eup %3851  ;;  %v2290_v54 = vmul.f32 1.442695, %v2289_v51 }
0x1452   :  { %3853 = vpow2.f32 %v2355_v15  ;;  %v2227_v18 = vsel %vm180_vm1, %v3852_v42, 0.0 }
0x1453   :  { %2228 = vadd.xlane.f32.xlu2 %v2227_v18 }
0x1455   :  { %v2158_v45 = vpop.xlane.xlu0 %2157 }
0x1456   :  { %v2159_v46 = vsub.f32 %v2153_v22, %v2158_v45  ;;  %v3604_v22 = vld [vmem:[%s5147_s0 + $0x28] sm:$0xff]  ;;  %s5163_s0 = sld [smem:[#allocation15_spill]] }
0x1457   :  { %v3727_v23 = vpack.i.bf16 %v3603_v21, %v3604_v22 }
0x1458   :  { %v3854_v50 = vpop.eup %3853  ;;  %v2160_v59 = vmul.f32 1.442695, %v2159_v46 }
0x1459   :  { %v2357_v53 = vsel %vm180_vm1, %v3854_v50, 0.0 }
0x145a   :  { %3855 = vpow2.f32 %v2160_v59  ;;  %2358 = vadd.xlane.f32.xlu1 %v2357_v53  ;;  %v4776_v59 = vld [vmem:[%s5160_s12 + $0x1] ss:$0 sm:$0xff] }
0x145b   :  { %3857 = vpow2.f32 %v2290_v54 }
0x1460   :  { %v3856_v55 = vpop.eup %3855 }
0x1461   :  { %v2162_v43 = vsel %vm180_vm1, %v3856_v55, 0.0  ;;  %v3858_v57 = vpop.eup %3857 }
0x1462   :  { %2163 = vadd.xlane.f32.xlu0 %v2162_v43  ;;  %v2292_v11 = vsel %vm180_vm1, %v3858_v57, 0.0 }
0x146a   :  { %2293 = vadd.xlane.f32.xlu0 %v2292_v11 }
0x146b   :  { %2232 = vrot.lane.b32.xlu2 %v4651_v8, %s5157_s22 }
0x1473   :  { %2167 = vrot.lane.b32.xlu1 %v4651_v8, %s5155_s20  ;;  %2297 = vrot.lane.b32.xlu2 %v4651_v8, %s5156_s11 }
0x147b   :  { %3723 = vrot.lane.b32.xlu2 %v3722_v19, %s5155_s20 }
0x147e   :  { %2362 = vrot.lane.b32.xlu0 %v4651_v8, %s5154_s4 }
0x1483   :  { %3728 = vrot.lane.b32.xlu2 %v3727_v23, %s5155_s20 }
0x14aa   :  { %v2429_v20 = vpop.f32.mrf.mxu0 }
0x14ab   :  { %v2430_v52 = vadd.f32 %v4725_v58, %v2429_v20 }
0x14ad   :  { %v2439_v60 = vadd.f32 %v2430_v52, %v4597_v44 }
0x14af   :  { %v2441_v61 = vsel %vm107_vm0, %v2439_v60, 0.0 }
0x14b0   :  { %2442 = vadd.xlane.f32.xlu0 %v2441_v61 }
0x14c4   :  { %2557 = vrot.lane.b32.xlu0 %v4768_v40, %s5155_s20 }
0x14c6   :  { %v2229_v62 = vpop.xlane.xlu2 %2228 }
0x14c7   :  { %3859 = vrcp.f32 %v2229_v62 }
0x14cd   :  { %v3860_v7 = vpop.eup %3859  ;;  %v2359_v1 = vpop.xlane.xlu1 %2358 }
0x14ce   :  { %v2231_v63 = vmul.f32 %v3860_v7, %v3852_v42  ;;  %v2233_v0 = vpop.permute.xlu2 %2232 }
0x14cf   :  { %2253 = vmatpush.msrb.mxu2 %v2233_v0 }
0x14d0   :  { %3592 = vmatmul.msk.f32.vlgmr.msrb.gmra.mxu2 %vm180_vm1, %v2231_v63 }
0x14d5   :  { %v2164_v8 = vpop.xlane.xlu0 %2163 }
0x14d6   :  { %3861 = vrcp.f32 %v2164_v8  ;;  %v2298_v44 = vpop.permute.xlu2 %2297 }
0x14dc   :  { %v3862_v3 = vpop.eup %3861 }
0x14dd   :  { %v2294_v2 = vpop.xlane.xlu0 %2293  ;;  %v2166_v4 = vmul.f32 %v3862_v3, %v3856_v55  ;;  %v4781_v55 = vld [vmem:[%s5161_s8 + $0x1] ss:$0 sm:$0xff] }
0x14de   :  { %3863 = vrcp.f32 %v2294_v2  ;;  %v3724_v33 = vpop.permute.xlu2 %3723 }
0x14df   :  { %3865 = vrcp.f32 %v2359_v1  ;;  %v3726_v34 = vunpack.i.h.bf16 %v3724_v33  ;;  %v3725_v47 = vunpack.i.l.bf16 %v3724_v33 }
0x14e1   :  { %2572 = vmatpush.msrb.mxu3 %v3725_v47 }
0x14e3   :  { %2573 = vmatpush.msrb.mxu3 %v3726_v34 }
0x14e4   :  { %v3864_v6 = vpop.eup %3863 }
0x14e5   :  { %v2168_v12 = vpop.permute.xlu1 %2167  ;;  %v3866_v9 = vpop.eup %3865  ;;  %v2296_v13 = vmul.f32 %v3864_v6, %v3858_v57 }
0x14e6   :  { %2188 = vmatpush.msrb.mxu1 %v2168_v12  ;;  %v2361_v5 = vmul.f32 %v3866_v9, %v3854_v50  ;;  %v3729_v27 = vpop.permute.xlu2 %3728 }
0x14e7   :  { %3589 = vmatmul.msk.f32.vlgmr.msrb.gmra.mxu1 %vm180_vm1, %v2166_v4  ;;  %v3731_v36 = vunpack.i.h.bf16 %v3729_v27  ;;  %v3730_v37 = vunpack.i.l.bf16 %v3729_v27 }
0x14e8   :  { %2318 = vmatpush.msra.mxu1 %v2298_v44 }
0x14e9   :  { %2574 = vmatpush.msrb.mxu3 %v3730_v37 }
0x14ea   :  { %2530 = vmatpush.msrb.mxu1 %v3606_v17 }
0x14eb   :  { %2575 = vmatpush.msrb.mxu3 %v3731_v36 }
0x14ec   :  { %2531 = vmatpush.msrb.mxu1 %v3605_v16  ;;  %3615 = vmatmul.msk.f32.vlgmr.msrb.gmra.mxu3 %vm107_vm0, %v3911_v38 }
0x14ee   :  { %2532 = vmatpush.msrb.mxu1 %v3604_v22 }
0x14ef   :  { %3595 = vmatmul.msk.f32.vlgmr.msra.gmra.mxu1 %vm180_vm1, %v2296_v13 }
0x14f0   :  { %v2363_v14 = vpop.permute.xlu0 %2362  ;;  %2533 = vmatpush.msrb.mxu1 %v3603_v21 }
0x14f1   :  { %2383 = vmatpush.msra.mxu2 %v2363_v14 }
0x14f2   :  { %3598 = vmatmul.msk.f32.vlgmr.msra.gmra.mxu2 %vm180_vm1, %v2361_v5 }
0x14f4   :  { %3616 = vmatmul.msk.f32.gmra.mxu3 %vm107_vm0, %v3912_v30 }
0x14fc   :  { %3617 = vmatmul.msk.f32.gmra.mxu3 %vm107_vm0, %v3913_v49 }
0x1523   :  { %v2443_v24 = vpop.xlane.xlu0 %2442 }
0x1524   :  { %v2447_v25 = vmul.f32 %v2443_v24, %v4220_v10 }
0x1526   :  { %v2449_v26 = vsub.f32 %v2439_v60, %v2447_v25 }
0x1528   :  { %v2451_v56 = vmul.f32 %v2449_v26, %v2449_v26 }
0x152a   :  { %v2453_v28 = vsel %vm107_vm0, %v2451_v56, 0.0 }
0x152b   :  { %2454 = vadd.xlane.f32.xlu1 %v2453_v28 }
0x1536   :  { %v2558_v0 = vpop.permute.xlu0 %2557 }
0x1553   :  { %v2255_v29 = vpop.f32.mrf.mxu2 }
0x1554   :  { %2389 = vrot.lane.b32.xlu2 %v2255_v29, %s5158_s3 }
0x1564   :  { %v2190_v48 = vpop.f32.mrf.mxu1 }
0x156c   :  { %v2320_v35 = vpop.f32.mrf.mxu1 }
0x156d   :  { %2393 = vrot.lane.b32.xlu2 %v2320_v35, %s5149_s24 }
0x156f   :  { %v2577_v7 = vpop.f32.mrf.mxu3 }
0x1570   :  { %v4793_v8 = vadd.f32 %v2577_v7, %v2558_v0 }
0x1572   :  { %2659 = vrot.lane.b32.xlu1 %v4793_v8, %s5151_s26 }
0x1575   :  { %v2385_v39 = vpop.f32.mrf.mxu2 }
0x1576   :  { %2397 = vrot.lane.b32.xlu2 %v2385_v39, %s5150_s21 }
0x1577   :  { %v2580_v63 = vpop.f32.mrf.mxu3 }
0x1578   :  { %v4795_v1 = vadd.f32 %v2580_v63, %v2558_v0 }
0x157a   :  { %3618 = vmatpush.xpose.msk.msrb.mxu2 %vm180_vm1, %v4795_v1 }
0x157e   :  { %2661 = vrot.lane.b32.xlu2 %v4795_v1, %s5151_s26  ;;  %3619 = vmatpush.xpose.msk.msrb.mxu2 %vm180_vm1, %v4793_v8 }
0x157f   :  { %v2583_v23 = vpop.f32.mrf.mxu3 }
0x1580   :  { %v2584_v24 = vadd.f32 %v2583_v23, %v2558_v0 }
0x1582   :  { %v4834_v25 = vrot.slane %v2584_v24, 2 }
0x159e   :  { %v2455_v41 = vpop.xlane.xlu1 %2454 }
0x159f   :  { %v2459_v15 = vmul.f32 %v2455_v41, %v4220_v10 }
0x15a1   :  { %v2461_v42 = vadd.f32 1e-05, %v2459_v15 }
0x15a3   :  { %3867 = vrsqrt.f32 %v2461_v42  ;;  %vm2469_vm10 = vweird.f32 %v2461_v42 }
0x15a9   :  { %v3868_v18 = vpop.eup %3867 }
0x15aa   :  { %v2464_v31 = vmul.f32 %v3868_v18, %v2461_v42  ;;  %vm2470_vm7 = vweird.f32 %v3868_v18 }
0x15ab   :  { %vm2471_vm11 = vmor %vm2469_vm10, %vm2470_vm7 }
0x15ac   :  { %v2465_v45 = vmul.f32 %v3868_v18, %v2464_v31 }
0x15ae   :  { %v2466_v46 = vmul.f32 0.5, %v2465_v45  ;;  %v2390_v11 = vpop.permute.xlu2 %2389 }
0x15af   :  { %v2400_v52 = vsel %vm180_vm1, %v2190_v48, %v2390_v11 }
0x15b0   :  { %v2467_v50 = vsub.f32 1.5, %v2466_v46 }
0x15b2   :  { %v2468_v51 = vmul.f32 %v3868_v18, %v2467_v50 }
0x15b4   :  { %v2472_v53 = vsel %vm2471_vm11, %v3868_v18, %v2468_v51 }
0x15b5   :  { %v2483_v54 = vmul.f32 %v2472_v53, %v2449_v26  ;;  %v2893_v26 = vrot.slane %v4795_v1, 2 }
0x15b7   :  { %v2488_v43 = vmul.f32 %v4776_v59, %v2483_v54  ;;  %v4841_v56 = vsel %vm1232_vm13, %v2893_v26, %v4834_v25 }
0x15b9   :  { %v4785_v57 = vadd.f32 %v4781_v55, %v2488_v43 }
0x15bb   :  { %3613 = vmatmul.msk.f32.vlgmr.msrb.gmra.mxu1 %vm107_vm0, %v4785_v57 }
0x15c7   :  { %v2394_v20 = vpop.permute.xlu2 %2393 }
0x15c8   :  { %v2401_v60 = vsel %vm452_vm2, %v2400_v52, %v2394_v20 }
0x15d0   :  { %v2398_v61 = vpop.permute.xlu2 %2397 }
0x15d1   :  { %v2402_v62 = vsel %vm454_vm3, %v2401_v60, %v2398_v61 }
0x15d2   :  { %3600 = vmatmul.msk.f32.gmra.mxu0 %vm107_vm0, %v2402_v62 }
0x15d8   :  { %v2662_v13 = vpop.permute.xlu2 %2661 }
0x15d9   :  { %3623 = vmatpush.xpose.msk.msra.mxu0 %vm180_vm1, %v2662_v13 }
0x15e4   :  { %v2660_v5 = vpop.permute.xlu1 %2659 }
0x15e5   :  { %3624 = vmatpush.xpose.msk.msra.mxu0 %vm180_vm1, %v2660_v5 }
0x1638   :  { %v2535_v2 = vpop.f32.mrf.mxu1 }
0x1639   :  { %v2536_v3 = vadd.f32 %v4768_v40, %v2535_v2 }
0x163b   :  { %v2586_v4 = vmul.f32 0.35355338, %v2536_v3 }
0x163d   :  { %2657 = vrot.lane.b32.xlu0 %v2586_v4, %s5151_s26  ;;  %3620 = vmatmul.msk.f32.vlgmr.msrb.gmra.mxu2 %vm180_vm1, %v2586_v4 }
0x164f   :  { %v2432_v12 = vpop.f32.mrf.mxu0 }
0x1650   :  { %v2433_v44 = vadd.f32 %v4725_v58, %v2432_v12 }
0x1652   :  { %v2440_v6 = vadd.f32 %v2433_v44, %v4639_v32 }
0x1654   :  { %v2444_v9 = vsel %vm107_vm0, %v2440_v6, 0.0 }
0x1655   :  { %2445 = vadd.xlane.f32.xlu2 %v2444_v9 }
0x166d   :  { %2627 = vrot.lane.b32.xlu2 %v4793_v8, %s5155_s20 }
0x1675   :  { %2732 = vrot.lane.b32.xlu2 %v4793_v8, %s5152_s30 }
0x167d   :  { %2803 = vrot.lane.b32.xlu2 %v2586_v4, %s5153_s29 }
0x16af   :  { %v2658_v58 = vpop.permute.xlu0 %2657 }
0x16b0   :  { %3625 = vmatmul.msk.f32.vlgmr.msra.gmra.mxu0 %vm180_vm1, %v2658_v58 }
0x16c0   :  { %v4819_v32 = vpop.f32.mrf.mxu2 }
0x16c1   :  { %v2616_v14 = vsel %vm953_vm9, %v4819_v32, -inf }
0x16c2   :  { %2617 = vmax.xlane.f32.xlu0 %v2616_v14 }
0x16c8   :  { %v2446_v16 = vpop.xlane.xlu2 %2445 }
0x16c9   :  { %v2448_v17 = vmul.f32 %v2446_v16, %v4220_v10 }
0x16cb   :  { %v2450_v19 = vsub.f32 %v2440_v6, %v2448_v17 }
0x16cd   :  { %v2452_v21 = vmul.f32 %v2450_v19, %v2450_v19 }
0x16cf   :  { %v2456_v22 = vsel %vm107_vm0, %v2452_v21, 0.0 }
0x16d0   :  { %2457 = vadd.xlane.f32.xlu1 %v2456_v22  ;;  %v2628_v18 = vpop.permute.xlu2 %2627 }
0x16d6   :  { %2702 = vrot.lane.b32.xlu0 %v4795_v1, %s5157_s22 }
0x16d8   :  { %v2733_v46 = vpop.permute.xlu2 %2732 }
0x16de   :  { %2700 = vrot.lane.b32.xlu0 %v4793_v8, %s5157_s22 }
0x16e0   :  { %v2804_v3 = vpop.permute.xlu2 %2803 }
0x16e6   :  { %2807 = vrot.lane.b32.xlu0 %v4795_v1, %s5153_s29 }
0x16e9   :  { %2629 = vrot.lane.b32.xlu1 %v4795_v1, %s5155_s20 }
0x16ee   :  { %2730 = vrot.lane.b32.xlu0 %v2586_v4, %s5152_s30 }
0x16f1   :  { %2734 = vrot.lane.b32.xlu1 %v4795_v1, %s5152_s30 }
0x16f6   :  { %2966 = vrot.lane.b32.xlu0 %v4841_v56, %s5151_s26 }
0x16f9   :  { %2805 = vrot.lane.b32.xlu1 %v4793_v8, %s5153_s29 }
0x16fe   :  { %3114 = vrot.lane.b32.xlu0 %v4834_v25, %s5153_s29 }
0x1701   :  { %2968 = vrot.lane.b32.xlu1 %v4834_v25, %s5151_s26 }
0x1709   :  { %3041 = vrot.lane.b32.xlu1 %v4834_v25, %s5152_s30 }
0x1711   :  { %3112 = vrot.lane.b32.xlu1 %v4841_v56, %s5153_s29 }
0x1719   :  { %2775 = vrot.lane.b32.xlu1 %v4795_v1, %s5156_s11 }
0x172d   :  { %v2686_v20 = vpop.f32.mrf.mxu0 }
0x172e   :  { %v2689_v52 = vsel %vm953_vm9, %v2686_v20, -inf }
0x1735   :  { %v2618_v28 = vpop.xlane.xlu0 %2617 }
0x1736   :  { %v2619_v61 = vsub.f32 %v4819_v32, %v2618_v28 }
0x1738   :  { %v2620_v62 = vmul.f32 1.442695, %v2619_v61 }
0x1743   :  { %v2458_v29 = vpop.xlane.xlu1 %2457 }
0x1744   :  { %v2460_v48 = vmul.f32 %v2458_v29, %v4220_v10 }
0x1746   :  { %v2462_v33 = vadd.f32 1e-05, %v2460_v48 }
0x1748   :  { %3869 = vrsqrt.f32 %v2462_v33  ;;  %v2703_v34 = vpop.permute.xlu0 %2702  ;;  %vm2479_vm12 = vweird.f32 %v2462_v33 }
0x1749   :  { %3626 = vmatpush.msk.msra.mxu1 %vm973_vm8, %v2703_v34  ;;  %3871 = vpow2.f32 %v2620_v62 }
0x174e   :  { %v3870_v47 = vpop.eup %3869 }
0x174f   :  { %v2474_v35 = vmul.f32 %v3870_v47, %v2462_v33  ;;  %vm2480_vm13 = vweird.f32 %v3870_v47  ;;  %v3872_v7 = vpop.eup %3871 }
0x1750   :  { %v2701_v27 = vpop.permute.xlu0 %2700  ;;  %vm2481_vm14 = vmor %vm2479_vm12, %vm2480_vm13  ;;  %v2622_v63 = vsel %vm953_vm9, %v3872_v7, 0.0  ;;  %vm3440_vm13 = vcmask 1040384   ;;  %vm3473_vm12 = vcmask 1024  }
0x1751   :  { %v2475_v36 = vmul.f32 %v3870_v47, %v2474_v35  ;;  %2725 = vmatpush.msra.mxu1 %v2701_v27 }
0x1753   :  { %v2476_v37 = vmul.f32 0.5, %v2475_v36 }
0x1755   :  { %v2477_v38 = vsub.f32 1.5, %v2476_v37 }
0x1757   :  { %v2478_v39 = vmul.f32 %v3870_v47, %v2477_v38 }
0x1758   :  { %v2808_v30 = vpop.permute.xlu0 %2807 }
0x1759   :  { %v2482_v49 = vsel %vm2481_vm14, %v3870_v47, %v2478_v39  ;;  %3633 = vmatpush.xpose.msk.msrb.mxu1 %vm180_vm1, %v2808_v30 }
0x175a   :  { %v2484_v41 = vmul.f32 %v2482_v49, %v2450_v19 }
0x175b   :  { %v2630_v15 = vpop.permute.xlu1 %2629 }
0x175c   :  { %3621 = vmatpush.msk.msra.mxu2 %vm973_vm8, %v2630_v15  ;;  %v2489_v42 = vmul.f32 %v4776_v59, %v2484_v41 }
0x175e   :  { %2652 = vmatpush.msra.mxu2 %v2628_v18  ;;  %v4863_v31 = vadd.f32 %v4781_v55, %v2489_v42 }
0x1760   :  { %3614 = vmatmul.msk.f32.gmra.mxu1 %vm107_vm0, %v4863_v31  ;;  %v2731_v60 = vpop.permute.xlu0 %2730 }
0x1763   :  { %v2735_v45 = vpop.permute.xlu1 %2734 }
0x1764   :  { %3628 = vmatpush.xpose.msk.msrb.mxu2 %vm180_vm1, %v2735_v45 }
0x1768   :  { %3629 = vmatpush.xpose.msk.msrb.mxu2 %vm180_vm1, %v2733_v46 }
0x176b   :  { %v2806_v50 = vpop.permute.xlu1 %2805 }
0x176c   :  { %3634 = vmatpush.xpose.msk.msrb.mxu1 %vm180_vm1, %v2806_v50 }
0x1773   :  { %v2969_v51 = vpop.permute.xlu1 %2968 }
0x177b   :  { %v3042_v53 = vpop.permute.xlu1 %3041 }
0x1783   :  { %v3113_v59 = vpop.permute.xlu1 %3112 }
0x178b   :  { %v2776_v54 = vpop.permute.xlu1 %2775 }
0x178c   :  { %3631 = vmatpush.msk.msrb.mxu0 %vm973_vm8, %v2776_v54 }
0x17dd   :  { %v2538_v55 = vpop.f32.mrf.mxu1 }
0x17de   :  { %v2539_v43 = vadd.f32 %v4768_v40, %v2538_v55  ;;  %v2967_v40 = vpop.permute.xlu0 %2966 }
0x17e0   :  { %v2891_v11 = vmul.f32 0.35355338, %v2539_v43 }
0x17e2   :  { %3037 = vrot.lane.b32.xlu0 %v2891_v11, %s5152_s30  ;;  %2964 = vrot.lane.b32.xlu2 %v2891_v11, %s5151_s26  ;;  %s5162_s26 = sld [smem:[#allocation14_spill]] }
0x17e6   :  { %v3115_v0 = vpop.permute.xlu0 %3114 }
0x17ea   :  { %2848 = vrot.lane.b32.xlu0 %v4795_v1, %s5154_s4 }
0x180b   :  { %2690 = vmax.xlane.f32.xlu2 %v2689_v52 }
0x1823   :  { %3039 = vrot.lane.b32.xlu2 %v4841_v56, %s5152_s30 }
0x183c   :  { %v2965_v4 = vpop.permute.xlu2 %2964 }
0x184c   :  { %2623 = vadd.xlane.f32.xlu2 %v2622_v63 }
0x1854   :  { %v3038_v2 = vpop.permute.xlu0 %3037 }
0x185c   :  { %v2849_v1 = vpop.permute.xlu0 %2848 }
0x185d   :  { %3636 = vmatpush.msk.msra.mxu3 %vm973_vm8, %v2849_v1 }
0x187e   :  { %v2691_v12 = vpop.xlane.xlu2 %2690 }
0x187f   :  { %v2692_v44 = vsub.f32 %v2686_v20, %v2691_v12 }
0x1881   :  { %v2693_v6 = vmul.f32 1.442695, %v2692_v44 }
0x1883   :  { %3873 = vpow2.f32 %v2693_v6 }
0x1886   :  { %v3040_v5 = vpop.permute.xlu2 %3039 }
0x1889   :  { %v3874_v9 = vpop.eup %3873 }
0x188a   :  { %v2695_v13 = vsel %vm953_vm9, %v3874_v9, 0.0 }
0x188b   :  { %2696 = vadd.xlane.f32.xlu2 %v2695_v13 }
0x18a3   :  { %3110 = vrot.lane.b32.xlu2 %v2891_v11, %s5153_s29 }
0x18ab   :  { %2846 = vrot.lane.b32.xlu2 %v4793_v8, %s5154_s4 }
0x18bf   :  { %v2624_v58 = vpop.xlane.xlu2 %2623 }
0x18c0   :  { %3875 = vrcp.f32 %v2624_v58 }
0x18c6   :  { %v3876_v32 = vpop.eup %3875 }
0x18c7   :  { %v2626_v14 = vmul.f32 %v3876_v32, %v3872_v7 }
0x18c9   :  { %3622 = vmatmul.msk.f32.vlgmr.msra.gmra.mxu2 %vm953_vm9, %v2626_v14 }
0x18ca   :  { %3638 = vmatpush.xpose.msk.msra.mxu2 %vm180_vm1, %v4834_v25 }
0x18ce   :  { %3639 = vmatpush.xpose.msk.msra.mxu2 %vm180_vm1, %v4841_v56 }
0x18d1   :  { %3630 = vmatmul.msk.f32.vlgmr.msrb.gmra.mxu2 %vm180_vm1, %v2731_v60 }
0x18d2   :  { %3648 = vmatpush.xpose.msk.msrb.mxu2 %vm180_vm1, %v3042_v53 }
0x18d6   :  { %3649 = vmatpush.xpose.msk.msrb.mxu2 %vm180_vm1, %v3040_v5 }
0x18d9   :  { %3640 = vmatmul.msk.f32.vlgmr.msra.gmra.mxu2 %vm180_vm1, %v2891_v11 }
0x18e1   :  { %3650 = vmatmul.msk.f32.vlgmr.msrb.gmra.mxu2 %vm180_vm1, %v3038_v2 }
0x18fe   :  { %v2697_v16 = vpop.xlane.xlu2 %2696 }
0x18ff   :  { %3877 = vrcp.f32 %v2697_v16 }
0x1905   :  { %v3878_v17 = vpop.eup %3877 }
0x1906   :  { %v2699_v19 = vmul.f32 %v3878_v17, %v3874_v9  ;;  %v3111_v21 = vpop.permute.xlu2 %3110 }
0x1908   :  { %3627 = vmatmul.msk.f32.vlgmr.msra.gmra.mxu1 %vm953_vm9, %v2699_v19 }
0x1909   :  { %3643 = vmatpush.xpose.msk.msra.mxu1 %vm180_vm1, %v2969_v51 }
0x190d   :  { %3644 = vmatpush.xpose.msk.msra.mxu1 %vm180_vm1, %v2967_v40 }
0x190e   :  { %v2847_v22 = vpop.permute.xlu2 %2846 }
0x190f   :  { %2871 = vmatpush.msra.mxu3 %v2847_v22 }
0x1910   :  { %3635 = vmatmul.msk.f32.vlgmr.msrb.gmra.mxu1 %vm180_vm1, %v2804_v3 }
0x1911   :  { %3653 = vmatpush.xpose.msk.msrb.mxu1 %vm180_vm1, %v3115_v0 }
0x1915   :  { %3654 = vmatpush.xpose.msk.msrb.mxu1 %vm180_vm1, %v3113_v59 }
0x1918   :  { %3645 = vmatmul.msk.f32.vlgmr.msra.gmra.mxu1 %vm180_vm1, %v2965_v4 }
0x1920   :  { %3655 = vmatmul.msk.f32.vlgmr.msrb.gmra.mxu1 %vm180_vm1, %v3111_v21 }
0x194c   :  { %v4904_v23 = vpop.f32.mrf.mxu2 }
0x1954   :  { %v2759_v24 = vpop.f32.mrf.mxu2 }
0x1955   :  { %v2762_v26 = vsel %vm953_vm9, %v2759_v24, -inf }
0x1956   :  { %2763 = vmax.xlane.f32.xlu0 %v2762_v26 }
0x195c   :  { %v2920_v28 = vpop.f32.mrf.mxu2 }
0x195d   :  { %v2923_v29 = vsel %vm953_vm9, %v2920_v28, -inf }
0x195e   :  { %2924 = vmax.xlane.f32.xlu1 %v2923_v29 }
0x1964   :  { %v4908_v48 = vpop.f32.mrf.mxu2 }
0x1965   :  { %v3069_v33 = vsel %vm953_vm9, %v4908_v48, -inf }
0x1966   :  { %3070 = vmax.xlane.f32.xlu0 %v3069_v33 }
0x1985   :  { %v4912_v34 = vpop.f32.mrf.mxu1 }
0x198d   :  { %v2832_v47 = vpop.f32.mrf.mxu1 }
0x198e   :  { %v2835_v35 = vsel %vm953_vm9, %v2832_v47, -inf }
0x198f   :  { %2836 = vmax.xlane.f32.xlu1 %v2835_v35 }
0x1995   :  { %v2993_v27 = vpop.f32.mrf.mxu1 }
0x1996   :  { %v2996_v36 = vsel %vm953_vm9, %v2993_v27, -inf }
0x1997   :  { %2997 = vmax.xlane.f32.xlu2 %v2996_v36 }
0x199d   :  { %v3139_v37 = vpop.f32.mrf.mxu1 }
0x199e   :  { %v3142_v38 = vsel %vm953_vm9, %v3139_v37, -inf }
0x199f   :  { %3143 = vmax.xlane.f32.xlu2 %v3142_v38 }
0x19a8   :  { %3009 = vrot.lane.b32.xlu1 %v4834_v25, %s5157_s22 }
0x19b0   :  { %3007 = vrot.lane.b32.xlu1 %v4841_v56, %s5157_s22 }
0x19b7   :  { %2773 = vrot.lane.b32.xlu2 %v4793_v8, %s5156_s11 }
0x19c9   :  { %v2764_v39 = vpop.xlane.xlu0 %2763 }
0x19ca   :  { %v2765_v30 = vsub.f32 %v2759_v24, %v2764_v39 }
0x19cc   :  { %v2766_v49 = vmul.f32 1.442695, %v2765_v30 }
0x19ce   :  { %3879 = vpow2.f32 %v2766_v49 }
0x19d1   :  { %v2925_v41 = vpop.xlane.xlu1 %2924 }
0x19d2   :  { %v2926_v15 = vsub.f32 %v2920_v28, %v2925_v41  ;;  %v3611_v41 = vld [vmem:[%s5162_s26 + $0x38] sm:$0xff] }
0x19d3   :  { %3219 = vmatpush.msra.mxu2 %v3611_v41 }
0x19d4   :  { %v2927_v42 = vmul.f32 1.442695, %v2926_v15  ;;  %v3880_v18 = vpop.eup %3879  ;;  %v3610_v15 = vld [vmem:[%s5162_s26 + $0x30] sm:$0xff] }
0x19d5   :  { %v2768_v50 = vsel %vm953_vm9, %v3880_v18, 0.0  ;;  %3220 = vmatpush.msra.mxu2 %v3610_v15 }
0x19d6   :  { %3881 = vpow2.f32 %v2927_v42  ;;  %v3609_v42 = vld [vmem:[%s5162_s26 + $0x28] sm:$0xff] }
0x19d7   :  { %3221 = vmatpush.msra.mxu2 %v3609_v42 }
0x19d9   :  { %v3071_v2 = vpop.xlane.xlu0 %3070 }
0x19da   :  { %v3072_v1 = vsub.f32 %v4908_v48, %v3071_v2 }
0x19dc   :  { %v4923_v45 = vpop.eup %3881  ;;  %v3073_v3 = vmul.f32 1.442695, %v3072_v1 }
0x19dd   :  { %v2929_v46 = vsel %vm953_vm9, %v4923_v45, 0.0 }
0x19de   :  { %2930 = vadd.xlane.f32.xlu0 %v2929_v46 }
0x19e0   :  { %2769 = vadd.xlane.f32.xlu2 %v2768_v50 }
0x19f2   :  { %2934 = vrot.lane.b32.xlu0 %v4841_v56, %s5155_s20 }
0x19fa   :  { %3153 = vrot.lane.b32.xlu0 %v4841_v56, %s5154_s4 }
0x1a02   :  { %3082 = vrot.lane.b32.xlu0 %v4834_v25, %s5156_s11  ;;  %v2837_v8 = vpop.xlane.xlu1 %2836 }
0x1a03   :  { %v2838_v51 = vsub.f32 %v2832_v47, %v2837_v8 }
0x1a05   :  { %v2839_v53 = vmul.f32 1.442695, %v2838_v51 }
0x1a07   :  { %3883 = vpow2.f32 %v2839_v53 }
0x1a0a   :  { %v2998_v59 = vpop.xlane.xlu2 %2997  ;;  %3080 = vrot.lane.b32.xlu0 %v4841_v56, %s5156_s11 }
0x1a0b   :  { %v2999_v54 = vsub.f32 %v2993_v27, %v2998_v59 }
0x1a0d   :  { %v3884_v55 = vpop.eup %3883  ;;  %v3000_v43 = vmul.f32 1.442695, %v2999_v54 }
0x1a0e   :  { %v2841_v11 = vsel %vm953_vm9, %v3884_v55, 0.0 }
0x1a0f   :  { %3885 = vpow2.f32 %v3000_v43  ;;  %2842 = vadd.xlane.f32.xlu1 %v2841_v11 }
0x1a12   :  { %v3144_v20 = vpop.xlane.xlu2 %3143 }
0x1a13   :  { %v3145_v52 = vsub.f32 %v3139_v37, %v3144_v20 }
0x1a15   :  { %v3886_v60 = vpop.eup %3885  ;;  %v3146_v61 = vmul.f32 1.442695, %v3145_v52 }
0x1a16   :  { %v3002_v62 = vsel %vm953_vm9, %v3886_v60, 0.0 }
0x1a17   :  { %3887 = vpow2.f32 %v3146_v61  ;;  %3003 = vadd.xlane.f32.xlu1 %v3002_v62 }
0x1a18   :  { %3889 = vpow2.f32 %v3073_v3 }
0x1a1a   :  { %v2774_v40 = vpop.permute.xlu2 %2773  ;;  %v3010_v7 = vpop.permute.xlu1 %3009 }
0x1a1b   :  { %2798 = vmatpush.msrb.mxu0 %v2774_v40  ;;  %3646 = vmatpush.msk.msrb.mxu3 %vm973_vm8, %v3010_v7 }
0x1a1d   :  { %v3888_v56 = vpop.eup %3887 }
0x1a1e   :  { %v3148_v63 = vsel %vm953_vm9, %v3888_v56, 0.0  ;;  %v3890_v12 = vpop.eup %3889 }
0x1a1f   :  { %3149 = vadd.xlane.f32.xlu2 %v3148_v63  ;;  %v3075_v44 = vsel %vm953_vm9, %v3890_v12, 0.0 }
0x1a22   :  { %v3008_v0 = vpop.permute.xlu1 %3007 }
0x1a23   :  { %3032 = vmatpush.msrb.mxu3 %v3008_v0 }
0x1a30   :  { %2936 = vrot.lane.b32.xlu1 %v4834_v25, %s5155_s20 }
0x1a37   :  { %3155 = vrot.lane.b32.xlu2 %v4834_v25, %s5154_s4 }
0x1a51   :  { %v2931_v13 = vpop.xlane.xlu0 %2930 }
0x1a53   :  { %v2770_v4 = vpop.xlane.xlu2 %2769 }
0x1a54   :  { %3891 = vrcp.f32 %v2770_v4 }
0x1a5a   :  { %v3892_v6 = vpop.eup %3891  ;;  %3076 = vadd.xlane.f32.xlu1 %v3075_v44 }
0x1a5b   :  { %v2772_v9 = vmul.f32 %v3892_v6, %v3880_v18  ;;  %v3608_v18 = vld [vmem:[%s5162_s26 + $0x20] sm:$0xff] }
0x1a5c   :  { %3222 = vmatpush.msra.mxu2 %v3608_v18 }
0x1a5d   :  { %3632 = vmatmul.msk.f32.vlgmr.msrb.gmra.mxu0 %vm953_vm9, %v2772_v9 }
0x1a64   :  { %v2935_v58 = vpop.permute.xlu0 %2934 }
0x1a6c   :  { %v3154_v21 = vpop.permute.xlu0 %3153 }
0x1a73   :  { %2877 = vrot.lane.b32.xlu1 %v4912_v34, %s5158_s3 }
0x1a74   :  { %v3083_v28 = vpop.permute.xlu0 %3082 }
0x1a7c   :  { %v3081_v34 = vpop.permute.xlu0 %3080 }
0x1a82   :  { %v2843_v25 = vpop.xlane.xlu1 %2842 }
0x1a83   :  { %3893 = vrcp.f32 %v2843_v25  ;;  %v3292_v25 = vld [vmem:[#allocation3 + $0x28] sm:$0xff] }
0x1a89   :  { %v3894_v5 = vpop.eup %3893 }
0x1a8a   :  { %v2845_v32 = vmul.f32 %v3894_v5, %v3884_v55  ;;  %v3004_v14 = vpop.xlane.xlu1 %3003  ;;  %v3291_v5 = vld [vmem:[#allocation3 + $0x20] sm:$0xff] }
0x1a8b   :  { %3895 = vrcp.f32 %v3004_v14 }
0x1a8c   :  { %3637 = vmatmul.msk.f32.vlgmr.msra.gmra.mxu3 %vm953_vm9, %v2845_v32 }
0x1a91   :  { %v3896_v16 = vpop.eup %3895 }
0x1a92   :  { %v3006_v17 = vmul.f32 %v3896_v16, %v3886_v60  ;;  %v3150_v19 = vpop.xlane.xlu2 %3149 }
0x1a93   :  { %3897 = vrcp.f32 %v3150_v19 }
0x1a94   :  { %3647 = vmatmul.msk.f32.vlgmr.msrb.gmra.mxu3 %vm953_vm9, %v3006_v17  ;;  %3899 = vrcp.f32 %v2931_v13  ;;  %v3293_v13 = vld [vmem:[#allocation3 + $0x30] sm:$0xff] }
0x1a99   :  { %v3898_v22 = vpop.eup %3897 }
0x1a9a   :  { %v3156_v24 = vpop.permute.xlu2 %3155  ;;  %v3152_v26 = vmul.f32 %v3898_v22, %v3888_v56  ;;  %v3900_v29 = vpop.eup %3899 }
0x1a9b   :  { %3656 = vmatpush.msk.msra.mxu3 %vm973_vm8, %v3156_v24  ;;  %v2933_v33 = vmul.f32 %v3900_v29, %v4923_v45 }
0x1a9d   :  { %3178 = vmatpush.msra.mxu3 %v3154_v21 }
0x1a9e   :  { %3657 = vmatmul.msk.f32.vlgmr.msra.gmra.mxu3 %vm953_vm9, %v3152_v26  ;;  %v3750_v26 = vld [vmem:[%s5164_s25 + $0x1] ss:$0 sm:$0xff] }
0x1aa2   :  { %v2937_v48 = vpop.permute.xlu1 %2936 }
0x1aa3   :  { %3641 = vmatpush.msk.msra.mxu0 %vm973_vm8, %v2937_v48  ;;  %v3751_v48 = vld [vmem:[%s5165_s6 + $0x1] ss:$0 sm:$0xff] }
0x1aa5   :  { %2959 = vmatpush.msra.mxu0 %v2935_v58 }
0x1aa6   :  { %3642 = vmatmul.msk.f32.vlgmr.msra.gmra.mxu0 %vm953_vm9, %v2933_v33 }
0x1aa7   :  { %3651 = vmatpush.msk.msrb.mxu0 %vm973_vm8, %v3083_v28 }
0x1aa9   :  { %3105 = vmatpush.msrb.mxu0 %v3081_v34 }
0x1acd   :  { %v3077_v47 = vpop.xlane.xlu1 %3076 }
0x1ace   :  { %3901 = vrcp.f32 %v3077_v47  ;;  %v3672_v47 = vld [vmem:[%s5085_s18 + $0x78] sm:$0xff] }
0x1acf   :  { %3359 = vmatpush.msra.mxu1 %v3672_v47 }
0x1ad4   :  { %v3902_v35 = vpop.eup %3901 }
0x1ad5   :  { %v3079_v27 = vmul.f32 %v3902_v35, %v3890_v12  ;;  %v3671_v35 = vld [vmem:[%s5085_s18 + $0x70] sm:$0xff] }
0x1ad6   :  { %3360 = vmatpush.msra.mxu1 %v3671_v35 }
0x1ad7   :  { %3652 = vmatmul.msk.f32.vlgmr.msrb.gmra.mxu0 %vm953_vm9, %v3079_v27  ;;  %v3670_v27 = vld [vmem:[%s5085_s18 + $0x68] sm:$0xff] }
0x1ad8   :  { %3361 = vmatpush.msra.mxu1 %v3670_v27 }
0x1ada   :  { %v2800_v36 = vpop.f32.mrf.mxu0 }
0x1adb   :  { %2881 = vrot.lane.b32.xlu2 %v2800_v36, %s5149_s24 }
0x1ae5   :  { %v2878_v45 = vpop.permute.xlu1 %2877 }
0x1ae6   :  { %v2888_v50 = vsel %vm180_vm1, %v4904_v23, %v2878_v45  ;;  %v3749_v23 = vld [vmem:[%s5163_s0 + $0x1] ss:$0 sm:$0xff] }
0x1b0f   :  { %v2873_v37 = vpop.f32.mrf.mxu3 }
0x1b10   :  { %2885 = vrot.lane.b32.xlu0 %v2873_v37, %s5150_s21 }
0x1b17   :  { %v3034_v38 = vpop.f32.mrf.mxu3 }
0x1b18   :  { %3184 = vrot.lane.b32.xlu2 %v3034_v38, %s5158_s3  ;;  %v3669_v38 = vld [vmem:[%s5085_s18 + $0x60] sm:$0xff] }
0x1b19   :  { %3362 = vmatpush.msra.mxu1 %v3669_v38  ;;  %v3754_v38 = vld [vmem:[%s5081_s14 + $0x1] ss:$0 sm:$0xff] }
0x1b21   :  { %v3180_v39 = vpop.f32.mrf.mxu3 }
0x1b22   :  { %3192 = vrot.lane.b32.xlu2 %v3180_v39, %s5150_s21 }
0x1b23   :  { %v2961_v30 = vpop.f32.mrf.mxu0 }
0x1b35   :  { %v2882_v46 = vpop.permute.xlu2 %2881 }
0x1b36   :  { %v2889_v8 = vsel %vm452_vm2, %v2888_v50, %v2882_v46 }
0x1b54   :  { %v3107_v49 = vpop.f32.mrf.mxu0 }
0x1b55   :  { %3188 = vrot.lane.b32.xlu0 %v3107_v49, %s5149_s24 }
0x1b72   :  { %v3185_v59 = vpop.permute.xlu2 %3184 }
0x1b73   :  { %v3195_v54 = vsel %vm180_vm1, %v2961_v30, %v3185_v59  ;;  %v3668_v30 = vld [vmem:[%s5085_s18 + $0x58] sm:$0xff]  ;;  %v3666_v59 = vld [vmem:[%s5085_s18 + $0x48] sm:$0xff] }
0x1b74   :  { %3363 = vmatpush.msra.mxu1 %v3668_v30 }
0x1b7c   :  { %v3193_v43 = vpop.permute.xlu2 %3192 }
0x1b82   :  { %v2886_v51 = vpop.permute.xlu0 %2885 }
0x1b83   :  { %v2890_v53 = vsel %vm454_vm3, %v2889_v8, %v2886_v51 }
0x1b84   :  { %3658 = vmatmul.msk.f32.vlgmr.msra.gmra.mxu2 %vm107_vm0, %v2890_v53  ;;  %v3667_v53 = vld [vmem:[%s5085_s18 + $0x50] sm:$0xff] }
0x1b85   :  { %3364 = vmatpush.msra.mxu1 %v3667_v53  ;;  %v3756_v53 = vld [vmem:[#allocation2] ss:$0 sm:$0xff] }
0x1b87   :  { %3365 = vmatpush.msra.mxu1 %v3666_v59 }
0x1bc7   :  { %v3189_v55 = vpop.permute.xlu0 %3188 }
0x1bc8   :  { %v3196_v11 = vsel %vm452_vm2, %v3195_v54, %v3189_v55  ;;  %v3665_v54 = vld [vmem:[%s5085_s18 + $0x40] sm:$0xff] }
0x1bc9   :  { %v3197_v20 = vsel %vm454_vm3, %v3196_v11, %v3193_v43  ;;  %3366 = vmatpush.msra.mxu1 %v3665_v54  ;;  %v3752_v55 = vld [vmem:[%s5084_s17 + $0x1] ss:$0 sm:$0xff] }
0x1bca   :  { %3659 = vmatmul.msk.f32.gmra.mxu2 %vm107_vm0, %v3197_v20 }
0x1c07   :  { %v3224_v52 = vpop.f32.mrf.mxu2 }
0x1c08   :  { %v3225_v60 = vadd.f32 %v3749_v23, %v3224_v52 }
0x1c0a   :  { %v3234_v61 = vadd.f32 %v3225_v60, %v4785_v57 }
0x1c0c   :  { %v3236_v62 = vsel %vm107_vm0, %v3234_v61, 0.0 }
0x1c0d   :  { %3237 = vadd.xlane.f32.xlu0 %v3236_v62 }
0x1c4d   :  { %v3227_v40 = vpop.f32.mrf.mxu2 }
0x1c4e   :  { %v3228_v7 = vadd.f32 %v3749_v23, %v3227_v40 }
0x1c50   :  { %v3235_v56 = vadd.f32 %v3228_v7, %v4863_v31  ;;  %v3294_v31 = vld [vmem:[#allocation3 + $0x38] sm:$0xff] }
0x1c51   :  { %3318 = vmatpush.msra.mxu0 %v3294_v31 }
0x1c52   :  { %v3239_v63 = vsel %vm107_vm0, %v3235_v56, 0.0 }
0x1c53   :  { %3240 = vadd.xlane.f32.xlu1 %v3239_v63  ;;  %3319 = vmatpush.msra.mxu0 %v3293_v13 }
0x1c55   :  { %3320 = vmatpush.msra.mxu0 %v3292_v25 }
0x1c57   :  { %3321 = vmatpush.msra.mxu0 %v3291_v5 }
0x1c80   :  { %v3238_v0 = vpop.xlane.xlu0 %3237 }
0x1c81   :  { %v3242_v2 = vmul.f32 %v3238_v0, %v4220_v10 }
0x1c83   :  { %v3244_v1 = vsub.f32 %v3234_v61, %v3242_v2  ;;  %v3753_v61 = vld [vmem:[%s5086_s19 + $0x1] ss:$0 sm:$0xff]  ;;  %s5166_s19 = sld [smem:[#allocation20_spill]] }
0x1c85   :  { %v3246_v3 = vmul.f32 %v3244_v1, %v3244_v1 }
0x1c87   :  { %v3248_v4 = vsel %vm107_vm0, %v3246_v3, 0.0 }
0x1c88   :  { %3249 = vadd.xlane.f32.xlu2 %v3248_v4 }
0x1cc6   :  { %v3241_v12 = vpop.xlane.xlu1 %3240 }
0x1cc7   :  { %v3243_v57 = vmul.f32 %v3241_v12, %v4220_v10 }
0x1cc9   :  { %v3245_v44 = vsub.f32 %v3235_v56, %v3243_v57 }
0x1ccb   :  { %v3247_v6 = vmul.f32 %v3245_v44, %v3245_v44 }
0x1ccd   :  { %v3251_v9 = vsel %vm107_vm0, %v3247_v6, 0.0 }
0x1cce   :  { %3252 = vadd.xlane.f32.xlu0 %v3251_v9 }
0x1cfb   :  { %v3250_v58 = vpop.xlane.xlu2 %3249 }
0x1cfc   :  { %v3254_v32 = vmul.f32 %v3250_v58, %v4220_v10 }
0x1cfe   :  { %v3256_v14 = vadd.f32 1e-05, %v3254_v32 }
0x1d00   :  { %3903 = vrsqrt.f32 %v3256_v14  ;;  %vm3264_vm2 = vweird.f32 %v3256_v14 }
0x1d06   :  { %v3904_v16 = vpop.eup %3903 }
0x1d07   :  { %v3259_v17 = vmul.f32 %v3904_v16, %v3256_v14  ;;  %vm3265_vm1 = vweird.f32 %v3904_v16 }
0x1d08   :  { %vm3266_vm3 = vmor %vm3264_vm2, %vm3265_vm1 }
0x1d09   :  { %v3260_v19 = vmul.f32 %v3904_v16, %v3259_v17  ;;  %v3444_v17 = vld [vmem:[%s5166_s19 + $0x10] sm:$0xff] }
0x1d0b   :  { %v3261_v21 = vmul.f32 0.5, %v3260_v19 }
0x1d0d   :  { %v3262_v22 = vsub.f32 1.5, %v3261_v21  ;;  %v3443_v21 = vld [vmem:[%s5166_s19 + $0x8] sm:$0xff] }
0x1d0f   :  { %v3263_v24 = vmul.f32 %v3904_v16, %v3262_v22  ;;  %v3442_v22 = vld [vmem:[%s5166_s19] sm:$0xff] }
0x1d11   :  { %v3267_v28 = vsel %vm3266_vm3, %v3904_v16, %v3263_v24  ;;  %v3445_v16 = vld [vmem:[%s5166_s19 + $0x18] sm:$0xff] }
0x1d12   :  { %v3278_v29 = vmul.f32 %v3267_v28, %v3244_v1  ;;  %3465 = vmatpush.msrb.mxu3 %v3445_v16 }
0x1d14   :  { %v3283_v33 = vmul.f32 %v3750_v26, %v3278_v29  ;;  %3466 = vmatpush.msrb.mxu3 %v3444_v17 }
0x1d16   :  { %v3288_v34 = vadd.f32 %v3751_v48, %v3283_v33  ;;  %3467 = vmatpush.msrb.mxu3 %v3443_v21 }
0x1d18   :  { %3663 = vmatmul.msk.f32.vlgmr.msra.gmra.mxu0 %vm107_vm0, %v3288_v34  ;;  %3468 = vmatpush.msrb.mxu3 %v3442_v22 }
0x1d41   :  { %v3253_v36 = vpop.xlane.xlu0 %3252 }
0x1d42   :  { %v3255_v37 = vmul.f32 %v3253_v36, %v4220_v10 }
0x1d44   :  { %v3257_v39 = vadd.f32 1e-05, %v3255_v37 }
0x1d46   :  { %3905 = vrsqrt.f32 %v3257_v39  ;;  %vm3274_vm9 = vweird.f32 %v3257_v39 }
0x1d4c   :  { %v3906_v49 = vpop.eup %3905 }
0x1d4d   :  { %v3269_v41 = vmul.f32 %v3906_v49, %v3257_v39  ;;  %vm3275_vm8 = vweird.f32 %v3906_v49 }
0x1d4e   :  { %vm3276_vm15 = vmor %vm3274_vm9, %vm3275_vm8 }
0x1d4f   :  { %v3270_v15 = vmul.f32 %v3906_v49, %v3269_v41  ;;  %v3755_v41 = vld [vmem:[%s5082_s15 + $0x1] ss:$0 sm:$0xff] }
0x1d51   :  { %v3271_v42 = vmul.f32 0.5, %v3270_v15 }
0x1d53   :  { %v3272_v18 = vsub.f32 1.5, %v3271_v42 }
0x1d55   :  { %v3273_v45 = vmul.f32 %v3906_v49, %v3272_v18 }
0x1d57   :  { %v3277_v46 = vsel %vm3276_vm15, %v3906_v49, %v3273_v45 }
0x1d58   :  { %v3279_v50 = vmul.f32 %v3277_v46, %v3245_v44 }
0x1d5a   :  { %v3284_v8 = vmul.f32 %v3750_v26, %v3279_v50 }
0x1d5c   :  { %v3289_v51 = vadd.f32 %v3751_v48, %v3284_v8 }
0x1d5e   :  { %3664 = vmatmul.msk.f32.gmra.mxu0 %vm107_vm0, %v3289_v51 }
0x1d95   :  { %v3323_v43 = vpop.f32.mrf.mxu0 }
0x1d96   :  { %v3324_v11 = vadd.f32 %v3752_v55, %v3323_v43 }
0x1d98   :  { %v3329_v20 = vmax.f32 %v3324_v11, 0.0 }
0x1d9a   :  { %3674 = vmatmul.msk.f32.vlgmr.msra.gmra.mxu1 %vm1679_vm5, %v3329_v20 }
0x1ddb   :  { %v3326_v23 = vpop.f32.mrf.mxu0 }
0x1ddc   :  { %v3327_v52 = vadd.f32 %v3752_v55, %v3326_v23 }
0x1dde   :  { %v3330_v60 = vmax.f32 %v3327_v52, 0.0 }
0x1de0   :  { %3675 = vmatmul.msk.f32.gmra.mxu1 %vm1679_vm5, %v3330_v60 }
0x1e17   :  { %v3368_v62 = vpop.f32.mrf.mxu1 }
0x1e18   :  { %v3369_v40 = vadd.f32 %v3753_v61, %v3368_v62 }
0x1e1a   :  { %v3378_v7 = vadd.f32 %v3369_v40, %v3288_v34 }
0x1e1c   :  { %v3380_v56 = vsel %vm107_vm0, %v3378_v7, 0.0 }
0x1e1d   :  { %3381 = vadd.xlane.f32.xlu2 %v3380_v56 }
0x1e5d   :  { %v3371_v63 = vpop.f32.mrf.mxu1 }
0x1e5e   :  { %v3372_v0 = vadd.f32 %v3753_v61, %v3371_v63 }
0x1e60   :  { %v3379_v2 = vadd.f32 %v3372_v0, %v3289_v51 }
0x1e62   :  { %v3383_v1 = vsel %vm107_vm0, %v3379_v2, 0.0 }
0x1e63   :  { %3384 = vadd.xlane.f32.xlu1 %v3383_v1 }
0x1e90   :  { %v3382_v3 = vpop.xlane.xlu2 %3381 }
0x1e91   :  { %v3386_v4 = vmul.f32 %v3382_v3, %v4220_v10 }
0x1e93   :  { %v3388_v12 = vsub.f32 %v3378_v7, %v3386_v4 }
0x1e95   :  { %v3390_v57 = vmul.f32 %v3388_v12, %v3388_v12 }
0x1e97   :  { %v3392_v44 = vsel %vm107_vm0, %v3390_v57, 0.0 }
0x1e98   :  { %3393 = vadd.xlane.f32.xlu0 %v3392_v44 }
0x1ed6   :  { %v3385_v6 = vpop.xlane.xlu1 %3384 }
0x1ed7   :  { %v3387_v9 = vmul.f32 %v3385_v6, %v4220_v10 }
0x1ed9   :  { %v3389_v31 = vsub.f32 %v3379_v2, %v3387_v9 }
0x1edb   :  { %v3391_v13 = vmul.f32 %v3389_v31, %v3389_v31 }
0x1edd   :  { %v3395_v25 = vsel %vm107_vm0, %v3391_v13, 0.0 }
0x1ede   :  { %3396 = vadd.xlane.f32.xlu2 %v3395_v25 }
0x1f0b   :  { %v3394_v5 = vpop.xlane.xlu0 %3393 }
0x1f0c   :  { %v3398_v58 = vmul.f32 %v3394_v5, %v4220_v10 }
0x1f0e   :  { %v3400_v32 = vadd.f32 1e-05, %v3398_v58 }
0x1f10   :  { %3907 = vrsqrt.f32 %v3400_v32  ;;  %vm3408_vm4 = vweird.f32 %v3400_v32 }
0x1f16   :  { %v3908_v14 = vpop.eup %3907 }
0x1f17   :  { %v3403_v19 = vmul.f32 %v3908_v14, %v3400_v32  ;;  %vm3409_vm5 = vweird.f32 %v3908_v14 }
0x1f18   :  { %vm3410_vm6 = vmor %vm3408_vm4, %vm3409_vm5 }
0x1f19   :  { %v3404_v24 = vmul.f32 %v3908_v14, %v3403_v19 }
0x1f1b   :  { %v3405_v29 = vmul.f32 0.5, %v3404_v24 }
0x1f1d   :  { %v3406_v33 = vsub.f32 1.5, %v3405_v29 }
0x1f1f   :  { %v3407_v34 = vmul.f32 %v3908_v14, %v3406_v33 }
0x1f21   :  { %v3411_v27 = vsel %vm3410_vm6, %v3908_v14, %v3407_v34 }
0x1f22   :  { %v3422_v39 = vmul.f32 %v3411_v27, %v3388_v12 }
0x1f24   :  { %v3427_v49 = vmul.f32 %v3754_v38, %v3422_v39 }
0x1f26   :  { %v3432_v45 = vadd.f32 %v3755_v41, %v3427_v49 }
0x1f28   :  { %v3435_v50 = vrot.slane %v3432_v45, 7 }
0x1f51   :  { %v3397_v26 = vpop.xlane.xlu2 %3396 }
0x1f52   :  { %v3399_v28 = vmul.f32 %v3397_v26, %v4220_v10 }
0x1f54   :  { %v3401_v48 = vadd.f32 1e-05, %v3399_v28 }
0x1f56   :  { %3909 = vrsqrt.f32 %v3401_v48  ;;  %vm3418_vm10 = vweird.f32 %v3401_v48 }
0x1f5c   :  { %v3910_v47 = vpop.eup %3909 }
0x1f5d   :  { %v3413_v35 = vmul.f32 %v3910_v47, %v3401_v48  ;;  %vm3419_vm7 = vweird.f32 %v3910_v47 }
0x1f5e   :  { %vm3420_vm11 = vmor %vm3418_vm10, %vm3419_vm7 }
0x1f5f   :  { %v3414_v36 = vmul.f32 %v3910_v47, %v3413_v35 }
0x1f61   :  { %v3415_v37 = vmul.f32 0.5, %v3414_v36 }
0x1f63   :  { %v3416_v30 = vsub.f32 1.5, %v3415_v37 }
0x1f65   :  { %v3417_v10 = vmul.f32 %v3910_v47, %v3416_v30 }
0x1f67   :  { %v3421_v15 = vsel %vm3420_vm11, %v3910_v47, %v3417_v10 }
0x1f68   :  { %v3423_v42 = vmul.f32 %v3421_v15, %v3389_v31 }
0x1f6a   :  { %v3428_v18 = vmul.f32 %v3754_v38, %v3423_v42 }
0x1f6c   :  { %v3433_v46 = vadd.f32 %v3755_v41, %v3428_v18 }
0x1f6e   :  { %v3438_v8 = vrot.slane %v3433_v46, 6 }
0x1f70   :  { %v3441_v51 = vsel %vm3440_vm13, %v3435_v50, %v3438_v8 }
0x1f71   :  { %3678 = vmatmul.msk.f32.vlgmr.msrb.gmra.mxu3 %vm107_vm0, %v3441_v51 }
0x1ff4   :  { %v3470_v59 = vpop.f32.mrf.mxu3 }
0x1ff5   :  { %v3471_v54 = vadd.f32 %v3756_v53, %v3470_v59 }
0x1ff7   :  { %3474 = vst.msk [vmem:[%s5167_s5] sm:$0x3] %vm3473_vm12, %v3471_v54 }
0x1ff8   :  { %3479 = vsyncpa [#allocation4], 1 }

</bundles_post_ra>
